<compile_context>
chip_gen: v7x
topology: tpu7x:2x2x1
jax: 0.10.0
libtpu: 0.0.40
codegen_flags: <defaults>
</compile_context>

<pallas_src>
import functools

import jax
import jax.numpy as jnp
from jax.experimental import pallas as pl
from jax.experimental.pallas import tpu as pltpu

LEAKY = 0.1


# ----------------------------------------------------------------------------
# Fused DAB1D kernel: one grid step = TP lane-paired samples, all in VMEM.
# ----------------------------------------------------------------------------
def _dab1d_kernel(x_ref, v_ref, wl1_ref, wl2_ref, w1x1_ref, wconv_ref, b_ref,
                  o_ref, *, L):
    TPL, D = x_ref.shape           # (TP*L, 2C) — lane-paired activations
    TP = TPL // L
    f32 = jnp.float32

    def leaky(t):
        return jnp.where(t >= 0, t, LEAKY * t)

    x0 = x_ref[...]                # (TPL, D)
    v = v_ref[...]                 # (TP, D)  paired degradation embeddings

    # ---- all per-sample linears (dyn-kernel MLPs + CA attention), pair-packed ----
    s1 = leaky(jnp.dot(v, wl1_ref[...], preferred_element_type=f32))       # (TP, 4*n1)
    s2 = jnp.dot(s1, wl2_ref[...], preferred_element_type=f32)             # (TP, 8*D)

    def seg(g):                    # every consumed slice starts on a 128-lane multiple
        return s2[:, g * D:(g + 1) * D]

    def expand(d):                 # (TP, D) per-sample row -> (TP*L, D)
        return jnp.broadcast_to(d.reshape(TP, 1, D), (TP, L, D)).reshape(TPL, D)

    dk1 = (expand(seg(0)), expand(seg(1)), expand(seg(2)))
    att1 = expand(jax.nn.sigmoid(seg(3)))
    dk2 = (expand(seg(4)), expand(seg(5)), expand(seg(6)))
    att2 = expand(jax.nn.sigmoid(seg(7)))

    # ---- zero-halo masks along the flattened (pair * L) row axis (built once) ----
    rows = jax.lax.broadcasted_iota(jnp.int32, (TPL, D), 0)
    is_first = (rows % L) == 0
    is_last = (rows % L) == (L - 1)
    zrow = jnp.zeros((1, D), f32)

    def shifted(a):                # x[l-1], x[l+1] with per-sample zero padding
        a_prev = jnp.where(is_first, 0.0,
                           jnp.concatenate([zrow, a[:-1, :]], axis=0))
        a_next = jnp.where(is_last, 0.0,
                           jnp.concatenate([a[1:, :], zrow], axis=0))
        return a_prev, a_next

    def dyn_conv(a, dk):           # depthwise dynamic 3-tap conv (VPU)
        a_prev, a_next = shifted(a)
        return dk[0] * a_prev + dk[1] * a + dk[2] * a_next

    def conv1x1(a, w, b):
        return jnp.dot(a, w, preferred_element_type=f32) + b

    def conv3(a, base, b):         # dense K=3 conv = 3 accumulated MXU matmuls
        a_prev, a_next = shifted(a)
        acc = jnp.dot(a_prev, wconv_ref[base + 0], preferred_element_type=f32)
        acc = acc + jnp.dot(a, wconv_ref[base + 1], preferred_element_type=f32)
        acc = acc + jnp.dot(a_next, wconv_ref[base + 2], preferred_element_type=f32)
        return acc + b

    # ---- DA_conv1D #1  (+ DAB relu) ----
    t = leaky(dyn_conv(x0, dk1))
    h = leaky(conv1x1(t, w1x1_ref[0], b_ref[0]) + x0 * att1)
    # ---- conv1 + relu ----
    g = leaky(conv3(h, 0, b_ref[1]))
    # ---- DA_conv1D #2  (+ DAB relu) ----
    t2 = leaky(dyn_conv(g, dk2))
    h2 = leaky(conv1x1(t2, w1x1_ref[1], b_ref[2]) + g * att2)
    # ---- conv2 + residual ----
    o_ref[...] = conv3(h2, 3, b_ref[3]) + x0


# ----------------------------------------------------------------------------
# One-time weight packing (hoisted out of the per-call path).
# ----------------------------------------------------------------------------
def pack_dab1d_params(params):
    C = params["c1w"].shape[0]
    D = 2 * C
    da1, da2 = params["da1"], params["da2"]
    R = da1["ca_w1"].shape[0]
    n1 = C + R

    # per-sample stage-1: [kw1_da1 | ca_w1_da1 | kw1_da2 | ca_w1_da2]
    w_lin1 = jnp.concatenate([da1["kw1"].T, da1["ca_w1"].T,
                              da2["kw1"].T, da2["ca_w1"].T], axis=1)        # (C, 2*n1)

    def perm_kw2(kw2):             # out-features (c,k) -> (k,c): contiguous per-tap slices
        return kw2.reshape(C, 3, C).transpose(1, 0, 2).reshape(3 * C, C)

    # per-sample stage-2 block-diagonal, columns = 8 segments of width C:
    # [dk1_k0 | dk1_k1 | dk1_k2 | att1 | dk2_k0 | dk2_k1 | dk2_k2 | att2]
    w_lin2 = jnp.zeros((2 * n1, 8 * C), jnp.float32)
    w_lin2 = w_lin2.at[0:C, 0:3 * C].set(perm_kw2(da1["kw2"]).T)
    w_lin2 = w_lin2.at[C:n1, 3 * C:4 * C].set(da1["ca_w2"].T)
    w_lin2 = w_lin2.at[n1:n1 + C, 4 * C:7 * C].set(perm_kw2(da2["kw2"]).T)
    w_lin2 = w_lin2.at[n1 + C:2 * n1, 7 * C:8 * C].set(da2["ca_w2"].T)

    # paired (lane-packed) stage-1: block_diag(w_lin1, w_lin1)
    wl1_pair = jnp.zeros((D, 4 * n1), jnp.float32)
    wl1_pair = wl1_pair.at[0:C, 0:2 * n1].set(w_lin1)
    wl1_pair = wl1_pair.at[C:D, 2 * n1:4 * n1].set(w_lin1)

    # paired stage-2: segment g of sample a lands at lanes [g*D, g*D+C), of sample b
    # at [g*D+C, (g+1)*D) — every slice consumed in-kernel is 128-lane aligned.
    wl2_pair = jnp.zeros((4 * n1, 8 * D), jnp.float32)
    for g in range(8):
        seg = w_lin2[:, g * C:(g + 1) * C]
        wl2_pair = wl2_pair.at[0:2 * n1, g * D:g * D + C].set(seg)
        wl2_pair = wl2_pair.at[2 * n1:4 * n1, g * D + C:(g + 1) * D].set(seg)

    def pair_sq(w):                # (out,in) -> paired block-diag (D,D) acting as a @ W
        wp = jnp.zeros((D, D), jnp.float32)
        wp = wp.at[0:C, 0:C].set(w.T)
        wp = wp.at[C:D, C:D].set(w.T)
        return wp

    w_1x1 = jnp.stack([pair_sq(da1["cw"]), pair_sq(da2["cw"])], axis=0)      # (2, D, D)
    w_conv = jnp.stack([pair_sq(params["c1w"][:, :, 0]),
                        pair_sq(params["c1w"][:, :, 1]),
                        pair_sq(params["c1w"][:, :, 2]),
                        pair_sq(params["c2w"][:, :, 0]),
                        pair_sq(params["c2w"][:, :, 1]),
                        pair_sq(params["c2w"][:, :, 2])], axis=0)            # (6, D, D)

    def pair_b(b):
        return jnp.concatenate([b, b]).reshape(1, D)

    biases = jnp.stack([pair_b(da1["cb"]), pair_b(params["c1b"]),
                        pair_b(da2["cb"]), pair_b(params["c2b"])], axis=0)   # (4, 1, D)

    return dict(wl1=wl1_pair, wl2=wl2_pair, w1x1=w_1x1, wconv=w_conv, b=biases)


# ----------------------------------------------------------------------------
# Wrapper: lane-pairing layout plumbing + one pallas_call.
# ----------------------------------------------------------------------------
def dab1d_forward(packed, x0, v, *, pairs_per_step=8):
    """x0: (B, C, L) float32, v: (B, 64) float32  ->  (B, C, L).

    pairs_per_step (TP) should be a multiple of 8; TP*L is the matmul M per step
    (TP=8 -> M=128 for v5e, TP=16 -> M=256 for v6e/v7x).
    """
    B, C, L = x0.shape
    D = 2 * C
    TP = int(pairs_per_step)
    TB = 2 * TP                                     # samples per grid step

    Bp = ((B + TB - 1) // TB) * TB                  # pad batch to whole steps
    if Bp != B:
        x0 = jnp.concatenate([x0, jnp.zeros((Bp - B, C, L), x0.dtype)], axis=0)
        v = jnp.concatenate([v, jnp.zeros((Bp - B, v.shape[1]), v.dtype)], axis=0)
    B2 = Bp // 2
    steps = B2 // TP

    # lane-pair consecutive samples: channels of sample 2p at lanes [0:C],
    # channels of sample 2p+1 at lanes [C:2C]; flatten (pair, L) onto sublanes.
    x_pair = jnp.transpose(x0, (0, 2, 1)).reshape(B2, 2, L, C)
    x_pair = jnp.transpose(x_pair, (0, 2, 1, 3)).reshape(B2 * L, D)
    v_pair = v.reshape(B2, D)

    kern = functools.partial(_dab1d_kernel, L=L)
    out_flat = pl.pallas_call(
        kern,
        out_shape=jax.ShapeDtypeStruct((B2 * L, D), jnp.float32),
        grid=(steps,),
        in_specs=[
            pl.BlockSpec((TP * L, D), lambda s: (s, 0)),          # paired activations
            pl.BlockSpec((TP, D), lambda s: (s, 0)),              # paired embeddings
            pl.BlockSpec(packed["wl1"].shape, lambda s: (0, 0)),  # stage-1 linear
            pl.BlockSpec(packed["wl2"].shape, lambda s: (0, 0)),  # stage-2 linear
            pl.BlockSpec(packed["w1x1"].shape, lambda s: (0, 0, 0)),   # 1x1 convs
            pl.BlockSpec(packed["wconv"].shape, lambda s: (0, 0, 0)),  # K=3 conv taps
            pl.BlockSpec(packed["b"].shape, lambda s: (0, 0, 0)),      # biases
        ],
        out_specs=pl.BlockSpec((TP * L, D), lambda s: (s, 0)),
        compiler_params=pltpu.CompilerParams(
            dimension_semantics=("parallel",),
            vmem_limit_bytes=32 * 1024 * 1024),
    )(x_pair, v_pair, packed["wl1"], packed["wl2"], packed["w1x1"],
      packed["wconv"], packed["b"])

    out = out_flat.reshape(B2, L, 2, C)
    out = jnp.transpose(out, (0, 2, 1, 3)).reshape(Bp, L, C)
    out = jnp.transpose(out, (0, 2, 1))
    return out[:B]


# ----------------------------------------------------------------------------
# Pure-JAX reference (PyTorch semantics) for the correctness check.
# ----------------------------------------------------------------------------
def _leaky(x):
    return jnp.where(x >= 0, x, LEAKY * x)


def _ref_da_conv(x0, v, p):
    B, C, L = x0.shape
    hi = jax.lax.Precision.HIGHEST
    h = _leaky(jnp.dot(v, p["kw1"].T, precision=hi))
    dk = jnp.dot(h, p["kw2"].T, precision=hi).reshape(B, C, 3)
    xpad = jnp.pad(x0, ((0, 0), (0, 0), (1, 1)))
    t = (dk[:, :, 0:1] * xpad[:, :, 0:L] + dk[:, :, 1:2] * xpad[:, :, 1:L + 1]
         + dk[:, :, 2:3] * xpad[:, :, 2:L + 2])
    t = _leaky(t)
    u = jnp.einsum("oi,bil->bol", p["cw"], t, precision=hi) + p["cb"][None, :, None]
    a = _leaky(jnp.dot(v, p["ca_w1"].T, precision=hi))
    att = jax.nn.sigmoid(jnp.dot(a, p["ca_w2"].T, precision=hi))
    return u + x0 * att[:, :, None]


def _ref_conv3(x, w, b):
    B, C, L = x.shape
    hi = jax.lax.Precision.HIGHEST
    xpad = jnp.pad(x, ((0, 0), (0, 0), (1, 1)))
    out = jnp.broadcast_to(b[None, :, None], (B, w.shape[0], L))
    for k in range(3):
        out = out + jnp.einsum("oi,bil->bol", w[:, :, k], xpad[:, :, k:k + L],
                               precision=hi)
    return out


def ref_dab1d(params, x0, v):
    out = _leaky(_ref_da_conv(x0, v, params["da1"]))
    out = _leaky(_ref_conv3(out, params["c1w"], params["c1b"]))
    out = _leaky(_ref_da_conv(out, v, params["da2"]))
    return _ref_conv3(out, params["c2w"], params["c2b"]) + x0


# ----------------------------------------------------------------------------
if __name__ == "__main__":
    key = jax.random.PRNGKey(0)
    ks = jax.random.split(key, 16)

    # n_feat = 64 is forced by DA_conv1D's hard-coded nn.Linear(64, ...); reduction = 8.
    # B=32 with TP=8 pairs/step -> TB=16 samples/step, grid=(2,) (both TCs on v7x).
    B, C, L = 32, 64, 16

    def w(k, shape, s=0.1):
        return jax.random.normal(k, shape, jnp.float32) * jnp.float32(s)

    def init_da(k):
        kk = jax.random.split(k, 6)
        return dict(
            kw1=w(kk[0], (C, C)),            # Linear(64, 64, bias=False)
            kw2=w(kk[1], (3 * C, C)),        # Linear(64, 64*3, bias=False)
            cw=w(kk[2], (C, C)),             # Conv1d(64, 64, 1) weight (kernel dim squeezed)
            cb=w(kk[3], (C,)),
            ca_w1=w(kk[4], (C // 8, C)),     # Conv1d(64, 8, 1, bias=False)
            ca_w2=w(kk[5], (C, C // 8)),     # Conv1d(8, 64, 1, bias=False)
        )

    params = dict(
        da1=init_da(ks[0]), da2=init_da(ks[1]),
        c1w=w(ks[2], (C, C, 3)), c1b=w(ks[3], (C,)),   # default_conv(64, 64, 3)
        c2w=w(ks[4], (C, C, 3)), c2b=w(ks[5], (C,)),
    )
    x0 = jax.random.normal(ks[6], (B, C, L), jnp.float32)   # x[0]
    v = jax.random.normal(ks[7], (B, C), jnp.float32)       # x[1] (degradation embedding)

    packed = pack_dab1d_params(params)                      # one-time init (hoisted)

    fwd = jax.jit(dab1d_forward)
    out = fwd(packed, x0, v)
    jax.block_until_ready(out)

    ref = ref_dab1d(params, x0, v)
    assert out.shape == (B, C, L), out.shape
    assert bool(jnp.all(jnp.isfinite(out)))
    assert bool(jnp.allclose(out, ref, rtol=1e-2, atol=1e-2)), \
        float(jnp.max(jnp.abs(out - ref)))
    print("KERNEL_OK")
</pallas_src>

<mosaic_0001>
module attributes {stable_mosaic.version = 11 : i64} {
  func.func @_dab1d_kernel(%arg0: i32, %arg1: memref<128x128xf32, #tpu.memory_space<vmem>>, %arg2: memref<8x128xf32, #tpu.memory_space<vmem>>, %arg3: memref<128x288xf32, #tpu.memory_space<vmem>>, %arg4: memref<288x1024xf32, #tpu.memory_space<vmem>>, %arg5: memref<2x128x128xf32, #tpu.memory_space<vmem>>, %arg6: memref<6x128x128xf32, #tpu.memory_space<vmem>>, %arg7: memref<4x1x128xf32, #tpu.memory_space<vmem>>, %arg8: memref<128x128xf32, #tpu.memory_space<vmem>>) attributes {dimension_semantics = [#tpu.dimension_semantics<parallel>], iteration_bounds = array<i64: 2>, scalar_prefetch = 0 : i64, scratch_operands = 0 : i64, tpu.core_type = #tpu.core_type<tc>, window_params = [{transform_indices = @transform_0, window_bounds = array<i64: 128, 128>}, {transform_indices = @transform_1, window_bounds = array<i64: 8, 128>}, {pipeline_mode = #tpu.pipeline_mode<synchronous>, transform_indices = @transform_2, window_bounds = array<i64: 128, 288>}, {pipeline_mode = #tpu.pipeline_mode<synchronous>, transform_indices = @transform_3, window_bounds = array<i64: 288, 1024>}, {pipeline_mode = #tpu.pipeline_mode<synchronous>, transform_indices = @transform_4, window_bounds = array<i64: 2, 128, 128>}, {pipeline_mode = #tpu.pipeline_mode<synchronous>, transform_indices = @transform_5, window_bounds = array<i64: 6, 128, 128>}, {pipeline_mode = #tpu.pipeline_mode<synchronous>, transform_indices = @transform_6, window_bounds = array<i64: 4, 1, 128>}, {transform_indices = @transform_7, window_bounds = array<i64: 128, 128>}]} {
    %c0 = arith.constant 0 : index
    %c0_0 = arith.constant 0 : index
    %0 = vector.load %arg1[%c0, %c0_0] : memref<128x128xf32, #tpu.memory_space<vmem>>, vector<128x128xf32>
    %c0_1 = arith.constant 0 : index
    %c0_2 = arith.constant 0 : index
    %1 = vector.load %arg2[%c0_1, %c0_2] : memref<8x128xf32, #tpu.memory_space<vmem>>, vector<8x128xf32>
    %c0_3 = arith.constant 0 : index
    %c0_4 = arith.constant 0 : index
    %2 = vector.load %arg3[%c0_3, %c0_4] : memref<128x288xf32, #tpu.memory_space<vmem>>, vector<128x288xf32>
    %cst = arith.constant dense<0.000000e+00> : vector<8x288xf32>
    %3 = tpu.matmul %1, %2, %cst {dimension_numbers = #tpu.dot_dimension_numbers<[1], [0], [0], [1], [0, 0, 1, 1], [], []>} : vector<8x128xf32>, vector<128x288xf32>, vector<8x288xf32> -> vector<8x288xf32>
    %cst_5 = arith.constant 0.000000e+00 : f32
    %4 = vector.broadcast %cst_5 : f32 to vector<8x288xf32>
    %5 = arith.cmpf oge, %3, %4 : vector<8x288xf32>
    %cst_6 = arith.constant 1.000000e-01 : f32
    %6 = vector.broadcast %cst_6 : f32 to vector<8x288xf32>
    %7 = arith.mulf %6, %3 : vector<8x288xf32>
    %8 = arith.select %5, %3, %7 : vector<8x288xi1>, vector<8x288xf32>
    %c0_7 = arith.constant 0 : index
    %c0_8 = arith.constant 0 : index
    %9 = vector.load %arg4[%c0_7, %c0_8] : memref<288x1024xf32, #tpu.memory_space<vmem>>, vector<288x1024xf32>
    %cst_9 = arith.constant dense<0.000000e+00> : vector<8x1024xf32>
    %10 = tpu.matmul %8, %9, %cst_9 {dimension_numbers = #tpu.dot_dimension_numbers<[1], [0], [0], [1], [0, 0, 1, 1], [], []>} : vector<8x288xf32>, vector<288x1024xf32>, vector<8x1024xf32> -> vector<8x1024xf32>
    %11 = vector.extract_strided_slice %10 {offsets = [0, 0], sizes = [8, 128], strides = [1, 1]} : vector<8x1024xf32> to vector<8x128xf32>
    %12 = vector.shape_cast %11 : vector<8x128xf32> to vector<8x1x128xf32>
    %13 = vector.shape_cast %12 : vector<8x1x128xf32> to vector<8x1x128xf32>
    %14 = vector.broadcast %13 : vector<8x1x128xf32> to vector<8x16x128xf32>
    %15 = vector.shape_cast %14 : vector<8x16x128xf32> to vector<128x128xf32>
    %16 = vector.extract_strided_slice %10 {offsets = [0, 128], sizes = [8, 128], strides = [1, 1]} : vector<8x1024xf32> to vector<8x128xf32>
    %17 = vector.shape_cast %16 : vector<8x128xf32> to vector<8x1x128xf32>
    %18 = vector.shape_cast %17 : vector<8x1x128xf32> to vector<8x1x128xf32>
    %19 = vector.broadcast %18 : vector<8x1x128xf32> to vector<8x16x128xf32>
    %20 = vector.shape_cast %19 : vector<8x16x128xf32> to vector<128x128xf32>
    %21 = vector.extract_strided_slice %10 {offsets = [0, 256], sizes = [8, 128], strides = [1, 1]} : vector<8x1024xf32> to vector<8x128xf32>
    %22 = vector.shape_cast %21 : vector<8x128xf32> to vector<8x1x128xf32>
    %23 = vector.shape_cast %22 : vector<8x1x128xf32> to vector<8x1x128xf32>
    %24 = vector.broadcast %23 : vector<8x1x128xf32> to vector<8x16x128xf32>
    %25 = vector.shape_cast %24 : vector<8x16x128xf32> to vector<128x128xf32>
    %26 = vector.extract_strided_slice %10 {offsets = [0, 384], sizes = [8, 128], strides = [1, 1]} : vector<8x1024xf32> to vector<8x128xf32>
    %27 = arith.negf %26 : vector<8x128xf32>
    %28 = math.exp %27 : vector<8x128xf32>
    %cst_10 = arith.constant 1.000000e+00 : f32
    %29 = vector.broadcast %cst_10 : f32 to vector<8x128xf32>
    %30 = arith.addf %29, %28 : vector<8x128xf32>
    %31 = arith.divf %29, %30 : vector<8x128xf32>
    %32 = vector.shape_cast %31 : vector<8x128xf32> to vector<8x1x128xf32>
    %33 = vector.shape_cast %32 : vector<8x1x128xf32> to vector<8x1x128xf32>
    %34 = vector.broadcast %33 : vector<8x1x128xf32> to vector<8x16x128xf32>
    %35 = vector.shape_cast %34 : vector<8x16x128xf32> to vector<128x128xf32>
    %36 = vector.extract_strided_slice %10 {offsets = [0, 512], sizes = [8, 128], strides = [1, 1]} : vector<8x1024xf32> to vector<8x128xf32>
    %37 = vector.shape_cast %36 : vector<8x128xf32> to vector<8x1x128xf32>
    %38 = vector.shape_cast %37 : vector<8x1x128xf32> to vector<8x1x128xf32>
    %39 = vector.broadcast %38 : vector<8x1x128xf32> to vector<8x16x128xf32>
    %40 = vector.shape_cast %39 : vector<8x16x128xf32> to vector<128x128xf32>
    %41 = vector.extract_strided_slice %10 {offsets = [0, 640], sizes = [8, 128], strides = [1, 1]} : vector<8x1024xf32> to vector<8x128xf32>
    %42 = vector.shape_cast %41 : vector<8x128xf32> to vector<8x1x128xf32>
    %43 = vector.shape_cast %42 : vector<8x1x128xf32> to vector<8x1x128xf32>
    %44 = vector.broadcast %43 : vector<8x1x128xf32> to vector<8x16x128xf32>
    %45 = vector.shape_cast %44 : vector<8x16x128xf32> to vector<128x128xf32>
    %46 = vector.extract_strided_slice %10 {offsets = [0, 768], sizes = [8, 128], strides = [1, 1]} : vector<8x1024xf32> to vector<8x128xf32>
    %47 = vector.shape_cast %46 : vector<8x128xf32> to vector<8x1x128xf32>
    %48 = vector.shape_cast %47 : vector<8x1x128xf32> to vector<8x1x128xf32>
    %49 = vector.broadcast %48 : vector<8x1x128xf32> to vector<8x16x128xf32>
    %50 = vector.shape_cast %49 : vector<8x16x128xf32> to vector<128x128xf32>
    %51 = vector.extract_strided_slice %10 {offsets = [0, 896], sizes = [8, 128], strides = [1, 1]} : vector<8x1024xf32> to vector<8x128xf32>
    %52 = arith.negf %51 : vector<8x128xf32>
    %53 = math.exp %52 : vector<8x128xf32>
    %cst_11 = arith.constant 1.000000e+00 : f32
    %54 = vector.broadcast %cst_11 : f32 to vector<8x128xf32>
    %55 = arith.addf %54, %53 : vector<8x128xf32>
    %56 = arith.divf %54, %55 : vector<8x128xf32>
    %57 = vector.shape_cast %56 : vector<8x128xf32> to vector<8x1x128xf32>
    %58 = vector.shape_cast %57 : vector<8x1x128xf32> to vector<8x1x128xf32>
    %59 = vector.broadcast %58 : vector<8x1x128xf32> to vector<8x16x128xf32>
    %60 = vector.shape_cast %59 : vector<8x16x128xf32> to vector<128x128xf32>
    %61 = tpu.iota {dimensions = array<i32: 0>} : vector<128x128xi32>
    %c16_i32 = arith.constant 16 : i32
    %c0_i32 = arith.constant 0 : i32
    %62 = arith.cmpi eq, %c16_i32, %c0_i32 : i32
    %c1_i32 = arith.constant 1 : i32
    %63 = arith.select %62, %c1_i32, %c16_i32 : i32
    %64 = vector.broadcast %63 : i32 to vector<128x128xi32>
    %65 = arith.remsi %61, %64 : vector<128x128xi32>
    %c0_i32_12 = arith.constant 0 : i32
    %66 = vector.broadcast %c0_i32_12 : i32 to vector<128x128xi32>
    %67 = arith.cmpi ne, %65, %66 : vector<128x128xi32>
    %c0_i32_13 = arith.constant 0 : i32
    %68 = vector.broadcast %c0_i32_13 : i32 to vector<128x128xi32>
    %69 = arith.cmpi slt, %65, %68 : vector<128x128xi32>
    %c0_i32_14 = arith.constant 0 : i32
    %70 = arith.cmpi slt, %63, %c0_i32_14 : i32
    %71 = vector.broadcast %70 : i1 to vector<128x128xi1>
    %72 = vector.broadcast %71 : vector<128x128xi1> to vector<128x128xi1>
    %73 = arith.xori %69, %72 : vector<128x128xi1>
    %74 = arith.andi %73, %67 : vector<128x128xi1>
    %75 = vector.broadcast %63 : i32 to vector<128x128xi32>
    %76 = arith.addi %65, %75 : vector<128x128xi32>
    %77 = arith.select %74, %76, %65 : vector<128x128xi1>, vector<128x128xi32>
    %c0_i32_15 = arith.constant 0 : i32
    %78 = vector.broadcast %c0_i32_15 : i32 to vector<128x128xi32>
    %79 = arith.cmpi eq, %77, %78 : vector<128x128xi32>
    %c16_i32_16 = arith.constant 16 : i32
    %c0_i32_17 = arith.constant 0 : i32
    %80 = arith.cmpi eq, %c16_i32_16, %c0_i32_17 : i32
    %c1_i32_18 = arith.constant 1 : i32
    %81 = arith.select %80, %c1_i32_18, %c16_i32_16 : i32
    %82 = vector.broadcast %81 : i32 to vector<128x128xi32>
    %83 = arith.remsi %61, %82 : vector<128x128xi32>
    %c0_i32_19 = arith.constant 0 : i32
    %84 = vector.broadcast %c0_i32_19 : i32 to vector<128x128xi32>
    %85 = arith.cmpi ne, %83, %84 : vector<128x128xi32>
    %c0_i32_20 = arith.constant 0 : i32
    %86 = vector.broadcast %c0_i32_20 : i32 to vector<128x128xi32>
    %87 = arith.cmpi slt, %83, %86 : vector<128x128xi32>
    %c0_i32_21 = arith.constant 0 : i32
    %88 = arith.cmpi slt, %81, %c0_i32_21 : i32
    %89 = vector.broadcast %88 : i1 to vector<128x128xi1>
    %90 = vector.broadcast %89 : vector<128x128xi1> to vector<128x128xi1>
    %91 = arith.xori %87, %90 : vector<128x128xi1>
    %92 = arith.andi %91, %85 : vector<128x128xi1>
    %93 = vector.broadcast %81 : i32 to vector<128x128xi32>
    %94 = arith.addi %83, %93 : vector<128x128xi32>
    %95 = arith.select %92, %94, %83 : vector<128x128xi1>, vector<128x128xi32>
    %c15_i32 = arith.constant 15 : i32
    %96 = vector.broadcast %c15_i32 : i32 to vector<128x128xi32>
    %97 = arith.cmpi eq, %95, %96 : vector<128x128xi32>
    %cst_22 = arith.constant 0.000000e+00 : f32
    %98 = vector.broadcast %cst_22 : f32 to vector<1x128xf32>
    %99 = vector.extract_strided_slice %0 {offsets = [0, 0], sizes = [127, 128], strides = [1, 1]} : vector<128x128xf32> to vector<127x128xf32>
    %100 = tpu.concatenate %98, %99 in 0 : vector<1x128xf32>, vector<127x128xf32> -> vector<128x128xf32>
    %cst_23 = arith.constant 0.000000e+00 : f32
    %101 = vector.broadcast %cst_23 : f32 to vector<128x128xf32>
    %102 = arith.select %79, %101, %100 : vector<128x128xi1>, vector<128x128xf32>
    %103 = vector.extract_strided_slice %0 {offsets = [1, 0], sizes = [127, 128], strides = [1, 1]} : vector<128x128xf32> to vector<127x128xf32>
    %104 = tpu.concatenate %103, %98 in 0 : vector<127x128xf32>, vector<1x128xf32> -> vector<128x128xf32>
    %cst_24 = arith.constant 0.000000e+00 : f32
    %105 = vector.broadcast %cst_24 : f32 to vector<128x128xf32>
    %106 = arith.select %97, %105, %104 : vector<128x128xi1>, vector<128x128xf32>
    %107 = arith.mulf %15, %102 : vector<128x128xf32>
    %108 = arith.mulf %20, %0 : vector<128x128xf32>
    %109 = arith.addf %107, %108 : vector<128x128xf32>
    %110 = arith.mulf %25, %106 : vector<128x128xf32>
    %111 = arith.addf %109, %110 : vector<128x128xf32>
    %cst_25 = arith.constant 0.000000e+00 : f32
    %112 = vector.broadcast %cst_25 : f32 to vector<128x128xf32>
    %113 = arith.cmpf oge, %111, %112 : vector<128x128xf32>
    %cst_26 = arith.constant 1.000000e-01 : f32
    %114 = vector.broadcast %cst_26 : f32 to vector<128x128xf32>
    %115 = arith.mulf %114, %111 : vector<128x128xf32>
    %116 = arith.select %113, %111, %115 : vector<128x128xi1>, vector<128x128xf32>
    %c0_27 = arith.constant 0 : index
    %c0_28 = arith.constant 0 : index
    %c0_29 = arith.constant 0 : index
    %117 = vector.load %arg5[%c0_27, %c0_28, %c0_29] : memref<2x128x128xf32, #tpu.memory_space<vmem>>, vector<1x128x128xf32>
    %118 = vector.shape_cast %117 : vector<1x128x128xf32> to vector<128x128xf32>
    %c0_30 = arith.constant 0 : index
    %c0_31 = arith.constant 0 : index
    %c0_32 = arith.constant 0 : index
    %119 = vector.load %arg7[%c0_30, %c0_31, %c0_32] : memref<4x1x128xf32, #tpu.memory_space<vmem>>, vector<1x1x128xf32>
    %120 = vector.shape_cast %119 : vector<1x1x128xf32> to vector<1x128xf32>
    %cst_33 = arith.constant dense<0.000000e+00> : vector<128x128xf32>
    %121 = tpu.matmul %116, %118, %cst_33 {dimension_numbers = #tpu.dot_dimension_numbers<[1], [0], [0], [1], [0, 0, 1, 1], [], []>} : vector<128x128xf32>, vector<128x128xf32>, vector<128x128xf32> -> vector<128x128xf32>
    %122 = vector.broadcast %120 : vector<1x128xf32> to vector<128x128xf32>
    %123 = arith.addf %121, %122 : vector<128x128xf32>
    %124 = arith.mulf %0, %35 : vector<128x128xf32>
    %125 = arith.addf %123, %124 : vector<128x128xf32>
    %cst_34 = arith.constant 0.000000e+00 : f32
    %126 = vector.broadcast %cst_34 : f32 to vector<128x128xf32>
    %127 = arith.cmpf oge, %125, %126 : vector<128x128xf32>
    %cst_35 = arith.constant 1.000000e-01 : f32
    %128 = vector.broadcast %cst_35 : f32 to vector<128x128xf32>
    %129 = arith.mulf %128, %125 : vector<128x128xf32>
    %130 = arith.select %127, %125, %129 : vector<128x128xi1>, vector<128x128xf32>
    %c1 = arith.constant 1 : index
    %c0_36 = arith.constant 0 : index
    %c0_37 = arith.constant 0 : index
    %131 = vector.load %arg7[%c1, %c0_36, %c0_37] : memref<4x1x128xf32, #tpu.memory_space<vmem>>, vector<1x1x128xf32>
    %132 = vector.shape_cast %131 : vector<1x1x128xf32> to vector<1x128xf32>
    %133 = vector.extract_strided_slice %130 {offsets = [0, 0], sizes = [127, 128], strides = [1, 1]} : vector<128x128xf32> to vector<127x128xf32>
    %134 = tpu.concatenate %98, %133 in 0 : vector<1x128xf32>, vector<127x128xf32> -> vector<128x128xf32>
    %cst_38 = arith.constant 0.000000e+00 : f32
    %135 = vector.broadcast %cst_38 : f32 to vector<128x128xf32>
    %136 = arith.select %79, %135, %134 : vector<128x128xi1>, vector<128x128xf32>
    %137 = vector.extract_strided_slice %130 {offsets = [1, 0], sizes = [127, 128], strides = [1, 1]} : vector<128x128xf32> to vector<127x128xf32>
    %138 = tpu.concatenate %137, %98 in 0 : vector<127x128xf32>, vector<1x128xf32> -> vector<128x128xf32>
    %cst_39 = arith.constant 0.000000e+00 : f32
    %139 = vector.broadcast %cst_39 : f32 to vector<128x128xf32>
    %140 = arith.select %97, %139, %138 : vector<128x128xi1>, vector<128x128xf32>
    %c0_40 = arith.constant 0 : index
    %c0_41 = arith.constant 0 : index
    %c0_42 = arith.constant 0 : index
    %141 = vector.load %arg6[%c0_40, %c0_41, %c0_42] : memref<6x128x128xf32, #tpu.memory_space<vmem>>, vector<1x128x128xf32>
    %142 = vector.shape_cast %141 : vector<1x128x128xf32> to vector<128x128xf32>
    %cst_43 = arith.constant dense<0.000000e+00> : vector<128x128xf32>
    %143 = tpu.matmul %136, %142, %cst_43 {dimension_numbers = #tpu.dot_dimension_numbers<[1], [0], [0], [1], [0, 0, 1, 1], [], []>} : vector<128x128xf32>, vector<128x128xf32>, vector<128x128xf32> -> vector<128x128xf32>
    %c1_44 = arith.constant 1 : index
    %c0_45 = arith.constant 0 : index
    %c0_46 = arith.constant 0 : index
    %144 = vector.load %arg6[%c1_44, %c0_45, %c0_46] : memref<6x128x128xf32, #tpu.memory_space<vmem>>, vector<1x128x128xf32>
    %145 = vector.shape_cast %144 : vector<1x128x128xf32> to vector<128x128xf32>
    %cst_47 = arith.constant dense<0.000000e+00> : vector<128x128xf32>
    %146 = tpu.matmul %130, %145, %cst_47 {dimension_numbers = #tpu.dot_dimension_numbers<[1], [0], [0], [1], [0, 0, 1, 1], [], []>} : vector<128x128xf32>, vector<128x128xf32>, vector<128x128xf32> -> vector<128x128xf32>
    %147 = arith.addf %143, %146 : vector<128x128xf32>
    %c2 = arith.constant 2 : index
    %c0_48 = arith.constant 0 : index
    %c0_49 = arith.constant 0 : index
    %148 = vector.load %arg6[%c2, %c0_48, %c0_49] : memref<6x128x128xf32, #tpu.memory_space<vmem>>, vector<1x128x128xf32>
    %149 = vector.shape_cast %148 : vector<1x128x128xf32> to vector<128x128xf32>
    %cst_50 = arith.constant dense<0.000000e+00> : vector<128x128xf32>
    %150 = tpu.matmul %140, %149, %cst_50 {dimension_numbers = #tpu.dot_dimension_numbers<[1], [0], [0], [1], [0, 0, 1, 1], [], []>} : vector<128x128xf32>, vector<128x128xf32>, vector<128x128xf32> -> vector<128x128xf32>
    %151 = arith.addf %147, %150 : vector<128x128xf32>
    %152 = vector.broadcast %132 : vector<1x128xf32> to vector<128x128xf32>
    %153 = arith.addf %151, %152 : vector<128x128xf32>
    %cst_51 = arith.constant 0.000000e+00 : f32
    %154 = vector.broadcast %cst_51 : f32 to vector<128x128xf32>
    %155 = arith.cmpf oge, %153, %154 : vector<128x128xf32>
    %cst_52 = arith.constant 1.000000e-01 : f32
    %156 = vector.broadcast %cst_52 : f32 to vector<128x128xf32>
    %157 = arith.mulf %156, %153 : vector<128x128xf32>
    %158 = arith.select %155, %153, %157 : vector<128x128xi1>, vector<128x128xf32>
    %159 = vector.extract_strided_slice %158 {offsets = [0, 0], sizes = [127, 128], strides = [1, 1]} : vector<128x128xf32> to vector<127x128xf32>
    %160 = tpu.concatenate %98, %159 in 0 : vector<1x128xf32>, vector<127x128xf32> -> vector<128x128xf32>
    %cst_53 = arith.constant 0.000000e+00 : f32
    %161 = vector.broadcast %cst_53 : f32 to vector<128x128xf32>
    %162 = arith.select %79, %161, %160 : vector<128x128xi1>, vector<128x128xf32>
    %163 = vector.extract_strided_slice %158 {offsets = [1, 0], sizes = [127, 128], strides = [1, 1]} : vector<128x128xf32> to vector<127x128xf32>
    %164 = tpu.concatenate %163, %98 in 0 : vector<127x128xf32>, vector<1x128xf32> -> vector<128x128xf32>
    %cst_54 = arith.constant 0.000000e+00 : f32
    %165 = vector.broadcast %cst_54 : f32 to vector<128x128xf32>
    %166 = arith.select %97, %165, %164 : vector<128x128xi1>, vector<128x128xf32>
    %167 = arith.mulf %40, %162 : vector<128x128xf32>
    %168 = arith.mulf %45, %158 : vector<128x128xf32>
    %169 = arith.addf %167, %168 : vector<128x128xf32>
    %170 = arith.mulf %50, %166 : vector<128x128xf32>
    %171 = arith.addf %169, %170 : vector<128x128xf32>
    %cst_55 = arith.constant 0.000000e+00 : f32
    %172 = vector.broadcast %cst_55 : f32 to vector<128x128xf32>
    %173 = arith.cmpf oge, %171, %172 : vector<128x128xf32>
    %cst_56 = arith.constant 1.000000e-01 : f32
    %174 = vector.broadcast %cst_56 : f32 to vector<128x128xf32>
    %175 = arith.mulf %174, %171 : vector<128x128xf32>
    %176 = arith.select %173, %171, %175 : vector<128x128xi1>, vector<128x128xf32>
    %c1_57 = arith.constant 1 : index
    %c0_58 = arith.constant 0 : index
    %c0_59 = arith.constant 0 : index
    %177 = vector.load %arg5[%c1_57, %c0_58, %c0_59] : memref<2x128x128xf32, #tpu.memory_space<vmem>>, vector<1x128x128xf32>
    %178 = vector.shape_cast %177 : vector<1x128x128xf32> to vector<128x128xf32>
    %c2_60 = arith.constant 2 : index
    %c0_61 = arith.constant 0 : index
    %c0_62 = arith.constant 0 : index
    %179 = vector.load %arg7[%c2_60, %c0_61, %c0_62] : memref<4x1x128xf32, #tpu.memory_space<vmem>>, vector<1x1x128xf32>
    %180 = vector.shape_cast %179 : vector<1x1x128xf32> to vector<1x128xf32>
    %cst_63 = arith.constant dense<0.000000e+00> : vector<128x128xf32>
    %181 = tpu.matmul %176, %178, %cst_63 {dimension_numbers = #tpu.dot_dimension_numbers<[1], [0], [0], [1], [0, 0, 1, 1], [], []>} : vector<128x128xf32>, vector<128x128xf32>, vector<128x128xf32> -> vector<128x128xf32>
    %182 = vector.broadcast %180 : vector<1x128xf32> to vector<128x128xf32>
    %183 = arith.addf %181, %182 : vector<128x128xf32>
    %184 = arith.mulf %158, %60 : vector<128x128xf32>
    %185 = arith.addf %183, %184 : vector<128x128xf32>
    %cst_64 = arith.constant 0.000000e+00 : f32
    %186 = vector.broadcast %cst_64 : f32 to vector<128x128xf32>
    %187 = arith.cmpf oge, %185, %186 : vector<128x128xf32>
    %cst_65 = arith.constant 1.000000e-01 : f32
    %188 = vector.broadcast %cst_65 : f32 to vector<128x128xf32>
    %189 = arith.mulf %188, %185 : vector<128x128xf32>
    %190 = arith.select %187, %185, %189 : vector<128x128xi1>, vector<128x128xf32>
    %c3 = arith.constant 3 : index
    %c0_66 = arith.constant 0 : index
    %c0_67 = arith.constant 0 : index
    %191 = vector.load %arg7[%c3, %c0_66, %c0_67] : memref<4x1x128xf32, #tpu.memory_space<vmem>>, vector<1x1x128xf32>
    %192 = vector.shape_cast %191 : vector<1x1x128xf32> to vector<1x128xf32>
    %193 = vector.extract_strided_slice %190 {offsets = [0, 0], sizes = [127, 128], strides = [1, 1]} : vector<128x128xf32> to vector<127x128xf32>
    %194 = tpu.concatenate %98, %193 in 0 : vector<1x128xf32>, vector<127x128xf32> -> vector<128x128xf32>
    %cst_68 = arith.constant 0.000000e+00 : f32
    %195 = vector.broadcast %cst_68 : f32 to vector<128x128xf32>
    %196 = arith.select %79, %195, %194 : vector<128x128xi1>, vector<128x128xf32>
    %197 = vector.extract_strided_slice %190 {offsets = [1, 0], sizes = [127, 128], strides = [1, 1]} : vector<128x128xf32> to vector<127x128xf32>
    %198 = tpu.concatenate %197, %98 in 0 : vector<127x128xf32>, vector<1x128xf32> -> vector<128x128xf32>
    %cst_69 = arith.constant 0.000000e+00 : f32
    %199 = vector.broadcast %cst_69 : f32 to vector<128x128xf32>
    %200 = arith.select %97, %199, %198 : vector<128x128xi1>, vector<128x128xf32>
    %c3_70 = arith.constant 3 : index
    %c0_71 = arith.constant 0 : index
    %c0_72 = arith.constant 0 : index
    %201 = vector.load %arg6[%c3_70, %c0_71, %c0_72] : memref<6x128x128xf32, #tpu.memory_space<vmem>>, vector<1x128x128xf32>
    %202 = vector.shape_cast %201 : vector<1x128x128xf32> to vector<128x128xf32>
    %cst_73 = arith.constant dense<0.000000e+00> : vector<128x128xf32>
    %203 = tpu.matmul %196, %202, %cst_73 {dimension_numbers = #tpu.dot_dimension_numbers<[1], [0], [0], [1], [0, 0, 1, 1], [], []>} : vector<128x128xf32>, vector<128x128xf32>, vector<128x128xf32> -> vector<128x128xf32>
    %c4 = arith.constant 4 : index
    %c0_74 = arith.constant 0 : index
    %c0_75 = arith.constant 0 : index
    %204 = vector.load %arg6[%c4, %c0_74, %c0_75] : memref<6x128x128xf32, #tpu.memory_space<vmem>>, vector<1x128x128xf32>
    %205 = vector.shape_cast %204 : vector<1x128x128xf32> to vector<128x128xf32>
    %cst_76 = arith.constant dense<0.000000e+00> : vector<128x128xf32>
    %206 = tpu.matmul %190, %205, %cst_76 {dimension_numbers = #tpu.dot_dimension_numbers<[1], [0], [0], [1], [0, 0, 1, 1], [], []>} : vector<128x128xf32>, vector<128x128xf32>, vector<128x128xf32> -> vector<128x128xf32>
    %207 = arith.addf %203, %206 : vector<128x128xf32>
    %c5 = arith.constant 5 : index
    %c0_77 = arith.constant 0 : index
    %c0_78 = arith.constant 0 : index
    %208 = vector.load %arg6[%c5, %c0_77, %c0_78] : memref<6x128x128xf32, #tpu.memory_space<vmem>>, vector<1x128x128xf32>
    %209 = vector.shape_cast %208 : vector<1x128x128xf32> to vector<128x128xf32>
    %cst_79 = arith.constant dense<0.000000e+00> : vector<128x128xf32>
    %210 = tpu.matmul %200, %209, %cst_79 {dimension_numbers = #tpu.dot_dimension_numbers<[1], [0], [0], [1], [0, 0, 1, 1], [], []>} : vector<128x128xf32>, vector<128x128xf32>, vector<128x128xf32> -> vector<128x128xf32>
    %211 = arith.addf %207, %210 : vector<128x128xf32>
    %212 = vector.broadcast %192 : vector<1x128xf32> to vector<128x128xf32>
    %213 = arith.addf %211, %212 : vector<128x128xf32>
    %214 = arith.addf %213, %0 : vector<128x128xf32>
    %c0_80 = arith.constant 0 : index
    %c0_81 = arith.constant 0 : index
    %215 = vector.load %arg8[%c0_80, %c0_81] : memref<128x128xf32, #tpu.memory_space<vmem>>, vector<128x128xf32>
    tpu.vector_store %arg8[%c0_80, %c0_81], %214 {strides = array<i32>} : memref<128x128xf32, #tpu.memory_space<vmem>>, vector<128x128xf32>,
    return
  }
  func.func @transform_0(%arg0: i32) -> (i32, i32) {
    %c0_i32 = arith.constant 0 : i32
    %c0_i32_0 = arith.constant 0 : i32
    return %arg0, %c0_i32 : i32, i32
  }
  func.func @transform_1(%arg0: i32) -> (i32, i32) {
    %c0_i32 = arith.constant 0 : i32
    %c0_i32_0 = arith.constant 0 : i32
    return %arg0, %c0_i32 : i32, i32
  }
  func.func @transform_2(%arg0: i32) -> (i32, i32) {
    %c0_i32 = arith.constant 0 : i32
    %c0_i32_0 = arith.constant 0 : i32
    %c0_i32_1 = arith.constant 0 : i32
    return %c0_i32, %c0_i32_0 : i32, i32
  }
  func.func @transform_3(%arg0: i32) -> (i32, i32) {
    %c0_i32 = arith.constant 0 : i32
    %c0_i32_0 = arith.constant 0 : i32
    %c0_i32_1 = arith.constant 0 : i32
    return %c0_i32, %c0_i32_0 : i32, i32
  }
  func.func @transform_4(%arg0: i32) -> (i32, i32, i32) {
    %c0_i32 = arith.constant 0 : i32
    %c0_i32_0 = arith.constant 0 : i32
    %c0_i32_1 = arith.constant 0 : i32
    %c0_i32_2 = arith.constant 0 : i32
    return %c0_i32, %c0_i32_0, %c0_i32_1 : i32, i32, i32
  }
  func.func @transform_5(%arg0: i32) -> (i32, i32, i32) {
    %c0_i32 = arith.constant 0 : i32
    %c0_i32_0 = arith.constant 0 : i32
    %c0_i32_1 = arith.constant 0 : i32
    %c0_i32_2 = arith.constant 0 : i32
    return %c0_i32, %c0_i32_0, %c0_i32_1 : i32, i32, i32
  }
  func.func @transform_6(%arg0: i32) -> (i32, i32, i32) {
    %c0_i32 = arith.constant 0 : i32
    %c0_i32_0 = arith.constant 0 : i32
    %c0_i32_1 = arith.constant 0 : i32
    %c0_i32_2 = arith.constant 0 : i32
    return %c0_i32, %c0_i32_0, %c0_i32_1 : i32, i32, i32
  }
  func.func @transform_7(%arg0: i32) -> (i32, i32) {
    %c0_i32 = arith.constant 0 : i32
    %c0_i32_0 = arith.constant 0 : i32
    return %arg0, %c0_i32 : i32, i32
  }
}

</mosaic_0001>

<bundles_post_ra>
// kernel: dab1d_forward.1
= control target key start
LH: loop header
LB: loop body
LE: loop exit
PB: predicated region body
PF: predicated region fallthrough
CT: control target
= control target key end

     0   :  { %12 = vsyncpa [#allocation3], 0  ;;  %s9573_s0 = inlined_call_operand.vmem [shape: f32[256,128], index: 0, kind: input, shape index: {}]   ;;  %s9574_s1 = inlined_call_operand.vmem [shape: f32[16,128], index: 1, kind: input, shape index: {}]   ;;  %s9575_s2 = inlined_call_operand.vmem [shape: f32[128,288], index: 2, kind: input, shape index: {}]   ;;  %s9576_s3 = inlined_call_operand.vmem [shape: f32[288,1024], index: 3, kind: input, shape index: {}]   ;;  %s9577_s4 = inlined_call_operand.hbm [shape: f32[2,128,128], index: 4, kind: input, shape index: {}]   ;;  %s9578_s5 = inlined_call_operand.hbm [shape: f32[6,128,128], index: 5, kind: input, shape index: {}]   ;;  %s9579_s6 = inlined_call_operand.vmem [shape: f32[4,1,128], index: 6, kind: input, shape index: {}]   ;;  %s9580_s7 = inlined_call_operand.vmem [shape: f32[256,128], index: 7, kind: output, shape index: {}]  }
   0x1   :  { %13 = vsyncpa [#allocation5], 0  ;;  %s6630_s24 = smov 0  }
   0x2 LB: > { %s6636_s25 = sadd.s32 4294967295, %s6580_s24   ;;  %p4932_p0 = scmp.ge.s32.totalorder %s6580_s24, 1  ;;  %s6580_s24 = sphi %s6630_s24, %s19_s24  }
   0x3   : > { %p207_p1 = scmp.lt.s32.totalorder %s6580_s24, 3  ;;  %s6582_s26 = smov [#allocation2]  }
   0x4   : > { %s225_s27 = sshll.u32 %s6582_s26, 4  ;;  %p9581_p3 = scmp.eq.s32.totalorder %s6636_s25, 0  ;;  %s226_s27 = int_to_ptr.vmem [resolvable:$true] %s225_s27 }
   0x5   : > { %p6640_p2 = pnand %p4932_p0, %p207_p1  ;;  %s6583_s29 = smov [#allocation4]  }
   0x6   : > { %s238_s30 = sshll.u32 %s6583_s29, 4  ;;  %s6510_s11 = scalar_lea.hbm %s9577_s4, 4096  ;;  %s6653_s30 = int_to_ptr.vmem [resolvable:$true] %s238_s30 }
   0x7   : > { %s9710_s28 = scalar_select %p6640_p2, 1, 0 }
   0x8   : > { %p6459_p4 = pneg %p6640_p2  ;;  %p6511_p6 = scmp.ne.s32.totalorder %s9577_s4, %s6510_s11 }
   0x9   : > { %p6517_p10 = scmp.lt.u32.totalorder %s6510_s11, %s9577_s4 }
   0xa   : > { %p6649_p5 = pnand %p9581_p3, %p6459_p4 }
   0xc   : > { %p6512_p7 = pneg %p6649_p5 }
   0xe   : > { %p6513_p8 = pnand %p6512_p7, %p6511_p6 }
  0x10   : > { %p6514_p9 = pneg %p6513_p8 }
  0x12   : > { %p6519_p11 = pnand %p6517_p10, %p6514_p9 }
  0x14   : > { %6522 = shalt.err (!%p6519_p11)
}
  0x15   : > { %s6523_s16 = scalar_lea.vmem %s226_s27, 4096  ;;  %p6531_p1 = scmp.lt.s32.totalorder %s226_s27, %s226_s27 }
  0x16   : > { %p6524_p12 = scmp.ne.s32.totalorder %s226_s27, %s6523_s16  ;;  %p6532_p4 = scmp.lt.s32.totalorder %s6523_s16, %s6523_s16 }
  0x18   : > { %p6526_p13 = pnand %p6524_p12, %p6512_p7  ;;  %p6533_p3 = por %p6532_p4, %p6531_p1 }
  0x1a   : > { %p6527_p0 = pneg %p6526_p13 }
  0x1c   : > { %p6534_p2 = pnand %p6533_p3, %p6527_p0 }
  0x1e   : > { %6537 = shalt.err (!%p6534_p2)
}
  0x1f   : > { %s6584_s17 = smov 128   ;;  %s6585_s18 = smov 8  }
  0x20   : > { %6462 = dma.hbm_to_vmem [thread:$0]  (!%p6649_p5), %s9577_s4, 4096, %s226_s27, [#allocation3], %s6584_s17, %s6584_s17, %s6585_s18  }
  0x21   : > { %s6538_s23 = scalar_lea.hbm %s9578_s5, 12288 }
  0x22   : > { %p6539_p6 = scmp.ne.s32.totalorder %s9578_s5, %s6538_s23  ;;  %p6545_p8 = scmp.lt.u32.totalorder %s6538_s23, %s9578_s5 }
  0x24   : > { %p6541_p2 = pnand %p6539_p6, %p6512_p7 }
  0x26   : > { %p6542_p3 = pneg %p6541_p2 }
  0x28   : > { %p6547_p9 = pnand %p6545_p8, %p6542_p3 }
  0x2a   : > { %6550 = shalt.err (!%p6547_p9)
}
  0x2b   : > { %s6551_s27 = scalar_lea.vmem %s6653_s30, 12288  ;;  %p6559_p13 = scmp.lt.s32.totalorder %s6653_s30, %s6653_s30 }
  0x2c   : > { %p6552_p10 = scmp.ne.s32.totalorder %s6653_s30, %s6551_s27  ;;  %p6560_p0 = scmp.lt.s32.totalorder %s6551_s27, %s6551_s27 }
  0x2e   : > { %p6554_p11 = pnand %p6552_p10, %p6512_p7  ;;  %p6561_p1 = por %p6560_p0, %p6559_p13 }
  0x30   : > { %p6555_p12 = pneg %p6554_p11 }
  0x32   : > { %p6562_p4 = pnand %p6561_p1, %p6555_p12 }
  0x34   : > { %6565 = shalt.err (!%p6562_p4)
}
  0x35   : > { %6465 = dma.hbm_to_vmem [thread:$0]  (!%p6649_p5), %s9578_s5, 12288, %s6653_s30, [#allocation5], %s6584_s17, %s6584_s17, %s6585_s18  }
  0x36   : > { %p9712_p6 = scmp.ne.s32.totalorder %s9710_s28, 0 }
  0x38   : > { %273 = sbr.rel (%p9712_p6) target bundleno = 1686 (0x696), region = 48 }
  0x3f   : > { %p9713_p2 = scmp.eq.s32.totalorder %s6636_s25, 0 }
  0x41   : > { %6571 = dma.done.wait (%p9713_p2), [#allocation3], 4096   ;;  %p9714_p7 = pmov %p9713_p2 }
  0x42   : > { %p9715_p3 = pmov %p9713_p2 }
  0x43   : > { %6573 = vsyncadd (%p9714_p7), [#allocation3], 4294963200 }
  0x44   : > { %6575 = dma.done.wait (%p9715_p3), [#allocation5], 12288   ;;  %p9716_p8 = pmov %p9713_p2 }
  0x45   : > { %v6586_v0 = vmov 0.0   ;;  %v347_v1 = vld [vmem:[%s9575_s2 + $0x8] sm:$0xff]  ;;  %v350_v2 = vld [vmem:[%s9575_s2 + $0x20] sm:$0xff]  ;;  %v349_v5 = vld [vmem:[%s9575_s2 + $0x18] sm:$0xff]  ;;  %p319_p5 = scmp.lt.s32.totalorder %s6636_s25, 1  ;;  %vm6588_vm0 = vmmov 0  }
  0x46   : > { %6577 = vsyncadd (%p9716_p8), [#allocation5], 4294955008  ;;  %458 = vmatprep.mubr.f32.mxu1 %v6586_v0  ;;  %v346_v3 = vld [vmem:[%s9575_s2] sm:$0xff]  ;;  %v5779_v4 = vpack.c.bf16 %v350_v2, %v347_v1  ;;  %v353_v6 = vld [vmem:[%s9575_s2 + $0x38] sm:$0xff]  ;;  %vm832_vm3 = vcmask 261120   ;;  %s4939_s15 = sshll.u32 %s6636_s25, 4 }
  0x47   : > { %v356_v7 = vld [vmem:[%s9575_s2 + $0x50] sm:$0xff]  ;;  %v5781_v8 = vpack.c.bf16 %v349_v5, %v346_v3  ;;  %v355_v11 = vld [vmem:[%s9575_s2 + $0x48] sm:$0xff]  ;;  %v362_v13 = vld [vmem:[%s9575_s2 + $0x80] sm:$0xff]  ;;  %s320_s29 = scalar_select %p319_p5, %s6636_s25, 1  ;;  %vm9644_vm5 = vcmask 1040384   ;;  %vm9608_vm10 = vcmask 1046528  }
  0x48   : > { %v5783_v9 = vpack.c.bf16 %v356_v7, %v353_v6  ;;  %v352_v10 = vld [vmem:[%s9575_s2 + $0x30] sm:$0xff]  ;;  %v359_v12 = vld [vmem:[%s9575_s2 + $0x68] sm:$0xff]  ;;  %5780 = vmatprep.subr.bf16.mxu1 %v5779_v4  ;;  %v358_v16 = vld [vmem:[%s9575_s2 + $0x60] sm:$0xff]  ;;  %p314_p9 = scmp.lt.s32.totalorder %s4939_s15, 31 }
  0x49   : > { %5782 = vmatpush1.bf16.msra.mxu1 %v5781_v8  ;;  %v5785_v14 = vpack.c.bf16 %v355_v11, %v352_v10  ;;  %v5787_v15 = vpack.c.bf16 %v362_v13, %v359_v12  ;;  %v361_v17 = vld [vmem:[%s9575_s2 + $0x78] sm:$0xff]  ;;  %v368_v19 = vld [vmem:[%s9575_s2 + $0xb0] sm:$0xff]  ;;  %v367_v23 = vld [vmem:[%s9575_s2 + $0xa8] sm:$0xff]  ;;  %s4941_s19 = sshll.u32 %s320_s29, 3 }
  0x4a   : > { %5784 = vmatprep.subr.bf16.mxu1 %v5783_v9  ;;  %v365_v18 = vld [vmem:[%s9575_s2 + $0x98] sm:$0xff]  ;;  %v5789_v20 = vpack.c.bf16 %v361_v17, %v358_v16  ;;  %v364_v22 = vld [vmem:[%s9575_s2 + $0x90] sm:$0xff]  ;;  %v371_v24 = vld [vmem:[%s9575_s2 + $0xc8] sm:$0xff]  ;;  %s322_s12 = scalar_lea.vmem %s9574_s1, %s4941_s19  ;;  %s10062_s15 = smov (!%p314_p9, %s4939_s15), 31 }
  0x4b   : > { %v5791_v21 = vpack.c.bf16 %v368_v19, %v365_v18  ;;  %v374_v25 = vld [vmem:[%s9575_s2 + $0xe0] sm:$0xff]  ;;  %v5793_v26 = vpack.c.bf16 %v367_v23, %v364_v22  ;;  %v373_v29 = vld [vmem:[%s9575_s2 + $0xd8] sm:$0xff]  ;;  %v380_v31 = vld [vmem:[%s9575_s2 + $0x110] sm:$0xff]  ;;  %s4940_s16 = sshll.u32 %s10062_s15, 3 }
  0x4c   : > { %v5795_v27 = vpack.c.bf16 %v374_v25, %v371_v24  ;;  %v370_v28 = vld [vmem:[%s9575_s2 + $0xc0] sm:$0xff]  ;;  %v377_v30 = vld [vmem:[%s9575_s2 + $0xf8] sm:$0xff]  ;;  %v545_v33 = vld [vmem:[%s9576_s3 + $0x8] sm:$0xff]  ;;  %s7770_s19 = scalar_lea.vmem %s9573_s0, %s4940_s16  ;;  %s9521_s11 = scalar_lea.vmem %s9580_s7, %s4940_s16 }
  0x4d   : > { %5786 = vmatpush1.bf16.msra.mxu1 %v5785_v14  ;;  %v5797_v32 = vpack.c.bf16 %v373_v29, %v370_v28  ;;  %v553_v34 = vld [vmem:[%s9576_s3 + $0x48] sm:$0xff]  ;;  %v5799_v35 = vpack.c.bf16 %v380_v31, %v377_v30  ;;  %v376_v36 = vld [vmem:[%s9575_s2 + $0xf0] sm:$0xff]  ;;  %v544_v39 = vld [vmem:[%s9576_s3] sm:$0xff] }
  0x4e   : > { %5788 = vmatprep.subr.bf16.mxu1 %v5787_v15  ;;  %v379_v37 = vld [vmem:[%s9575_s2 + $0x108] sm:$0xff]  ;;  %v5835_v38 = vpack.c.bf16 %v553_v34, %v545_v33  ;;  %v386_v41 = vld [vmem:[%s9575_s2 + $0x140] sm:$0xff]  ;;  %v385_v52 = vld [vmem:[%s9575_s2 + $0x138] sm:$0xff] }
  0x4f   : > { %v383_v40 = vld [vmem:[%s9575_s2 + $0x128] sm:$0xff]  ;;  %v552_v42 = vld [vmem:[%s9576_s3 + $0x40] sm:$0xff]  ;;  %v5801_v46 = vpack.c.bf16 %v379_v37, %v376_v36  ;;  %v389_v55 = vld [vmem:[%s9575_s2 + $0x158] sm:$0xff] }
  0x50   : > { %5836 = vmatprep.subr.bf16.mxu0 %v5835_v38  ;;  %v5837_v43 = vpack.c.bf16 %v552_v42, %v544_v39  ;;  %v561_v44 = vld [vmem:[%s9576_s3 + $0x88] sm:$0xff]  ;;  %v560_v48 = vld [vmem:[%s9576_s3 + $0x80] sm:$0xff]  ;;  %v5803_v50 = vpack.c.bf16 %v386_v41, %v383_v40  ;;  %v392_v56 = vld [vmem:[%s9575_s2 + $0x170] sm:$0xff] }
  0x51   : > { %5790 = vmatpush1.bf16.msra.mxu1 %v5789_v20  ;;  %v569_v45 = vld [vmem:[%s9576_s3 + $0xc8] sm:$0xff]  ;;  %v568_v49 = vld [vmem:[%s9576_s3 + $0xc0] sm:$0xff]  ;;  %v5807_v1 = vpack.c.bf16 %v392_v56, %v389_v55  ;;  %v388_v2 = vld [vmem:[%s9575_s2 + $0x150] sm:$0xff] }
  0x52   : > { %5792 = vmatprep.subr.bf16.mxu1 %v5791_v21  ;;  %v5839_v47 = vpack.c.bf16 %v569_v45, %v561_v44  ;;  %v382_v51 = vld [vmem:[%s9575_s2 + $0x120] sm:$0xff]  ;;  %5838 = vmatpush1.bf16.msra.mxu0 %v5837_v43  ;;  %v5841_v53 = vpack.c.bf16 %v568_v49, %v560_v48  ;;  %v577_v54 = vld [vmem:[%s9576_s3 + $0x108] sm:$0xff]  ;;  %v348_v11 = vld [vmem:[%s9575_s2 + $0x10] sm:$0xff]  ;;  %v6587_v21 = vmov 0.0|0.0  }
  0x53   : > { %v585_v57 = vld [vmem:[%s9576_s3 + $0x148] sm:$0xff]  ;;  %v576_v59 = vld [vmem:[%s9576_s3 + $0x100] sm:$0xff]  ;;  %v5805_v61 = vpack.c.bf16 %v385_v52, %v382_v51  ;;  %v357_v23 = vld [vmem:[%s9575_s2 + $0x58] sm:$0xff] }
  0x54   : > { %5840 = vmatprep.subr.bf16.mxu0 %v5839_v47  ;;  %v5843_v58 = vpack.c.bf16 %v585_v57, %v577_v54  ;;  %v584_v60 = vld [vmem:[%s9576_s3 + $0x140] sm:$0xff]  ;;  %v593_v62 = vld [vmem:[%s9576_s3 + $0x188] sm:$0xff]  ;;  %v360_v31 = vld [vmem:[%s9575_s2 + $0x70] sm:$0xff] }
  0x55   : > { %5794 = vmatpush1.bf16.msra.mxu1 %v5793_v26  ;;  %v601_v63 = vld [vmem:[%s9576_s3 + $0x1c8] sm:$0xff]  ;;  %v5845_v4 = vpack.c.bf16 %v584_v60, %v576_v59  ;;  %v592_v6 = vld [vmem:[%s9576_s3 + $0x180] sm:$0xff]  ;;  %v369_v41 = vld [vmem:[%s9575_s2 + $0xb8] sm:$0xff] }
  0x56   : > { %5796 = vmatprep.subr.bf16.mxu1 %v5795_v27  ;;  %v391_v3 = vld [vmem:[%s9575_s2 + $0x168] sm:$0xff]  ;;  %5842 = vmatpush1.bf16.msra.mxu0 %v5841_v53  ;;  %v5847_v5 = vpack.c.bf16 %v601_v63, %v593_v62  ;;  %v600_v7 = vld [vmem:[%s9576_s3 + $0x1c0] sm:$0xff]  ;;  %v372_v49 = vld [vmem:[%s9575_s2 + $0xd0] sm:$0xff] }
  0x57   : > { %5844 = vmatprep.subr.bf16.mxu0 %v5843_v58  ;;  %v609_v8 = vld [vmem:[%s9576_s3 + $0x208] sm:$0xff]  ;;  %v5809_v10 = vpack.c.bf16 %v391_v3, %v388_v2  ;;  %v5849_v13 = vpack.c.bf16 %v600_v7, %v592_v6  ;;  %v608_v15 = vld [vmem:[%s9576_s3 + $0x200] sm:$0xff]  ;;  %v381_v59 = vld [vmem:[%s9575_s2 + $0x118] sm:$0xff] }
  0x58   : > { %v617_v9 = vld [vmem:[%s9576_s3 + $0x248] sm:$0xff]  ;;  %v616_v16 = vld [vmem:[%s9576_s3 + $0x240] sm:$0xff] }
  0x59   : > { %5798 = vmatpush1.bf16.msra.mxu1 %v5797_v32  ;;  %v351_v12 = vld [vmem:[%s9575_s2 + $0x28] sm:$0xff]  ;;  %v5851_v14 = vpack.c.bf16 %v617_v9, %v609_v8  ;;  %v6888_v19 = vld [vmem:[%s322_s12] sm:$0xff]  ;;  %v5853_v24 = vpack.c.bf16 %v616_v16, %v608_v15  ;;  %v547_v15 = vld [vmem:[%s9576_s3 + $0x18] sm:$0xff] }
  0x5a   : > { %5800 = vmatprep.subr.bf16.mxu1 %v5799_v35  ;;  %5846 = vmatpush1.bf16.msra.mxu0 %v5845_v4  ;;  %v625_v17 = vld [vmem:[%s9576_s3 + $0x288] sm:$0xff]  ;;  %v5812_v20 = vpack.c.bf16 %v351_v12, %v348_v11  ;;  %v354_v22 = vld [vmem:[%s9575_s2 + $0x40] sm:$0xff]  ;;  %v384_v4 = vld [vmem:[%s9575_s2 + $0x130] sm:$0xff] }
  0x5b   : > { %5848 = vmatprep.subr.bf16.mxu0 %v5847_v5  ;;  %v633_v18 = vld [vmem:[%s9576_s3 + $0x2c8] sm:$0xff]  ;;  %v624_v26 = vld [vmem:[%s9576_s3 + $0x280] sm:$0xff]  ;;  %v5815_v30 = vpack.c.bf16 %v357_v23, %v354_v22 }
  0x5c   : > { %v5855_v25 = vpack.c.bf16 %v633_v18, %v625_v17  ;;  %v632_v27 = vld [vmem:[%s9576_s3 + $0x2c0] sm:$0xff]  ;;  %v641_v28 = vld [vmem:[%s9576_s3 + $0x308] sm:$0xff]  ;;  %v555_v17 = vld [vmem:[%s9576_s3 + $0x58] sm:$0xff] }
  0x5d   : > { %5802 = vmatpush1.bf16.msra.mxu1 %v5801_v46  ;;  %v649_v29 = vld [vmem:[%s9576_s3 + $0x348] sm:$0xff]  ;;  %v5857_v33 = vpack.c.bf16 %v632_v27, %v624_v26  ;;  %v640_v35 = vld [vmem:[%s9576_s3 + $0x300] sm:$0xff]  ;;  %v5907_v26 = vpack.c.bf16 %v555_v17, %v547_v15  ;;  %v546_v27 = vld [vmem:[%s9576_s3 + $0x10] sm:$0xff] }
  0x5e   : > { %5804 = vmatprep.subr.bf16.mxu1 %v5803_v50  ;;  %5850 = vmatpush1.bf16.msra.mxu0 %v5849_v13  ;;  %v363_v32 = vld [vmem:[%s9575_s2 + $0x88] sm:$0xff]  ;;  %v5859_v34 = vpack.c.bf16 %v649_v29, %v641_v28  ;;  %v648_v36 = vld [vmem:[%s9576_s3 + $0x340] sm:$0xff]  ;;  %v554_v28 = vld [vmem:[%s9576_s3 + $0x50] sm:$0xff] }
  0x5f   : > { %5852 = vmatprep.subr.bf16.mxu0 %v5851_v14  ;;  %v657_v37 = vld [vmem:[%s9576_s3 + $0x388] sm:$0xff]  ;;  %v5818_v39 = vpack.c.bf16 %v363_v32, %v360_v31  ;;  %v366_v40 = vld [vmem:[%s9575_s2 + $0xa0] sm:$0xff]  ;;  %v5861_v42 = vpack.c.bf16 %v648_v36, %v640_v35  ;;  %v393_v14 = vld [vmem:[%s9575_s2 + $0x178] sm:$0xff]  ;;  %v5909_v36 = vpack.c.bf16 %v554_v28, %v546_v27 }
  0x60   : > { %v665_v38 = vld [vmem:[%s9576_s3 + $0x3c8] sm:$0xff]  ;;  %v656_v44 = vld [vmem:[%s9576_s3 + $0x380] sm:$0xff]  ;;  %v5821_v48 = vpack.c.bf16 %v369_v41, %v366_v40  ;;  %v563_v29 = vld [vmem:[%s9576_s3 + $0x98] sm:$0xff] }
  0x61   : > { %5806 = vmatpush1.bf16.msra.mxu1 %v5805_v61  ;;  %v5863_v43 = vpack.c.bf16 %v665_v38, %v657_v37  ;;  %v664_v45 = vld [vmem:[%s9576_s3 + $0x3c0] sm:$0xff]  ;;  %v673_v46 = vld [vmem:[%s9576_s3 + $0x408] sm:$0xff]  ;;  %v571_v31 = vld [vmem:[%s9576_s3 + $0xd8] sm:$0xff] }
  0x62   : > { %5808 = vmatprep.subr.bf16.mxu1 %v5807_v1  ;;  %5854 = vmatpush1.bf16.msra.mxu0 %v5853_v24  ;;  %v681_v47 = vld [vmem:[%s9576_s3 + $0x448] sm:$0xff]  ;;  %v5865_v51 = vpack.c.bf16 %v664_v45, %v656_v44  ;;  %v672_v53 = vld [vmem:[%s9576_s3 + $0x400] sm:$0xff]  ;;  %v5911_v37 = vpack.c.bf16 %v571_v31, %v563_v29  ;;  %v562_v38 = vld [vmem:[%s9576_s3 + $0x90] sm:$0xff] }
  0x63   : > { %5856 = vmatprep.subr.bf16.mxu0 %v5855_v25  ;;  %v375_v50 = vld [vmem:[%s9575_s2 + $0xe8] sm:$0xff]  ;;  %v5867_v52 = vpack.c.bf16 %v681_v47, %v673_v46  ;;  %v680_v54 = vld [vmem:[%s9576_s3 + $0x440] sm:$0xff]  ;;  %v579_v40 = vld [vmem:[%s9576_s3 + $0x118] sm:$0xff] }
  0x64   : > { %v689_v55 = vld [vmem:[%s9576_s3 + $0x488] sm:$0xff]  ;;  %v5824_v57 = vpack.c.bf16 %v375_v50, %v372_v49  ;;  %v378_v58 = vld [vmem:[%s9575_s2 + $0x100] sm:$0xff]  ;;  %v5869_v60 = vpack.c.bf16 %v680_v54, %v672_v53  ;;  %v578_v50 = vld [vmem:[%s9576_s3 + $0x110] sm:$0xff] }
  0x65   : > { %5810 = vmatpush1.bf16.msra.mxu1 %v5809_v10  ;;  %v697_v56 = vld [vmem:[%s9576_s3 + $0x4c8] sm:$0xff]  ;;  %v688_v62 = vld [vmem:[%s9576_s3 + $0x480] sm:$0xff]  ;;  %v5827_v3 = vpack.c.bf16 %v381_v59, %v378_v58  ;;  %v603_v53 = vld [vmem:[%s9576_s3 + $0x1d8] sm:$0xff] }
  0x66   : > { %5811 = vmatprep.subr.bf16.mxu1 %v6587_v21  ;;  %5858 = vmatpush1.bf16.msra.mxu0 %v5857_v33  ;;  %v5871_v61 = vpack.c.bf16 %v697_v56, %v689_v55  ;;  %v696_v63 = vld [vmem:[%s9576_s3 + $0x4c0] sm:$0xff]  ;;  %v705_v1 = vld [vmem:[%s9576_s3 + $0x508] sm:$0xff]  ;;  %v594_v59 = vld [vmem:[%s9576_s3 + $0x190] sm:$0xff] }
  0x67   : > { %5860 = vmatprep.subr.bf16.mxu0 %v5859_v34  ;;  %v713_v2 = vld [vmem:[%s9576_s3 + $0x548] sm:$0xff]  ;;  %v5873_v6 = vpack.c.bf16 %v696_v63, %v688_v62  ;;  %v704_v8 = vld [vmem:[%s9576_s3 + $0x500] sm:$0xff]  ;;  %v611_v62 = vld [vmem:[%s9576_s3 + $0x218] sm:$0xff] }
  0x68   : > { %459 = vmatmul.mubr.f32.vlgmr.msra.gmra.mrb[0].mxu1 %v6888_v19  ;;  %v387_v5 = vld [vmem:[%s9575_s2 + $0x148] sm:$0xff]  ;;  %v5875_v7 = vpack.c.bf16 %v713_v2, %v705_v1  ;;  %v712_v9 = vld [vmem:[%s9576_s3 + $0x540] sm:$0xff]  ;;  %v619_v63 = vld [vmem:[%s9576_s3 + $0x258] sm:$0xff] }
  0x69   : > { %5813 = vmatpush3.bf16.msra.mxu1 %v5812_v20  ;;  %5328 = vmatprep.mubr.msk.f32.mxu1 %vm6588_vm0, %v6586_v0  ;;  %v721_v10 = vld [vmem:[%s9576_s3 + $0x588] sm:$0xff]  ;;  %v5830_v12 = vpack.c.bf16 %v387_v5, %v384_v4  ;;  %v390_v13 = vld [vmem:[%s9575_s2 + $0x160] sm:$0xff]  ;;  %v5877_v16 = vpack.c.bf16 %v712_v9, %v704_v8  ;;  %v5923_v2 = vpack.c.bf16 %v619_v63, %v611_v62  ;;  %v618_v4 = vld [vmem:[%s9576_s3 + $0x250] sm:$0xff] }
  0x6a   : > { %5814 = vmatprep.subr.bf16.mxu1 %v6587_v21  ;;  %5862 = vmatpush1.bf16.msra.mxu0 %v5861_v42  ;;  %v729_v11 = vld [vmem:[%s9576_s3 + $0x5c8] sm:$0xff]  ;;  %v720_v20 = vld [vmem:[%s9576_s3 + $0x580] sm:$0xff]  ;;  %v5833_v25 = vpack.c.bf16 %v393_v14, %v390_v13  ;;  %v587_v42 = vld [vmem:[%s9576_s3 + $0x158] sm:$0xff] }
  0x6b   : > { %5864 = vmatprep.subr.bf16.mxu0 %v5863_v43  ;;  %v5879_v18 = vpack.c.bf16 %v729_v11, %v721_v10  ;;  %v728_v22 = vld [vmem:[%s9576_s3 + $0x5c0] sm:$0xff]  ;;  %v737_v23 = vld [vmem:[%s9576_s3 + $0x608] sm:$0xff]  ;;  %v5915_v49 = vpack.c.bf16 %v587_v42, %v579_v40  ;;  %v627_v5 = vld [vmem:[%s9576_s3 + $0x298] sm:$0xff] }
  0x6c   : > { %v745_v24 = vld [vmem:[%s9576_s3 + $0x648] sm:$0xff]  ;;  %v736_v32 = vld [vmem:[%s9576_s3 + $0x600] sm:$0xff]  ;;  %v626_v9 = vld [vmem:[%s9576_s3 + $0x290] sm:$0xff] }
  0x6d   : > { %5816 = vmatpush3.bf16.msra.mxu1 %v5815_v30  ;;  %v5881_v30 = vpack.c.bf16 %v728_v22, %v720_v20  ;;  %v744_v33 = vld [vmem:[%s9576_s3 + $0x640] sm:$0xff]  ;;  %v753_v34 = vld [vmem:[%s9576_s3 + $0x688] sm:$0xff]  ;;  %v634_v10 = vld [vmem:[%s9576_s3 + $0x2d0] sm:$0xff] }
  0x6e   : > { %5817 = vmatprep.subr.bf16.mxu1 %v6587_v21  ;;  %5866 = vmatpush1.bf16.msra.mxu0 %v5865_v51  ;;  %v761_v35 = vld [vmem:[%s9576_s3 + $0x6c8] sm:$0xff]  ;;  %v5885_v41 = vpack.c.bf16 %v744_v33, %v736_v32  ;;  %v752_v44 = vld [vmem:[%s9576_s3 + $0x680] sm:$0xff]  ;;  %v595_v51 = vld [vmem:[%s9576_s3 + $0x198] sm:$0xff]  ;;  %v5929_v13 = vpack.c.bf16 %v634_v10, %v626_v9 }
  0x6f   : > { %5868 = vmatprep.subr.bf16.mxu0 %v5867_v52  ;;  %v5887_v43 = vpack.c.bf16 %v761_v35, %v753_v34  ;;  %v760_v45 = vld [vmem:[%s9576_s3 + $0x6c0] sm:$0xff]  ;;  %v769_v46 = vld [vmem:[%s9576_s3 + $0x708] sm:$0xff]  ;;  %v5919_v58 = vpack.c.bf16 %v603_v53, %v595_v51  ;;  %v643_v11 = vld [vmem:[%s9576_s3 + $0x318] sm:$0xff] }
  0x70   : > { %v777_v47 = vld [vmem:[%s9576_s3 + $0x748] sm:$0xff]  ;;  %v5889_v52 = vpack.c.bf16 %v760_v45, %v752_v44  ;;  %v768_v55 = vld [vmem:[%s9576_s3 + $0x700] sm:$0xff]  ;;  %v642_v15 = vld [vmem:[%s9576_s3 + $0x310] sm:$0xff] }
  0x71   : > { %5819 = vmatpush3.bf16.msra.mxu1 %v5818_v39  ;;  %v570_v39 = vld [vmem:[%s9576_s3 + $0xd0] sm:$0xff]  ;;  %v5891_v54 = vpack.c.bf16 %v777_v47, %v769_v46  ;;  %v776_v56 = vld [vmem:[%s9576_s3 + $0x740] sm:$0xff]  ;;  %v659_v17 = vld [vmem:[%s9576_s3 + $0x398] sm:$0xff] }
  0x72   : > { %5820 = vmatprep.subr.bf16.mxu1 %v6587_v21  ;;  %5870 = vmatpush1.bf16.msra.mxu0 %v5869_v60  ;;  %v602_v60 = vld [vmem:[%s9576_s3 + $0x1d0] sm:$0xff]  ;;  %v691_v31 = vld [vmem:[%s9576_s3 + $0x498] sm:$0xff] }
  0x73   : > { %5872 = vmatprep.subr.bf16.mxu0 %v5871_v61  ;;  %v5893_v61 = vpack.c.bf16 %v776_v56, %v768_v55  ;;  %v5921_v1 = vpack.c.bf16 %v602_v60, %v594_v59  ;;  %v674_v29 = vld [vmem:[%s9576_s3 + $0x410] sm:$0xff]  ;;  %v723_v42 = vld [vmem:[%s9576_s3 + $0x598] sm:$0xff] }
  0x74   : > { %v690_v34 = vld [vmem:[%s9576_s3 + $0x490] sm:$0xff]  ;;  %v755_v53 = vld [vmem:[%s9576_s3 + $0x698] sm:$0xff] }
  0x75   : > { %5822 = vmatpush3.bf16.msra.mxu1 %v5821_v48  ;;  %v5913_v48 = vpack.c.bf16 %v570_v39, %v562_v38  ;;  %v698_v35 = vld [vmem:[%s9576_s3 + $0x4d0] sm:$0xff]  ;;  %v771_v59 = vld [vmem:[%s9576_s3 + $0x718] sm:$0xff] }
  0x76   : > { %5823 = vmatprep.subr.bf16.mxu1 %v6587_v21  ;;  %5874 = vmatpush1.bf16.msra.mxu0 %v5873_v6  ;;  %v635_v6 = vld [vmem:[%s9576_s3 + $0x2d8] sm:$0xff]  ;;  %v5945_v38 = vpack.c.bf16 %v698_v35, %v690_v34  ;;  %v706_v40 = vld [vmem:[%s9576_s3 + $0x510] sm:$0xff] }
  0x77   : > { %5876 = vmatprep.subr.bf16.mxu0 %v5875_v7  ;;  %v5927_v8 = vpack.c.bf16 %v635_v6, %v627_v5  ;;  %v722_v46 = vld [vmem:[%s9576_s3 + $0x590] sm:$0xff]  ;;  %v779_v60 = vld [vmem:[%s9576_s3 + $0x758] sm:$0xff] }
  0x78   : > { %v730_v47 = vld [vmem:[%s9576_s3 + $0x5d0] sm:$0xff]  ;;  %v795_v6 = vld [vmem:[%s9576_s3 + $0x7d8] sm:$0xff] }
  0x79   : > { %5825 = vmatpush3.bf16.msra.mxu1 %v5824_v57  ;;  %v738_v51 = vld [vmem:[%s9576_s3 + $0x610] sm:$0xff] }
  0x7a   : > { %5826 = vmatprep.subr.bf16.mxu1 %v6587_v21  ;;  %5878 = vmatpush1.bf16.msra.mxu0 %v5877_v16  ;;  %v650_v16 = vld [vmem:[%s9576_s3 + $0x350] sm:$0xff] }
  0x7b   : > { %5880 = vmatprep.subr.bf16.mxu0 %v5879_v18  ;;  %v667_v18 = vld [vmem:[%s9576_s3 + $0x3d8] sm:$0xff]  ;;  %v5933_v20 = vpack.c.bf16 %v650_v16, %v642_v15  ;;  %v770_v62 = vld [vmem:[%s9576_s3 + $0x710] sm:$0xff]  ;;  %v801_v15 = vld [vmem:[%s9576_s3 + $0x808] sm:$0xff] }
  0x7c   : > { %v5935_v22 = vpack.c.bf16 %v667_v18, %v659_v17  ;;  %v778_v63 = vld [vmem:[%s9576_s3 + $0x750] sm:$0xff]  ;;  %v809_v16 = vld [vmem:[%s9576_s3 + $0x848] sm:$0xff]  ;;  %v803_v17 = vld [vmem:[%s9576_s3 + $0x818] sm:$0xff] }
  0x7d   : > { %5828 = vmatpush3.bf16.msra.mxu1 %v5827_v3  ;;  %v610_v3 = vld [vmem:[%s9576_s3 + $0x210] sm:$0xff]  ;;  %v5965_v10 = vpack.c.bf16 %v778_v63, %v770_v62  ;;  %v5899_v18 = vpack.c.bf16 %v809_v16, %v801_v15  ;;  %v588_v15 = vld [vmem:[%s9576_s3 + $0x160] sm:$0xff] }
  0x7e   : > { %5829 = vmatprep.subr.bf16.mxu1 %v6587_v21  ;;  %5882 = vmatpush1.bf16.msra.mxu0 %v5881_v30  ;;  %v5925_v7 = vpack.c.bf16 %v618_v4, %v610_v3  ;;  %v682_v30 = vld [vmem:[%s9576_s3 + $0x450] sm:$0xff]  ;;  %v793_v3 = vld [vmem:[%s9576_s3 + $0x7c8] sm:$0xff]  ;;  %v787_v4 = vld [vmem:[%s9576_s3 + $0x798] sm:$0xff] }
  0x7f   : > { %v5941_v32 = vpack.c.bf16 %v682_v30, %v674_v29 }
  0x81   : > { %5831 = vmatpush3.bf16.msra.mxu1 %v5830_v12  ;;  %v651_v12 = vld [vmem:[%s9576_s3 + $0x358] sm:$0xff] }
  0x82   : > { %5832 = vmatprep.subr.bf16.mxu1 %v6587_v21  ;;  %v5883_v21 = vpack.c.bf16 %v745_v24, %v737_v23  ;;  %v5931_v14 = vpack.c.bf16 %v651_v12, %v643_v11  ;;  %v658_v23 = vld [vmem:[%s9576_s3 + $0x390] sm:$0xff]  ;;  %v5967_v11 = vpack.c.bf16 %v795_v6, %v787_v4 }
  0x83   : > { %v666_v24 = vld [vmem:[%s9576_s3 + $0x3d0] sm:$0xff] }
  0x84   : > { %5884 = vmatprep.subr.bf16.mxu0 %v5883_v21  ;;  %v5937_v27 = vpack.c.bf16 %v666_v24, %v658_v23  ;;  %v699_v21 = vld [vmem:[%s9576_s3 + $0x4d8] sm:$0xff]  ;;  %v786_v12 = vld [vmem:[%s9576_s3 + $0x790] sm:$0xff]  ;;  %v800_v23 = vld [vmem:[%s9576_s3 + $0x800] sm:$0xff] }
  0x85   : > { %5834 = vmatpush3.bf16.msra.mxu1 %v5833_v25  ;;  %5886 = vmatpush1.bf16.msra.mxu0 %v5885_v41  ;;  %v675_v25 = vld [vmem:[%s9576_s3 + $0x418] sm:$0xff]  ;;  %v5943_v33 = vpack.c.bf16 %v699_v21, %v691_v31  ;;  %v714_v41 = vld [vmem:[%s9576_s3 + $0x550] sm:$0xff]  ;;  %v808_v24 = vld [vmem:[%s9576_s3 + $0x840] sm:$0xff] }
  0x86   : > { %5908 = vmatprep.subr.bf16.mxu1 %v5907_v26  ;;  %5888 = vmatprep.subr.bf16.mxu0 %v5887_v43  ;;  %v683_v26 = vld [vmem:[%s9576_s3 + $0x458] sm:$0xff]  ;;  %v5949_v44 = vpack.c.bf16 %v714_v41, %v706_v40  ;;  %v825_v31 = vld [vmem:[%s9576_s3 + $0x8c8] sm:$0xff]  ;;  %v5901_v34 = vpack.c.bf16 %v808_v24, %v800_v23  ;;  %v818_v41 = vld [vmem:[%s9576_s3 + $0x890] sm:$0xff] }
  0x87   : > { %v5939_v28 = vpack.c.bf16 %v683_v26, %v675_v25  ;;  %v731_v43 = vld [vmem:[%s9576_s3 + $0x5d8] sm:$0xff]  ;;  %v802_v26 = vld [vmem:[%s9576_s3 + $0x810] sm:$0xff]  ;;  %v605_v23 = vld [vmem:[%s9576_s3 + $0x1e8] sm:$0xff] }
  0x88   : > { %5329 = vmatmul.mubr.f32.vlgmr.msra.gmra.mrb[2].mxu1 %v6888_v19  ;;  %v586_v19 = vld [vmem:[%s9576_s3 + $0x150] sm:$0xff]  ;;  %v5951_v45 = vpack.c.bf16 %v731_v43, %v723_v42  ;;  %v819_v21 = vld [vmem:[%s9576_s3 + $0x898] sm:$0xff]  ;;  %v549_v43 = vld [vmem:[%s9576_s3 + $0x28] sm:$0xff] }
  0x89   : > { %5910 = vmatpush1.bf16.msra.mxu1 %v5909_v36  ;;  %v5917_v57 = vpack.c.bf16 %v586_v19, %v578_v50  ;;  %5890 = vmatpush1.bf16.msra.mxu0 %v5889_v52  ;;  %v707_v36 = vld [vmem:[%s9576_s3 + $0x518] sm:$0xff]  ;;  %v5953_v50 = vpack.c.bf16 %v730_v47, %v722_v46  ;;  %v746_v52 = vld [vmem:[%s9576_s3 + $0x650] sm:$0xff] }
  0x8a   : > { %5912 = vmatprep.subr.bf16.mxu1 %v5911_v37  ;;  %5892 = vmatprep.subr.bf16.mxu0 %v5891_v54  ;;  %v715_v37 = vld [vmem:[%s9576_s3 + $0x558] sm:$0xff]  ;;  %v5957_v55 = vpack.c.bf16 %v746_v52, %v738_v51  ;;  %v826_v42 = vld [vmem:[%s9576_s3 + $0x8d0] sm:$0xff]  ;;  %v548_v51 = vld [vmem:[%s9576_s3 + $0x20] sm:$0xff] }
  0x8b   : > { %v5947_v39 = vpack.c.bf16 %v715_v37, %v707_v36  ;;  %v763_v54 = vld [vmem:[%s9576_s3 + $0x6d8] sm:$0xff]  ;;  %v816_v36 = vld [vmem:[%s9576_s3 + $0x880] sm:$0xff]  ;;  %v574_v4 = vld [vmem:[%s9576_s3 + $0xf0] sm:$0xff] }
  0x8c   : > { %v5959_v56 = vpack.c.bf16 %v763_v54, %v755_v53  ;;  %v824_v37 = vld [vmem:[%s9576_s3 + $0x8c0] sm:$0xff]  ;;  %v551_v46 = vld [vmem:[%s9576_s3 + $0x38] sm:$0xff]  ;;  %v550_v53 = vld [vmem:[%s9576_s3 + $0x30] sm:$0xff] }
  0x8d   : > { %5914 = vmatpush1.bf16.msra.mxu1 %v5913_v48  ;;  %5894 = vmatpush1.bf16.msra.mxu0 %v5893_v61  ;;  %v739_v48 = vld [vmem:[%s9576_s3 + $0x618] sm:$0xff]  ;;  %v556_v52 = vld [vmem:[%s9576_s3 + $0x60] sm:$0xff]  ;;  %v558_v54 = vld [vmem:[%s9576_s3 + $0x70] sm:$0xff] }
  0x8e   : > { %5916 = vmatprep.subr.bf16.mxu1 %v5915_v49  ;;  %v747_v49 = vld [vmem:[%s9576_s3 + $0x658] sm:$0xff]  ;;  %v5981_v62 = vpack.c.bf16 %v556_v52, %v548_v51  ;;  %v6053_v63 = vpack.c.bf16 %v558_v54, %v550_v53  ;;  %v628_v51 = vld [vmem:[%s9576_s3 + $0x2a0] sm:$0xff] }
  0x8f   : > { %v5955_v19 = vpack.c.bf16 %v747_v49, %v739_v48  ;;  %v559_v47 = vld [vmem:[%s9576_s3 + $0x78] sm:$0xff]  ;;  %v5905_v48 = vpack.c.bf16 %v824_v37, %v816_v36  ;;  %v5977_v49 = vpack.c.bf16 %v826_v42, %v818_v41  ;;  %v636_v52 = vld [vmem:[%s9576_s3 + $0x2e0] sm:$0xff] }
  0x90   : > { %v599_v24 = vld [vmem:[%s9576_s3 + $0x1b8] sm:$0xff] }
  0x91   : > { %5918 = vmatpush1.bf16.msra.mxu1 %v5917_v57  ;;  %v754_v57 = vld [vmem:[%s9576_s3 + $0x690] sm:$0xff]  ;;  %v623_v36 = vld [vmem:[%s9576_s3 + $0x278] sm:$0xff] }
  0x92   : > { %5920 = vmatprep.subr.bf16.mxu1 %v5919_v58  ;;  %v762_v58 = vld [vmem:[%s9576_s3 + $0x6d0] sm:$0xff] }
  0x93   : > { %v5961_v61 = vpack.c.bf16 %v762_v58, %v754_v57  ;;  %v573_v57 = vld [vmem:[%s9576_s3 + $0xe8] sm:$0xff]  ;;  %v567_v58 = vld [vmem:[%s9576_s3 + $0xb8] sm:$0xff] }
  0x95   : > { %5922 = vmatpush1.bf16.msra.mxu1 %v5921_v1  ;;  %v5963_v1 = vpack.c.bf16 %v779_v60, %v771_v59  ;;  %v575_v59 = vld [vmem:[%s9576_s3 + $0xf8] sm:$0xff] }
  0x96   : > { %5924 = vmatprep.subr.bf16.mxu1 %v5923_v2  ;;  %v785_v2 = vld [vmem:[%s9576_s3 + $0x788] sm:$0xff] }
  0x97   : > { %v5895_v5 = vpack.c.bf16 %v793_v3, %v785_v2  ;;  %v572_v2 = vld [vmem:[%s9576_s3 + $0xe0] sm:$0xff]  ;;  %v566_v3 = vld [vmem:[%s9576_s3 + $0xb0] sm:$0xff] }
  0x99   : > { %5926 = vmatpush1.bf16.msra.mxu1 %v5925_v7  ;;  %v784_v7 = vld [vmem:[%s9576_s3 + $0x780] sm:$0xff]  ;;  %5896 = vmatprep.subr.bf16.mxu0 %v5895_v5  ;;  %v581_v5 = vld [vmem:[%s9576_s3 + $0x128] sm:$0xff] }
  0x9a   : > { %5928 = vmatprep.subr.bf16.mxu1 %v5927_v8  ;;  %v792_v8 = vld [vmem:[%s9576_s3 + $0x7c0] sm:$0xff] }
  0x9b   : > { %v5897_v9 = vpack.c.bf16 %v792_v8, %v784_v7  ;;  %v6055_v8 = vpack.c.bf16 %v575_v59, %v567_v58  ;;  %v653_v58 = vld [vmem:[%s9576_s3 + $0x368] sm:$0xff]  ;;  %v647_v59 = vld [vmem:[%s9576_s3 + $0x338] sm:$0xff] }
  0x9d   : > { %5930 = vmatpush1.bf16.msra.mxu1 %v5929_v13  ;;  %5898 = vmatpush1.bf16.msra.mxu0 %v5897_v9  ;;  %v794_v13 = vld [vmem:[%s9576_s3 + $0x7d0] sm:$0xff]  ;;  %v589_v9 = vld [vmem:[%s9576_s3 + $0x168] sm:$0xff] }
  0x9e   : > { %5932 = vmatprep.subr.bf16.mxu1 %v5931_v14  ;;  %v5969_v14 = vpack.c.bf16 %v794_v13, %v786_v12  ;;  %5900 = vmatprep.subr.bf16.mxu0 %v5899_v18  ;;  %v6057_v13 = vpack.c.bf16 %v574_v4, %v566_v3  ;;  %v5987_v16 = vpack.c.bf16 %v589_v9, %v581_v5  ;;  %v582_v18 = vld [vmem:[%s9576_s3 + $0x130] sm:$0xff]  ;;  %v663_v9 = vld [vmem:[%s9576_s3 + $0x3b8] sm:$0xff] }
  0x9f   : > { %v646_v4 = vld [vmem:[%s9576_s3 + $0x330] sm:$0xff] }
  0xa0   : > { %v654_v5 = vld [vmem:[%s9576_s3 + $0x370] sm:$0xff] }
  0xa1   : > { %5934 = vmatpush1.bf16.msra.mxu1 %v5933_v20  ;;  %v811_v20 = vld [vmem:[%s9576_s3 + $0x858] sm:$0xff] }
  0xa2   : > { %5936 = vmatprep.subr.bf16.mxu1 %v5935_v22  ;;  %v5971_v22 = vpack.c.bf16 %v811_v20, %v803_v17  ;;  %v590_v20 = vld [vmem:[%s9576_s3 + $0x170] sm:$0xff] }
  0xa5   : > { %5938 = vmatpush1.bf16.msra.mxu1 %v5937_v27  ;;  %v810_v27 = vld [vmem:[%s9576_s3 + $0x850] sm:$0xff] }
  0xa6   : > { %5940 = vmatprep.subr.bf16.mxu1 %v5939_v28  ;;  %v817_v28 = vld [vmem:[%s9576_s3 + $0x888] sm:$0xff]  ;;  %v5973_v35 = vpack.c.bf16 %v810_v27, %v802_v26  ;;  %v6061_v27 = vpack.c.bf16 %v590_v20, %v582_v18  ;;  %v670_v18 = vld [vmem:[%s9576_s3 + $0x3f0] sm:$0xff] }
  0xa7   : > { %v677_v20 = vld [vmem:[%s9576_s3 + $0x428] sm:$0xff] }
  0xa9   : > { %5942 = vmatpush1.bf16.msra.mxu1 %v5941_v32  ;;  %v827_v32 = vld [vmem:[%s9576_s3 + $0x8d8] sm:$0xff] }
  0xaa   : > { %5944 = vmatprep.subr.bf16.mxu1 %v5943_v33  ;;  %v5975_v40 = vpack.c.bf16 %v827_v32, %v819_v21  ;;  %v598_v21 = vld [vmem:[%s9576_s3 + $0x1b0] sm:$0xff] }
  0xab   : > { %v606_v32 = vld [vmem:[%s9576_s3 + $0x1f0] sm:$0xff] }
  0xad   : > { %5946 = vmatpush1.bf16.msra.mxu1 %v5945_v38 }
  0xae   : > { %5948 = vmatprep.subr.bf16.mxu1 %v5947_v39  ;;  %v5903_v39 = vpack.c.bf16 %v825_v31, %v817_v28  ;;  %v596_v28 = vld [vmem:[%s9576_s3 + $0x1a0] sm:$0xff] }
  0xb1   : > { %5950 = vmatpush1.bf16.msra.mxu1 %v5949_v44 }
  0xb2   : > { %5952 = vmatprep.subr.bf16.mxu1 %v5951_v45  ;;  %v557_v45 = vld [vmem:[%s9576_s3 + $0x68] sm:$0xff] }
  0xb5   : > { %5954 = vmatpush1.bf16.msra.mxu1 %v5953_v50  ;;  %v5979_v50 = vpack.c.bf16 %v557_v45, %v549_v43  ;;  %v614_v43 = vld [vmem:[%s9576_s3 + $0x230] sm:$0xff] }
  0xb6   : > { %5956 = vmatprep.subr.bf16.mxu1 %v5955_v19  ;;  %v6051_v19 = vpack.c.bf16 %v559_v47, %v551_v46  ;;  %v622_v45 = vld [vmem:[%s9576_s3 + $0x270] sm:$0xff]  ;;  %v629_v46 = vld [vmem:[%s9576_s3 + $0x2a8] sm:$0xff] }
  0xb7   : > { %v637_v47 = vld [vmem:[%s9576_s3 + $0x2e8] sm:$0xff] }
  0xb8   : > { %v5999_v53 = vpack.c.bf16 %v637_v47, %v629_v46  ;;  %v717_v46 = vld [vmem:[%s9576_s3 + $0x568] sm:$0xff]  ;;  %v711_v47 = vld [vmem:[%s9576_s3 + $0x538] sm:$0xff] }
  0xb9   : > { %5958 = vmatpush1.bf16.msra.mxu1 %v5957_v55  ;;  %v565_v55 = vld [vmem:[%s9576_s3 + $0xa8] sm:$0xff] }
  0xba   : > { %5960 = vmatprep.subr.bf16.mxu1 %v5959_v56  ;;  %v5983_v7 = vpack.c.bf16 %v573_v57, %v565_v55  ;;  %v630_v55 = vld [vmem:[%s9576_s3 + $0x2b0] sm:$0xff]  ;;  %v645_v57 = vld [vmem:[%s9576_s3 + $0x328] sm:$0xff] }
  0xbd   : > { %5962 = vmatpush1.bf16.msra.mxu1 %v5961_v61 }
  0xbe   : > { %5964 = vmatprep.subr.bf16.mxu1 %v5963_v1  ;;  %v564_v1 = vld [vmem:[%s9576_s3 + $0xa0] sm:$0xff] }
  0xbf   : > { %v5985_v12 = vpack.c.bf16 %v572_v2, %v564_v1  ;;  %v652_v1 = vld [vmem:[%s9576_s3 + $0x360] sm:$0xff]  ;;  %v6003_v2 = vpack.c.bf16 %v653_v58, %v645_v57  ;;  %v733_v57 = vld [vmem:[%s9576_s3 + $0x5e8] sm:$0xff]  ;;  %v727_v58 = vld [vmem:[%s9576_s3 + $0x5b8] sm:$0xff] }
  0xc1   : > { %5966 = vmatpush1.bf16.msra.mxu1 %v5965_v10  ;;  %v583_v10 = vld [vmem:[%s9576_s3 + $0x138] sm:$0xff] }
  0xc2   : > { %5968 = vmatprep.subr.bf16.mxu1 %v5967_v11  ;;  %v591_v11 = vld [vmem:[%s9576_s3 + $0x178] sm:$0xff] }
  0xc3   : > { %v6059_v17 = vpack.c.bf16 %v591_v11, %v583_v10  ;;  %v671_v10 = vld [vmem:[%s9576_s3 + $0x3f8] sm:$0xff] }
  0xc5   : > { %5970 = vmatpush1.bf16.msra.mxu1 %v5969_v14  ;;  %v580_v14 = vld [vmem:[%s9576_s3 + $0x120] sm:$0xff] }
  0xc6   : > { %5972 = vmatprep.subr.bf16.mxu1 %v5971_v22  ;;  %v597_v22 = vld [vmem:[%s9576_s3 + $0x1a8] sm:$0xff]  ;;  %v5989_v26 = vpack.c.bf16 %v588_v15, %v580_v14  ;;  %v668_v14 = vld [vmem:[%s9576_s3 + $0x3e0] sm:$0xff] }
 0x13b   : > { %v460_v25 = vpop.f32.mrb[0].mxu1 }
 0x13c   : > { %v538_v29 = vmul.f32 0.1, %v460_v25  ;;  %v462_v30 = vpop.f32.mrb[1].mxu1  ;;  %vm535_vm1 = vcmp.ge.f32.partialorder %v460_v25, 0.0 }
 0x13d   : > { %vm536_vm2 = vcmp.ge.f32.partialorder %v462_v30, 0.0  ;;  %v539_v33 = vmul.f32 0.1, %v462_v30 }
 0x13e   : > { %v7312_v44 = vsel %vm535_vm1, %v460_v25, %v538_v29  ;;  %v607_v25 = vld [vmem:[%s9576_s3 + $0x1f8] sm:$0xff]  ;;  %v604_v29 = vld [vmem:[%s9576_s3 + $0x1e0] sm:$0xff] }
 0x13f   : > { %v542_v38 = vsel %vm536_vm2, %v462_v30, %v539_v33  ;;  %v5991_v30 = vpack.c.bf16 %v605_v23, %v597_v22  ;;  %v6063_v31 = vpack.c.bf16 %v607_v25, %v599_v24  ;;  %v613_v33 = vld [vmem:[%s9576_s3 + $0x228] sm:$0xff]  ;;  %v5993_v37 = vpack.c.bf16 %v604_v29, %v596_v28  ;;  %v679_v23 = vld [vmem:[%s9576_s3 + $0x438] sm:$0xff]  ;;  %v684_v28 = vld [vmem:[%s9576_s3 + $0x460] sm:$0xff] }
 0x140   : > { %900 = vmatprep.mubr.f32.mxu0 %v542_v38  ;;  %1042 = vmatprep.mubr.f32.mxu1 %v542_v38  ;;  %v685_v22 = vld [vmem:[%s9576_s3 + $0x468] sm:$0xff]  ;;  %v687_v24 = vld [vmem:[%s9576_s3 + $0x478] sm:$0xff] }
 0x141   : > { %901 = vmatmul.mubr.f32.vlgmr.msra.gmra.mrb[0].mxu0 %v7312_v44  ;;  %1043 = vmatmul.mubr.f32.vlgmr.msra.gmra.mrb[4].mxu1 %v7312_v44  ;;  %v6011_v29 = vpack.c.bf16 %v685_v22, %v677_v20  ;;  %v765_v20 = vld [vmem:[%s9576_s3 + $0x6e8] sm:$0xff]  ;;  %v759_v22 = vld [vmem:[%s9576_s3 + $0x6b8] sm:$0xff] }
 0x142   : > { %5902 = vmatpush1.bf16.msra.mxu0 %v5901_v34  ;;  %5974 = vmatpush1.bf16.msra.mxu1 %v5973_v35  ;;  %v621_v34 = vld [vmem:[%s9576_s3 + $0x268] sm:$0xff]  ;;  %v615_v35 = vld [vmem:[%s9576_s3 + $0x238] sm:$0xff] }
 0x143   : > { %5904 = vmatprep.subr.bf16.mxu0 %v5903_v39  ;;  %5976 = vmatprep.subr.bf16.mxu1 %v5975_v40  ;;  %v612_v39 = vld [vmem:[%s9576_s3 + $0x220] sm:$0xff]  ;;  %v5995_v41 = vpack.c.bf16 %v621_v34, %v613_v33  ;;  %v6067_v42 = vpack.c.bf16 %v623_v36, %v615_v35  ;;  %v701_v33 = vld [vmem:[%s9576_s3 + $0x4e8] sm:$0xff]  ;;  %v695_v34 = vld [vmem:[%s9576_s3 + $0x4b8] sm:$0xff] }
 0x144   : > { %971 = vmatprep.mubr.f32.mxu0 %v6586_v0  ;;  %1113 = vmatprep.mubr.f32.mxu1 %v6586_v0  ;;  %v620_v40 = vld [vmem:[%s9576_s3 + $0x260] sm:$0xff]  ;;  %v703_v35 = vld [vmem:[%s9576_s3 + $0x4f8] sm:$0xff] }
 0x146   : > { %5906 = vmatpush1.bf16.msra.mxu0 %v5905_v48  ;;  %5978 = vmatpush1.bf16.msra.mxu1 %v5977_v49  ;;  %v631_v48 = vld [vmem:[%s9576_s3 + $0x2b8] sm:$0xff] }
 0x147   : > { %5980 = vmatprep.subr.bf16.mxu0 %v5979_v50  ;;  %6052 = vmatprep.subr.bf16.mxu1 %v6051_v19  ;;  %v639_v49 = vld [vmem:[%s9576_s3 + $0x2f8] sm:$0xff]  ;;  %v5997_v50 = vpack.c.bf16 %v620_v40, %v612_v39  ;;  %v6069_v19 = vpack.c.bf16 %v622_v45, %v614_v43  ;;  %v700_v39 = vld [vmem:[%s9576_s3 + $0x4e0] sm:$0xff]  ;;  %v702_v43 = vld [vmem:[%s9576_s3 + $0x4f0] sm:$0xff] }
 0x148   : > { %v6071_v54 = vpack.c.bf16 %v639_v49, %v631_v48  ;;  %v709_v45 = vld [vmem:[%s9576_s3 + $0x528] sm:$0xff]  ;;  %v719_v48 = vld [vmem:[%s9576_s3 + $0x578] sm:$0xff] }
 0x15b   : > { %v531_v56 = vpop.f32.mrb[2].mxu1 }
 0x15c   : > { %vm537_vm4 = vcmp.ge.f32.partialorder %v531_v56, 0.0  ;;  %v540_v60 = vmul.f32 0.1, %v531_v56  ;;  %v5330_v61 = vpop.f32.mrb[3].mxu1 }
 0x15d   : > { %v6001_v61 = vpack.c.bf16 %v636_v52, %v628_v51  ;;  %v716_v51 = vld [vmem:[%s9576_s3 + $0x560] sm:$0xff]  ;;  %v6019_v52 = vpack.c.bf16 %v717_v46, %v709_v45  ;;  %v797_v45 = vld [vmem:[%s9576_s3 + $0x7e8] sm:$0xff]  ;;  %v791_v46 = vld [vmem:[%s9576_s3 + $0x7b8] sm:$0xff] }
 0x15e   : > { %v7366_v6 = vsel %vm537_vm4, %v531_v56, %v540_v60  ;;  %v638_v56 = vld [vmem:[%s9576_s3 + $0x2f0] sm:$0xff]  ;;  %v655_v60 = vld [vmem:[%s9576_s3 + $0x378] sm:$0xff] }
 0x15f   : > { %4944 = vmatmul.mubr.msk.f32.vlgmr.msra.gmra.mrb[0].mxu0 %vm832_vm3, %v7366_v6  ;;  %4945 = vmatmul.mubr.msk.f32.vlgmr.msra.gmra.mrb[4].mxu1 %vm832_vm3, %v7366_v6  ;;  %v6075_v3 = vpack.c.bf16 %v655_v60, %v647_v59  ;;  %v735_v59 = vld [vmem:[%s9576_s3 + $0x5f8] sm:$0xff] }
 0x160   : > { %5982 = vmatpush1.bf16.msra.mxu0 %v5981_v62  ;;  %6054 = vmatpush1.bf16.msra.mxu1 %v6053_v63  ;;  %v6073_v62 = vpack.c.bf16 %v638_v56, %v630_v55  ;;  %v644_v63 = vld [vmem:[%s9576_s3 + $0x320] sm:$0xff]  ;;  %v718_v55 = vld [vmem:[%s9576_s3 + $0x570] sm:$0xff]  ;;  %v725_v56 = vld [vmem:[%s9576_s3 + $0x5a8] sm:$0xff] }
 0x161   : > { %1184 = vmatprep.mubr.f32.mxu0 %v542_v38  ;;  %1326 = vmatprep.mubr.f32.mxu1 %v542_v38  ;;  %v6065_v38 = vpack.c.bf16 %v606_v32, %v598_v21  ;;  %v6005_v11 = vpack.c.bf16 %v652_v1, %v644_v63  ;;  %v686_v21 = vld [vmem:[%s9576_s3 + $0x470] sm:$0xff]  ;;  %v693_v32 = vld [vmem:[%s9576_s3 + $0x4a8] sm:$0xff]  ;;  %v732_v63 = vld [vmem:[%s9576_s3 + $0x5e0] sm:$0xff]  ;;  %v6023_v1 = vpack.c.bf16 %v733_v57, %v725_v56 }
 0x162   : > { %5984 = vmatprep.subr.bf16.mxu0 %v5983_v7  ;;  %6056 = vmatprep.subr.bf16.mxu1 %v6055_v8  ;;  %v661_v7 = vld [vmem:[%s9576_s3 + $0x3a8] sm:$0xff]  ;;  %v6015_v40 = vpack.c.bf16 %v701_v33, %v693_v32  ;;  %v775_v33 = vld [vmem:[%s9576_s3 + $0x738] sm:$0xff] }
 0x163   : > { %v669_v8 = vld [vmem:[%s9576_s3 + $0x3e8] sm:$0xff]  ;;  %v807_v57 = vld [vmem:[%s9576_s3 + $0x838] sm:$0xff] }
 0x164   : > { %5986 = vmatpush1.bf16.msra.mxu0 %v5985_v12  ;;  %6058 = vmatpush1.bf16.msra.mxu1 %v6057_v13  ;;  %v6077_v12 = vpack.c.bf16 %v654_v5, %v646_v4  ;;  %v660_v13 = vld [vmem:[%s9576_s3 + $0x3a0] sm:$0xff]  ;;  %v6007_v15 = vpack.c.bf16 %v669_v8, %v661_v7  ;;  %v734_v4 = vld [vmem:[%s9576_s3 + $0x5f0] sm:$0xff]  ;;  %v741_v5 = vld [vmem:[%s9576_s3 + $0x628] sm:$0xff] }
 0x165   : > { %5988 = vmatprep.subr.bf16.mxu0 %v5987_v16  ;;  %6060 = vmatprep.subr.bf16.mxu1 %v6059_v17  ;;  %v6079_v16 = vpack.c.bf16 %v671_v10, %v663_v9  ;;  %v662_v17 = vld [vmem:[%s9576_s3 + $0x3b0] sm:$0xff]  ;;  %v6009_v25 = vpack.c.bf16 %v668_v14, %v660_v13  ;;  %v749_v7 = vld [vmem:[%s9576_s3 + $0x668] sm:$0xff]  ;;  %v743_v8 = vld [vmem:[%s9576_s3 + $0x638] sm:$0xff] }
 0x166   : > { %v751_v9 = vld [vmem:[%s9576_s3 + $0x678] sm:$0xff]  ;;  %v748_v13 = vld [vmem:[%s9576_s3 + $0x660] sm:$0xff]  ;;  %v6027_v14 = vpack.c.bf16 %v749_v7, %v741_v5  ;;  %v781_v32 = vld [vmem:[%s9576_s3 + $0x768] sm:$0xff] }
 0x167   : > { %v813_v56 = vld [vmem:[%s9576_s3 + $0x868] sm:$0xff]  ;;  %v823_v7 = vld [vmem:[%s9576_s3 + $0x8b8] sm:$0xff] }
 0x168   : > { %5990 = vmatpush1.bf16.msra.mxu0 %v5989_v26  ;;  %6062 = vmatpush1.bf16.msra.mxu1 %v6061_v27  ;;  %v6081_v26 = vpack.c.bf16 %v670_v18, %v662_v17  ;;  %v676_v27 = vld [vmem:[%s9576_s3 + $0x420] sm:$0xff]  ;;  %v750_v17 = vld [vmem:[%s9576_s3 + $0x670] sm:$0xff]  ;;  %v757_v18 = vld [vmem:[%s9576_s3 + $0x6a8] sm:$0xff] }
 0x169   : > { %5992 = vmatprep.subr.bf16.mxu0 %v5991_v30  ;;  %6064 = vmatprep.subr.bf16.mxu1 %v6063_v31  ;;  %v6083_v30 = vpack.c.bf16 %v687_v24, %v679_v23  ;;  %v678_v31 = vld [vmem:[%s9576_s3 + $0x430] sm:$0xff]  ;;  %v6013_v36 = vpack.c.bf16 %v684_v28, %v676_v27  ;;  %v767_v23 = vld [vmem:[%s9576_s3 + $0x6f8] sm:$0xff]  ;;  %v764_v27 = vld [vmem:[%s9576_s3 + $0x6e0] sm:$0xff]  ;;  %v6031_v28 = vpack.c.bf16 %v765_v20, %v757_v18 }
 0x16a   : > { %v829_v5 = vld [vmem:[%s9576_s3 + $0x8e8] sm:$0xff] }
 0x16b   : > { %v2652_v18 = vld [vmem:[#allocation2 + $0x8] sm:$0xff] }
 0x16c   : > { %5994 = vmatpush1.bf16.msra.mxu0 %v5993_v37  ;;  %6066 = vmatpush1.bf16.msra.mxu1 %v6065_v38  ;;  %v6085_v37 = vpack.c.bf16 %v686_v21, %v678_v31  ;;  %v692_v38 = vld [vmem:[%s9576_s3 + $0x4a0] sm:$0xff]  ;;  %v766_v31 = vld [vmem:[%s9576_s3 + $0x6f0] sm:$0xff]  ;;  %v773_v21 = vld [vmem:[%s9576_s3 + $0x728] sm:$0xff] }
 0x16d   : > { %5996 = vmatprep.subr.bf16.mxu0 %v5995_v41  ;;  %6068 = vmatprep.subr.bf16.mxu1 %v6067_v42  ;;  %v6087_v41 = vpack.c.bf16 %v703_v35, %v695_v34  ;;  %v694_v42 = vld [vmem:[%s9576_s3 + $0x4b0] sm:$0xff]  ;;  %v6017_v49 = vpack.c.bf16 %v700_v39, %v692_v38  ;;  %v783_v34 = vld [vmem:[%s9576_s3 + $0x778] sm:$0xff]  ;;  %v780_v38 = vld [vmem:[%s9576_s3 + $0x760] sm:$0xff]  ;;  %v6035_v39 = vpack.c.bf16 %v781_v32, %v773_v21 }
 0x16e   : > { %v2660_v21 = vld [vmem:[#allocation2 + $0x48] sm:$0xff] }
 0x170   : > { %5998 = vmatpush1.bf16.msra.mxu0 %v5997_v50  ;;  %6070 = vmatpush1.bf16.msra.mxu1 %v6069_v19  ;;  %v6089_v50 = vpack.c.bf16 %v702_v43, %v694_v42  ;;  %v708_v19 = vld [vmem:[%s9576_s3 + $0x520] sm:$0xff]  ;;  %v782_v42 = vld [vmem:[%s9576_s3 + $0x770] sm:$0xff]  ;;  %v789_v43 = vld [vmem:[%s9576_s3 + $0x7a8] sm:$0xff] }
 0x171   : > { %6000 = vmatprep.subr.bf16.mxu0 %v5999_v53  ;;  %6072 = vmatprep.subr.bf16.mxu1 %v6071_v54  ;;  %v6091_v53 = vpack.c.bf16 %v719_v48, %v711_v47  ;;  %v710_v54 = vld [vmem:[%s9576_s3 + $0x530] sm:$0xff]  ;;  %v6021_v60 = vpack.c.bf16 %v716_v51, %v708_v19  ;;  %v799_v47 = vld [vmem:[%s9576_s3 + $0x7f8] sm:$0xff]  ;;  %v796_v19 = vld [vmem:[%s9576_s3 + $0x7e0] sm:$0xff]  ;;  %v6039_v51 = vpack.c.bf16 %v797_v45, %v789_v43 }
 0x174   : > { %6002 = vmatpush1.bf16.msra.mxu0 %v6001_v61  ;;  %6074 = vmatpush1.bf16.msra.mxu1 %v6073_v62  ;;  %v6093_v61 = vpack.c.bf16 %v718_v55, %v710_v54  ;;  %v724_v62 = vld [vmem:[%s9576_s3 + $0x5a0] sm:$0xff]  ;;  %v798_v54 = vld [vmem:[%s9576_s3 + $0x7f0] sm:$0xff]  ;;  %v805_v55 = vld [vmem:[%s9576_s3 + $0x828] sm:$0xff] }
 0x175   : > { %6004 = vmatprep.subr.bf16.mxu0 %v6003_v2  ;;  %6076 = vmatprep.subr.bf16.mxu1 %v6075_v3  ;;  %v6095_v2 = vpack.c.bf16 %v735_v59, %v727_v58  ;;  %v726_v3 = vld [vmem:[%s9576_s3 + $0x5b0] sm:$0xff]  ;;  %v6025_v10 = vpack.c.bf16 %v732_v63, %v724_v62  ;;  %v815_v58 = vld [vmem:[%s9576_s3 + $0x878] sm:$0xff]  ;;  %v812_v62 = vld [vmem:[%s9576_s3 + $0x860] sm:$0xff]  ;;  %v6043_v63 = vpack.c.bf16 %v813_v56, %v805_v55 }
 0x178   : > { %6006 = vmatpush1.bf16.msra.mxu0 %v6005_v11  ;;  %6078 = vmatpush1.bf16.msra.mxu1 %v6077_v12  ;;  %v6097_v11 = vpack.c.bf16 %v734_v4, %v726_v3  ;;  %v740_v12 = vld [vmem:[%s9576_s3 + $0x620] sm:$0xff]  ;;  %v814_v3 = vld [vmem:[%s9576_s3 + $0x870] sm:$0xff]  ;;  %v821_v4 = vld [vmem:[%s9576_s3 + $0x8a8] sm:$0xff] }
 0x179   : > { %6008 = vmatprep.subr.bf16.mxu0 %v6007_v15  ;;  %6080 = vmatprep.subr.bf16.mxu1 %v6079_v16  ;;  %v6099_v15 = vpack.c.bf16 %v751_v9, %v743_v8  ;;  %v742_v16 = vld [vmem:[%s9576_s3 + $0x630] sm:$0xff]  ;;  %v6029_v24 = vpack.c.bf16 %v748_v13, %v740_v12  ;;  %v831_v8 = vld [vmem:[%s9576_s3 + $0x8f8] sm:$0xff]  ;;  %v6047_v12 = vpack.c.bf16 %v829_v5, %v821_v4  ;;  %v7805_v5 = vld [vmem:[%s7770_s19 + $0x40] sm:$0xff] }
 0x17a   : > { %v6119_v13 = vpack.c.bf16 %v831_v8, %v823_v7  ;;  %v3065_v4 = vld [vmem:[#allocation4 + $0x98] sm:$0xff]  ;;  %9724 = vst [vmem:[#allocation15_spill] sm:$0xff] %v7805_v5 }
 0x17c   : > { %6010 = vmatpush1.bf16.msra.mxu0 %v6009_v25  ;;  %6082 = vmatpush1.bf16.msra.mxu1 %v6081_v26  ;;  %v6101_v25 = vpack.c.bf16 %v750_v17, %v742_v16  ;;  %v756_v26 = vld [vmem:[%s9576_s3 + $0x6a0] sm:$0xff]  ;;  %v830_v16 = vld [vmem:[%s9576_s3 + $0x8f0] sm:$0xff] }
 0x17d   : > { %6012 = vmatprep.subr.bf16.mxu0 %v6011_v29  ;;  %6084 = vmatprep.subr.bf16.mxu1 %v6083_v30  ;;  %v6103_v29 = vpack.c.bf16 %v767_v23, %v759_v22  ;;  %v758_v30 = vld [vmem:[%s9576_s3 + $0x6b0] sm:$0xff]  ;;  %v6033_v35 = vpack.c.bf16 %v764_v27, %v756_v26  ;;  %v2651_v17 = vld [vmem:[#allocation2] sm:$0xff] }
 0x17e   : > { %v6123_v23 = vpack.c.bf16 %v2652_v18, %v2651_v17  ;;  %v2655_v27 = vld [vmem:[#allocation2 + $0x20] sm:$0xff]  ;;  %v7822_v17 = vld [vmem:[%s7770_s19 + $0x48] sm:$0xff]  ;;  %v9729_v18 = vmov 0 }
 0x17f   : > { %9728 = vst [vmem:[#allocation17_spill] sm:$0xff] %v7822_v17 }
 0x180   : > { %6014 = vmatpush1.bf16.msra.mxu0 %v6013_v36  ;;  %6086 = vmatpush1.bf16.msra.mxu1 %v6085_v37  ;;  %v6105_v36 = vpack.c.bf16 %v766_v31, %v758_v30  ;;  %v772_v37 = vld [vmem:[%s9576_s3 + $0x720] sm:$0xff]  ;;  %v2658_v30 = vld [vmem:[#allocation2 + $0x38] sm:$0xff] }
 0x181   : > { %6016 = vmatprep.subr.bf16.mxu0 %v6015_v40  ;;  %6088 = vmatprep.subr.bf16.mxu1 %v6087_v41  ;;  %v6107_v40 = vpack.c.bf16 %v783_v34, %v775_v33  ;;  %v774_v41 = vld [vmem:[%s9576_s3 + $0x730] sm:$0xff]  ;;  %v6037_v48 = vpack.c.bf16 %v780_v38, %v772_v37  ;;  %v2659_v31 = vld [vmem:[#allocation2 + $0x40] sm:$0xff]  ;;  %v2662_v34 = vld [vmem:[#allocation2 + $0x58] sm:$0xff] }
 0x182   : > { %v6139_v32 = vpack.c.bf16 %v2660_v21, %v2659_v31  ;;  %v2661_v33 = vld [vmem:[#allocation2 + $0x50] sm:$0xff]  ;;  %v3069_v31 = vld [vmem:[#allocation4 + $0xb8] sm:$0xff] }
 0x183   : > { %v2665_v38 = vld [vmem:[#allocation2 + $0x70] sm:$0xff] }
 0x184   : > { %6018 = vmatpush1.bf16.msra.mxu0 %v6017_v49  ;;  %6090 = vmatpush1.bf16.msra.mxu1 %v6089_v50  ;;  %v6109_v49 = vpack.c.bf16 %v782_v42, %v774_v41  ;;  %v788_v50 = vld [vmem:[%s9576_s3 + $0x7a0] sm:$0xff]  ;;  %v1409_v41 = vlaneseq  ;;  %v6589_v42 = vmov 1966171168  }
 0x185   : > { %6020 = vmatprep.subr.bf16.mxu0 %v6019_v52  ;;  %6092 = vmatprep.subr.bf16.mxu1 %v6091_v53  ;;  %v6111_v52 = vpack.c.bf16 %v799_v47, %v791_v46  ;;  %v790_v53 = vld [vmem:[%s9576_s3 + $0x7b0] sm:$0xff]  ;;  %v6041_v59 = vpack.c.bf16 %v796_v19, %v788_v50  ;;  %v1407_v43 = vunpack.c.l.s4 %v6589_v42  ;;  %v7775_v46 = vld [vmem:[%s7770_s19] sm:$0xff]  ;;  %v7778_v47 = vld [vmem:[%s7770_s19 + $0x8] sm:$0xff] }
 0x186   : > { %v7772_v45 = vshrl.u32 %v1409_v41, 7  ;;  %9717 = vst [vmem:[#allocation8_spill] sm:$0xff] %v7775_v46  ;;  %9718 = vst [vmem:[#allocation9_spill] sm:$0xff] %v7778_v47  ;;  %v2394_v55 = vrot.slane %v7775_v46, 7  ;;  %v2395_v56 = vrot.slane %v7778_v47, 7  ;;  %v9738_v41 = vmov 0 }
 0x187   : > { %v1408_v19 = vunpack.c.0.s8 %v1407_v43  ;;  %v2459_v42 = vrot.slane %v7775_v46, 1 }
 0x188   : > { %6022 = vmatpush1.bf16.msra.mxu0 %v6021_v60  ;;  %6094 = vmatpush1.bf16.msra.mxu1 %v6093_v61  ;;  %v6113_v60 = vpack.c.bf16 %v798_v54, %v790_v53  ;;  %v804_v61 = vld [vmem:[%s9576_s3 + $0x820] sm:$0xff]  ;;  %v2145_v50 = vadd.s32 64, %v7772_v45  ;;  %v2157_v54 = vand.u32 15, %v7772_v45  ;;  %v7808_v7 = vsub.s32 0, %v7772_v45 }
 0x189   : > { %6024 = vmatprep.subr.bf16.mxu0 %v6023_v1  ;;  %6096 = vmatprep.subr.bf16.mxu1 %v6095_v2  ;;  %v6115_v1 = vpack.c.bf16 %v815_v58, %v807_v57  ;;  %v806_v2 = vld [vmem:[%s9576_s3 + $0x830] sm:$0xff]  ;;  %v6045_v9 = vpack.c.bf16 %v812_v62, %v804_v61  ;;  %v7790_v53 = vld [vmem:[%s7770_s19 + $0x20] sm:$0xff]  ;;  %v3063_v61 = vld [vmem:[#allocation4 + $0x88] sm:$0xff] }
 0x18a   : > { %9721 = vst [vmem:[#allocation12_spill] sm:$0xff] %v7790_v53  ;;  %v3064_v62 = vld [vmem:[#allocation4 + $0x90] sm:$0xff]  ;;  %vm7812_vm6 = vcmp.eq.s32.totalorder %v2157_v54, 0 }
 0x18c   : > { %6026 = vmatpush1.bf16.msra.mxu0 %v6025_v10  ;;  %6098 = vmatpush1.bf16.msra.mxu1 %v6097_v11  ;;  %v6117_v10 = vpack.c.bf16 %v814_v3, %v806_v2  ;;  %v820_v11 = vld [vmem:[%s9576_s3 + $0x8a0] sm:$0xff]  ;;  %v7802_v2 = vsub.s32 %v1408_v19, %v7772_v45 }
 0x18d   : > { %6028 = vmatprep.subr.bf16.mxu0 %v6027_v14  ;;  %6100 = vmatprep.subr.bf16.mxu1 %v6099_v15  ;;  %v828_v14 = vld [vmem:[%s9576_s3 + $0x8e0] sm:$0xff]  ;;  %v822_v15 = vld [vmem:[%s9576_s3 + $0x8b0] sm:$0xff] }
 0x18e   : > { %v6049_v20 = vpack.c.bf16 %v828_v14, %v820_v11  ;;  %v6121_v22 = vpack.c.bf16 %v830_v16, %v822_v15  ;;  %9723 = vst [vmem:[#allocation14_spill] sm:$0xff] %v7802_v2  ;;  %v3066_v11 = vld [vmem:[#allocation4 + $0xa0] sm:$0xff]  ;;  %v7817_v14 = vsel %vm9644_vm5, %v2394_v55, %v2395_v56  ;;  %v2140_v16 = vadd.s32 24, %v7772_v45 }
 0x190   : > { %6030 = vmatpush1.bf16.msra.mxu0 %v6029_v24  ;;  %6102 = vmatpush1.bf16.msra.mxu1 %v6101_v25  ;;  %v2653_v24 = vld [vmem:[#allocation2 + $0x10] sm:$0xff]  ;;  %v2654_v25 = vld [vmem:[#allocation2 + $0x18] sm:$0xff] }
 0x191   : > { %6032 = vmatprep.subr.bf16.mxu0 %v6031_v28  ;;  %6104 = vmatprep.subr.bf16.mxu1 %v6103_v29  ;;  %v6127_v26 = vpack.c.bf16 %v2654_v25, %v2653_v24  ;;  %v2656_v28 = vld [vmem:[#allocation2 + $0x28] sm:$0xff]  ;;  %v2657_v29 = vld [vmem:[#allocation2 + $0x30] sm:$0xff] }
 0x194   : > { %6034 = vmatpush1.bf16.msra.mxu0 %v6033_v35  ;;  %6106 = vmatpush1.bf16.msra.mxu1 %v6105_v36  ;;  %v6143_v35 = vpack.c.bf16 %v2662_v34, %v2661_v33  ;;  %v2664_v36 = vld [vmem:[#allocation2 + $0x68] sm:$0xff]  ;;  %v2178_v33 = vand.u32 15, %v2140_v16  ;;  %v3072_v16 = vld [vmem:[#allocation4 + $0xd0] sm:$0xff] }
 0x195   : > { %6036 = vmatprep.subr.bf16.mxu0 %v6035_v39  ;;  %6108 = vmatprep.subr.bf16.mxu1 %v6107_v40  ;;  %v2666_v39 = vld [vmem:[#allocation2 + $0x78] sm:$0xff] }
 0x196   : > { %v6151_v40 = vpack.c.bf16 %v2666_v39, %v2665_v38  ;;  %vm7890_vm12 = vcmp.eq.s32.totalorder %v2178_v33, 15  ;;  %v2474_v33 = vrot.slane %v7805_v5, 1 }
 0x198   : > { %6038 = vmatpush1.bf16.msra.mxu0 %v6037_v48  ;;  %6110 = vmatpush1.bf16.msra.mxu1 %v6109_v49  ;;  %v2139_v48 = vadd.s32 16, %v7772_v45  ;;  %v2141_v49 = vadd.s32 32, %v7772_v45 }
 0x199   : > { %6040 = vmatprep.subr.bf16.mxu0 %v6039_v51  ;;  %6112 = vmatprep.subr.bf16.mxu1 %v6111_v52  ;;  %v7784_v51 = vld [vmem:[%s7770_s19 + $0x10] sm:$0xff]  ;;  %v7787_v52 = vld [vmem:[%s7770_s19 + $0x18] sm:$0xff] }
 0x19a   : > { %9719 = vst [vmem:[#allocation10_spill] sm:$0xff] %v7784_v51  ;;  %9720 = vst [vmem:[#allocation11_spill] sm:$0xff] %v7787_v52  ;;  %v2171_v57 = vand.u32 15, %v2139_v48  ;;  %v2185_v58 = vand.u32 15, %v2141_v49  ;;  %v2397_v8 = vrot.slane %v7784_v51, 7  ;;  %v2399_v15 = vrot.slane %v7787_v52, 7 }
 0x19b   : > { %v2142_v48 = vadd.s32 40, %v7772_v45  ;;  %v3070_v49 = vld [vmem:[#allocation4 + $0xc0] sm:$0xff] }
 0x19c   : > { %6042 = vmatpush1.bf16.msra.mxu0 %v6041_v59  ;;  %6114 = vmatpush1.bf16.msra.mxu1 %v6113_v60  ;;  %v2213_v59 = vand.u32 15, %v2145_v50  ;;  %v3062_v60 = vld [vmem:[#allocation4 + $0x80] sm:$0xff]  ;;  %vm7824_vm7 = vcmp.eq.s32.totalorder %v2171_v57, 0  ;;  %vm7828_vm8 = vcmp.eq.s32.totalorder %v2185_v58, 0  ;;  %v7846_v21 = vsel %vm9644_vm5, %v2397_v8, %v2399_v15  ;;  %v3071_v50 = vld [vmem:[#allocation4 + $0xc8] sm:$0xff]  ;;  %v7895_v57 = vld [vmem:[%s7770_s19 + $0x30] sm:$0xff] }
 0x19d   : > { %6044 = vmatprep.subr.bf16.mxu0 %v6043_v63  ;;  %6116 = vmatprep.subr.bf16.mxu1 %v6115_v1  ;;  %v7796_v63 = vld [vmem:[%s7770_s19 + $0x28] sm:$0xff]  ;;  %v7799_v1 = vld [vmem:[%s7770_s19 + $0x38] sm:$0xff]  ;;  %v6155_v3 = vpack.c.bf16 %v3063_v61, %v3062_v60  ;;  %v9730_v18 = vsel %vm7824_vm7, 4294967295, %v9729_v18  ;;  %9744 = vst [vmem:[#allocation23_spill] sm:$0xff] %v7895_v57  ;;  %v2144_v60 = vadd.s32 56, %v7772_v45  ;;  %v2146_v61 = vadd.s32 72, %v7772_v45 }
 0x19e   : > { %9722 = vst [vmem:[#allocation13_spill] sm:$0xff] %v7796_v63  ;;  %9731 = vst [vmem:[#allocation18_spill] sm:$0xff] %v9730_v18  ;;  %vm7832_vm9 = vcmp.eq.s32.totalorder %v2213_v59, 0  ;;  %v2403_v24 = vrot.slane %v7796_v63, 7  ;;  %v9583_v25 = vrot.slane %v7799_v1, 7  ;;  %v2143_v59 = vadd.s32 48, %v7772_v45 }
 0x19f   : > { %1185 = vmatmul.mubr.f32.vlgmr.msra.gmra.mrb[2].mxu0 %v7312_v44  ;;  %1327 = vmatmul.mubr.f32.vlgmr.msra.gmra.mrb[6].mxu1 %v7312_v44  ;;  %v6131_v44 = vpack.c.bf16 %v2656_v28, %v2655_v27  ;;  %v7841_v28 = vsel %vm9644_vm5, %v2395_v56, %v2397_v8  ;;  %v9741_v56 = vmov 0  ;;  %v6171_v8 = vpack.c.bf16 %v3071_v50, %v3070_v49 }
 0x1a0   : > { %6046 = vmatpush1.bf16.msra.mxu0 %v6045_v9  ;;  %6118 = vmatpush1.bf16.msra.mxu1 %v6117_v10  ;;  %v2138_v9 = vadd.s32 8, %v7772_v45  ;;  %v6159_v10 = vpack.c.bf16 %v3065_v4, %v3064_v62  ;;  %v9742_v56 = vsel %vm7890_vm12, 4294967295, %v9741_v56  ;;  %v2468_v4 = vrot.slane %v7796_v63, 1 }
 0x1a1   : > { %6048 = vmatprep.subr.bf16.mxu0 %v6047_v12  ;;  %6120 = vmatprep.subr.bf16.mxu1 %v6119_v13  ;;  %v3067_v12 = vld [vmem:[#allocation4 + $0xa8] sm:$0xff]  ;;  %v9725_v13 = vmov 0  ;;  %9743 = vst [vmem:[#allocation22_spill] sm:$0xff] %v9742_v56  ;;  %v9755_v62 = vmov 0 }
 0x1a2   : > { %1255 = vmatprep.mubr.f32.mxu0 %v6586_v0  ;;  %1397 = vmatprep.mubr.f32.mxu1 %v6586_v0  ;;  %v6135_v0 = vpack.c.bf16 %v2658_v30, %v2657_v29  ;;  %v9726_v13 = vsel %vm7812_vm6, 4294967295, %v9725_v13  ;;  %v6163_v27 = vpack.c.bf16 %v3067_v12, %v3066_v11  ;;  %v2460_v29 = vrot.slane %v7778_v47, 1  ;;  %v7915_v12 = vld [vmem:[%s7770_s19 + $0x50] sm:$0xff] }
 0x1a3   : > { %9727 = vst [vmem:[#allocation16_spill] sm:$0xff] %v9726_v13  ;;  %v2462_v30 = vrot.slane %v7784_v51, 1  ;;  %v2470_v11 = vrot.slane %v7895_v57, 1  ;;  %9745 = vst [vmem:[#allocation24_spill] sm:$0xff] %v7915_v12 }
 0x1a4   : > { %6050 = vmatpush1.bf16.msra.mxu0 %v6049_v20  ;;  %6122 = vmatpush1.bf16.msra.mxu1 %v6121_v22  ;;  %v9732_v20 = vmov 0  ;;  %v9735_v22 = vmov 0 }
 0x1a5   : > { %6124 = vmatprep.subr.bf16.mxu0 %v6123_v23  ;;  %6156 = vmatprep.subr.bf16.mxu1 %v6155_v3  ;;  %v9733_v20 = vsel %vm7828_vm8, 4294967295, %v9732_v20  ;;  %v9736_v22 = vsel %vm7832_vm9, 4294967295, %v9735_v22  ;;  %v7876_v43 = vsel %vm9608_vm10, %v2460_v29, %v2462_v30 }
 0x1a6   : > { %9734 = vst [vmem:[#allocation19_spill] sm:$0xff] %v9733_v20  ;;  %9737 = vst [vmem:[#allocation20_spill] sm:$0xff] %v9736_v22 }
 0x1a7   : > { %4946 = vmatmul.mubr.msk.f32.vlgmr.msra.gmra.mrb[2].mxu0 %vm832_vm3, %v7366_v6  ;;  %4947 = vmatmul.mubr.msk.f32.vlgmr.msra.gmra.mrb[6].mxu1 %vm832_vm3, %v7366_v6  ;;  %v2663_v6 = vld [vmem:[#allocation2 + $0x60] sm:$0xff] }
 0x1a8   : > { %6126 = vmatpush3.bf16.msra.mxu0 %v6123_v23  ;;  %v6147_v37 = vpack.c.bf16 %v2664_v36, %v2663_v6  ;;  %v2401_v23 = vrot.slane %v7790_v53, 7  ;;  %6158 = vmatpush3.bf16.msra.mxu1 %v6155_v3  ;;  %v2464_v6 = vrot.slane %v7787_v52, 1  ;;  %v2466_v36 = vrot.slane %v7790_v53, 1 }
 0x1a9   : > { %6128 = vmatprep.subr.bf16.mxu0 %v6127_v26  ;;  %6160 = vmatprep.subr.bf16.mxu1 %v6159_v10  ;;  %v7943_v3 = vsel %vm9608_vm10, %v2468_v4, %v2470_v11 }
 0x1aa   : > { %v7850_v34 = vsel %vm9644_vm5, %v2399_v15, %v2401_v23  ;;  %v7898_v58 = vsel %vm9608_vm10, %v2464_v6, %v2466_v36  ;;  %v2147_v15 = vadd.s32 80, %v7772_v45  ;;  %v7931_v50 = vsel %vm9608_vm10, %v2466_v36, %v2468_v4  ;;  %v7951_v36 = vld [vmem:[%s7770_s19 + $0x60] sm:$0xff] }
 0x1ab   : > { %9750 = vst [vmem:[#allocation27_spill] sm:$0xff] %v7951_v36 }
 0x1ac   : > { %6130 = vmatpush3.bf16.msra.mxu0 %v6127_v26  ;;  %v2409_v26 = vrot.slane %v7805_v5, 7  ;;  %6162 = vmatpush3.bf16.msra.mxu1 %v6159_v10  ;;  %v2192_v10 = vand.u32 15, %v2142_v48  ;;  %v2476_v48 = vrot.slane %v7822_v17, 1 }
 0x1ad   : > { %6132 = vmatprep.subr.bf16.mxu0 %v6131_v44  ;;  %6164 = vmatprep.subr.bf16.mxu1 %v6163_v27 }
 0x1ae   : > { %v7865_v38 = vsel %vm9644_vm5, %v9583_v25, %v2409_v26  ;;  %vm7938_vm13 = vcmp.eq.s32.totalorder %v2192_v10, 15  ;;  %v9753_v10 = vmov 0  ;;  %v9761_v25 = vmov 0 }
 0x1b0   : > { %6134 = vmatpush3.bf16.msra.mxu0 %v6131_v44  ;;  %v2164_v44 = vand.u32 15, %v2138_v9  ;;  %6166 = vmatpush3.bf16.msra.mxu1 %v6163_v27  ;;  %v7911_v9 = vsel %vm9608_vm10, %v2459_v42, %v2460_v29  ;;  %v2472_v29 = vrot.slane %v7799_v1, 1  ;;  %v2220_v42 = vand.u32 15, %v2146_v61 }
 0x1b1   : > { %6136 = vmatprep.subr.bf16.mxu0 %v6135_v0  ;;  %v2413_v27 = vrot.slane %v7915_v12, 7  ;;  %v9747_v61 = vmov 0 }
 0x1b2   : > { %vm7870_vm11 = vcmp.eq.s32.totalorder %v2164_v44, 15  ;;  %v2405_v44 = vrot.slane %v7895_v57, 7  ;;  %v9748_v61 = vsel %vm7938_vm13, 4294967295, %v9747_v61  ;;  %v7963_v4 = vsel %vm9608_vm10, %v2472_v29, %v2474_v33 }
 0x1b3   : > { %v9739_v41 = vsel %vm7870_vm11, 4294967295, %v9738_v41  ;;  %9749 = vst [vmem:[#allocation26_spill] sm:$0xff] %v9748_v61  ;;  %vm7965_vm0 = vcmp.eq.s32.totalorder %v2220_v42, 15  ;;  %v2417_v57 = vrot.slane %v7951_v36, 7  ;;  %v9775_v61 = vmov 0 }
 0x1b4   : > { %6138 = vmatpush3.bf16.msra.mxu0 %v6135_v0  ;;  %v3068_v0 = vld [vmem:[#allocation4 + $0xb0] sm:$0xff]  ;;  %9740 = vst [vmem:[#allocation21_spill] sm:$0xff] %v9739_v41  ;;  %v9756_v62 = vsel %vm7965_vm0, 4294967295, %v9755_v62 }
 0x1b5   : > { %6140 = vmatprep.subr.bf16.mxu0 %v6139_v32  ;;  %9757 = vst [vmem:[#allocation28_spill] sm:$0xff] %v9756_v62 }
 0x1b8   : > { %6142 = vmatpush3.bf16.msra.mxu0 %v6139_v32  ;;  %v2411_v32 = vrot.slane %v7822_v17, 7  ;;  %v8000_v17 = vsel %vm9608_vm10, %v2470_v11, %v2472_v29  ;;  %v8018_v29 = vld [vmem:[%s7770_s19 + $0x78] sm:$0xff] }
 0x1b9   : > { %6144 = vmatprep.subr.bf16.mxu0 %v6143_v35  ;;  %9766 = vst [vmem:[#allocation34_spill] sm:$0xff] %v8018_v29 }
 0x1ba   : > { %v7882_v19 = vsel %vm9644_vm5, %v2409_v26, %v2411_v32  ;;  %v7919_v26 = vsel %vm9608_vm10, %v2462_v30, %v2464_v6  ;;  %v2478_v30 = vrot.slane %v7915_v12, 1  ;;  %v2148_v6 = vadd.s32 88, %v7772_v45 }
 0x1bb   : > { %v7987_v42 = vsel %vm9644_vm5, %v2411_v32, %v2413_v27 }
 0x1bc   : > { %6146 = vmatpush3.bf16.msra.mxu0 %v6143_v35  ;;  %v7853_v35 = vsel %vm9644_vm5, 0.0, %v2394_v55  ;;  %v7973_v55 = vld [vmem:[%s7770_s19 + $0x70] sm:$0xff]  ;;  %v2234_v39 = vand.u32 15, %v2148_v6  ;;  %9764 = vst [vmem:[#allocation33_spill] sm:$0xff] %v7987_v42  ;;  %v2488_v42 = vrot.slane %v8018_v29, 1 }
 0x1bd   : > { %6148 = vmatprep.subr.bf16.mxu0 %v6147_v37  ;;  %9759 = vst [vmem:[#allocation30_spill] sm:$0xff] %v7973_v55  ;;  %v2421_v32 = vrot.slane %v7973_v55, 7 }
 0x1be   : > { %vm8023_vm2 = vcmp.eq.s32.totalorder %v2234_v39, 15 }
 0x1c0   : > { %6150 = vmatpush3.bf16.msra.mxu0 %v6147_v37  ;;  %v7860_v37 = vsel %vm9644_vm5, %v2401_v23, %v2403_v24  ;;  %v3073_v23 = vld [vmem:[#allocation4 + $0xd8] sm:$0xff] }
 0x1c1   : > { %6152 = vmatprep.subr.bf16.mxu0 %v6151_v40  ;;  %v6175_v49 = vpack.c.bf16 %v3073_v23, %v3072_v16  ;;  %v7948_v16 = vsel %vm9644_vm5, %v2403_v24, %v2405_v44  ;;  %v7970_v24 = vld [vmem:[%s7770_s19 + $0x68] sm:$0xff] }
 0x1c2   : > { %9758 = vst [vmem:[#allocation29_spill] sm:$0xff] %v7970_v24  ;;  %v2484_v6 = vrot.slane %v7970_v24, 1 }
 0x1c4   : > { %6154 = vmatpush3.bf16.msra.mxu0 %v6151_v40  ;;  %v6167_v40 = vpack.c.bf16 %v3069_v31, %v3068_v0  ;;  %v2199_v0 = vand.u32 15, %v2143_v59  ;;  %v2206_v31 = vand.u32 15, %v2144_v60  ;;  %v7934_v59 = vld [vmem:[%s7770_s19 + $0x58] sm:$0xff]  ;;  %v2227_v60 = vand.u32 15, %v2147_v15 }
 0x1c5   : > { %9746 = vst [vmem:[#allocation25_spill] sm:$0xff] %v7934_v59  ;;  %v2150_v15 = vadd.s32 104, %v7772_v45  ;;  %v2415_v54 = vrot.slane %v7934_v59, 7 }
 0x1c6   : > { %6168 = vmatprep.subr.bf16.mxu1 %v6167_v40  ;;  %vm7954_vm14 = vcmp.eq.s32.totalorder %v2199_v0, 0  ;;  %vm7958_vm15 = vcmp.eq.s32.totalorder %v2206_v31, 15  ;;  %v7976_v0 = vsel %vm9608_vm10, %v2476_v48, %v2478_v30  ;;  %v2480_v31 = vrot.slane %v7934_v59, 1 }
 0x1c7   : > { %6170 = vmatpush3.bf16.msra.mxu1 %v6167_v40  ;;  %v2149_v40 = vadd.s32 96, %v7772_v45  ;;  %v9754_v10 = vsel %vm7958_vm15, 4294967295, %v9753_v10  ;;  %9760 = vst [vmem:[#allocation31_spill] sm:$0xff] %v7976_v0  ;;  %vm7980_vm1 = vcmp.eq.s32.totalorder %v2227_v60, 0  ;;  %v2248_v5 = vand.u32 15, %v2150_v15 }
 0x1c8   : > { %6172 = vmatprep.subr.bf16.mxu1 %v6171_v8  ;;  %v9762_v25 = vsel %vm7980_vm1, 4294967295, %v9761_v25  ;;  %v2486_v59 = vrot.slane %v7973_v55, 1  ;;  %v8012_v60 = vsel %vm9608_vm10, %v2474_v33, %v2476_v48  ;;  %v2419_v33 = vrot.slane %v7970_v24, 7 }
 0x1c9   : > { %9763 = vst [vmem:[#allocation32_spill] sm:$0xff] %v9762_v25  ;;  %v2241_v12 = vand.u32 15, %v2149_v40  ;;  %v2151_v40 = vadd.s32 112, %v7772_v45  ;;  %v9771_v48 = vmov 0  ;;  %v8036_v11 = vsel %vm9644_vm5, %v2415_v54, %v2417_v57 }
 0x1ca   : > { %9774 = vst [vmem:[#allocation38_spill] sm:$0xff] %v8036_v11  ;;  %vm8038_vm4 = vcmp.eq.s32.totalorder %v2248_v5, 15  ;;  %v8043_v39 = vsel %vm9608_vm10, %v2484_v6, %v2486_v59  ;;  %v8051_v24 = vsel %vm9608_vm10, %v2478_v30, %v2480_v31  ;;  %v8054_v25 = vsel %vm9644_vm5, %v2413_v27, %v2415_v54 }
 0x1cb   : > { %6174 = vmatpush3.bf16.msra.mxu1 %v6171_v8  ;;  %v2482_v8 = vrot.slane %v7951_v36, 1  ;;  %v9765_v36 = vrot.slane %v7799_v1, 7  ;;  %vm8031_vm3 = vcmp.eq.s32.totalorder %v2241_v12, 0  ;;  %v9776_v61 = vsel %vm8038_vm4, 4294967295, %v9775_v61  ;;  %9778 = vst [vmem:[#allocation40_spill] sm:$0xff] %v8043_v39  ;;  %9779 = vst [vmem:[#allocation41_spill] sm:$0xff] %v8051_v24 }
 0x1cc   : > { %6176 = vmatprep.subr.bf16.mxu1 %v6175_v49  ;;  %v9772_v48 = vsel %vm8031_vm3, 4294967295, %v9771_v48  ;;  %9777 = vst [vmem:[#allocation39_spill] sm:$0xff] %v9776_v61  ;;  %v8048_v12 = vadd.s32 120, %v7772_v45  ;;  %v8066_v62 = vsel %vm9644_vm5, %v2417_v57, %v2419_v33  ;;  %v2423_v27 = vrot.slane %v8018_v29, 7 }
 0x1cd   : > { %v8006_v15 = vsel %vm9644_vm5, %v2405_v44, %v9765_v36  ;;  %v9767_v44 = vmov 0  ;;  %v8028_v36 = vsel %vm9608_vm10, %v2480_v31, %v2482_v8  ;;  %9773 = vst [vmem:[#allocation37_spill] sm:$0xff] %v9772_v48  ;;  %v8060_v0 = vsel %vm9608_vm10, %v2482_v8, %v2484_v6  ;;  %9781 = vst [vmem:[#allocation43_spill] sm:$0xff] %v8066_v62 }
 0x1ce   : > { %v9768_v44 = vsel %vm8023_vm2, 4294967295, %v9767_v44  ;;  %9770 = vst [vmem:[#allocation36_spill] sm:$0xff] %v8028_v36  ;;  %9780 = vst [vmem:[#allocation42_spill] sm:$0xff] %v8060_v0  ;;  %v9783_v45 = vmov 0  ;;  %v8081_v57 = vsel %vm9644_vm5, %v2419_v33, %v2421_v32  ;;  %vm9786_vm4 = vcmask 1046528  }
 0x1cf   : > { %6178 = vmatpush3.bf16.msra.mxu1 %v6175_v49  ;;  %9769 = vst [vmem:[#allocation35_spill] sm:$0xff] %v9768_v44  ;;  %v2255_v49 = vand.u32 15, %v2151_v40  ;;  %v8085_v29 = vsel %vm9786_vm4, %v2488_v42, 0.0  ;;  %vm9788_vm3 = vmmov %vm9786_vm4 }
 0x1d0   : > { %9787 = vst [vmem:[#allocation46_spill] sm:$0xff] %v8085_v29  ;;  %v8092_v11 = vsel %vm9788_vm3, %v2486_v59, %v2488_v42 }
 0x1d1   : > { %vm8076_vm10 = vcmp.eq.s32.totalorder %v2255_v49, 0  ;;  %9789 = vst [vmem:[#allocation47_spill] sm:$0xff] %v8092_v11 }
 0x1d2   : > { %v9784_v45 = vsel %vm8076_vm10, 4294967295, %v9783_v45 }
 0x1d3   : > { %9785 = vst [vmem:[#allocation45_spill] sm:$0xff] %v9784_v45  ;;  %v4312_v45 = vld [vmem:[#allocation4 + $0x250] sm:$0xff] }
 0x232   : > { %v973_v40 = vpop.f32.mrb[0].mxu0  ;;  %v1115_v55 = vpop.f32.mrb[4].mxu1 }
 0x233   : > { %v1405_v30 = vcombine.high %v973_v40, %v973_v40  ;;  %v1412_v31 = vrot.slane %v973_v40, %v7802_v2  ;;  %v1585_v8 = vcombine.high %v1115_v55, %v1115_v55  ;;  %v1592_v6 = vrot.slane %v1115_v55, %v7802_v2  ;;  %v975_v5 = vpop.f32.mrb[1].mxu0  ;;  %v8074_v0 = vpop.f32.mrb[5].mxu1 }
 0x234   : > { %9782 = vst [vmem:[#allocation44_spill] sm:$0xff] %v8074_v0  ;;  %v1495_v49 = vcombine.high %v975_v5, %v975_v5  ;;  %v1502_v62 = vrot.slane %v975_v5, %v7802_v2 }
 0x235   : > { %v1419_v40 = vrot.slane %v1405_v30, %v7802_v2  ;;  %v1420_v39 = vcombine.high %v1412_v31, %v1412_v31  ;;  %v1428_v55 = vrot.slane %v1412_v31, %v7802_v2  ;;  %v1599_v61 = vrot.slane %v1585_v8, %v7802_v2 }
 0x236   : > { %v1600_v0 = vcombine.high %v1592_v6, %v1592_v6  ;;  %v8101_v8 = vsel %vm9644_vm5, %v2421_v32, %v2423_v27  ;;  %v1509_v32 = vrot.slane %v1495_v49, %v7802_v2  ;;  %v1510_v27 = vcombine.high %v1502_v62, %v1502_v62 }
 0x237   : > { %v1421_v33 = vcombine.high %v1419_v40, %v1419_v40  ;;  %v1435_v54 = vrot.slane %v1419_v40, %v7802_v2  ;;  %v1442_v48 = vrot.slane %v1420_v39, %v7802_v2  ;;  %v1450_v29 = vcombine.high %v1428_v55, %v1428_v55  ;;  %9790 = vst [vmem:[#allocation48_spill] sm:$0xff] %v8101_v8 }
 0x238   : > { %v1457_v30 = vrot.slane %v1428_v55, %v7808_v7  ;;  %v1601_v36 = vcombine.high %v1599_v61, %v1599_v61  ;;  %v1608_v39 = vrot.slane %v1592_v6, %v7802_v2  ;;  %v1615_v55 = vrot.slane %v1599_v61, %v7802_v2 }
 0x239   : > { %v1449_v5 = vrot.slane %v1421_v33, %v7802_v2  ;;  %v1451_v59 = vcombine.high %v1435_v54, %v1435_v54  ;;  %v1452_v42 = vcombine.high %v1442_v48, %v1442_v48  ;;  %v1461_v11 = vrot.slane %v1442_v48, %v7808_v7 }
 0x23a   : > { %v1465_v40 = vrot.slane %v1450_v29, %v7808_v7  ;;  %v1622_v44 = vrot.slane %v1600_v0, %v7802_v2  ;;  %v1473_v31 = vrot.slane %v1435_v54, %v7808_v7  ;;  %v9791_v29 = vsel %vm7812_vm6, 0.0, %v7853_v35 }
 0x23b   : > { %v1453_v24 = vcombine.high %v1449_v5, %v1449_v5  ;;  %v8112_v33 = vrot.slane %v1452_v42, %v7808_v7  ;;  %v8115_v8 = vrot.slane %v1449_v5, %v7808_v7  ;;  %v2523_v48 = vmul.f32 %v9791_v29, %v1457_v30 }
 0x23c   : > { %v2524_v61 = vmul.f32 %v7817_v14, %v1457_v30  ;;  %v8123_v0 = vrot.slane %v1451_v59, %v7808_v7  ;;  %v9792_v54 = vsel %vm7824_vm7, 0.0, %v7841_v28  ;;  %v2526_v49 = vmul.f32 %v7846_v21, %v1461_v11 }
 0x23d   : > { %v2525_v6 = vmul.f32 %v9792_v54, %v1461_v11  ;;  %v8131_v5 = vrot.slane %v1601_v36, %v7802_v2  ;;  %v9793_v35 = vsel %vm7828_vm8, 0.0, %v7850_v34  ;;  %v1630_v29 = vcombine.high %v1608_v39, %v1608_v39 }
 0x23e   : > { %v2527_v42 = vmul.f32 %v9793_v35, %v1465_v40  ;;  %v1631_v14 = vcombine.high %v1615_v55, %v1615_v55  ;;  %v1632_v30 = vcombine.high %v1622_v44, %v1622_v44  ;;  %v8138_v59 = vrot.slane %v1453_v24, %v7808_v7 }
 0x23f   : > { %v2528_v18 = vmul.f32 %v7860_v37, %v1465_v40  ;;  %v9794_v28 = vsel %vm7832_vm9, 0.0, %v7865_v38  ;;  %v1637_v11 = vrot.slane %v1608_v39, %v7808_v7  ;;  %v8149_v36 = vmul.f32 %v7882_v19, %v1473_v31 }
 0x240   : > { %v8145_v21 = vmul.f32 %v9794_v28, %v1473_v31  ;;  %v1641_v54 = vrot.slane %v1622_v44, %v7808_v7  ;;  %v8155_v24 = vrot.slane %v1615_v55, %v7808_v7  ;;  %v8159_v37 = vrot.slane %v8131_v5, %v7808_v7 }
 0x241   : > { %v1511_v38 = vcombine.high %v1509_v32, %v1509_v32  ;;  %v1518_v40 = vrot.slane %v1502_v62, %v7802_v2  ;;  %v1525_v39 = vrot.slane %v1509_v32, %v7802_v2  ;;  %v1645_v19 = vrot.slane %v1630_v29, %v7808_v7 }
 0x242   : > { %v8165_v31 = vrot.slane %v1632_v30, %v7808_v7  ;;  %v8168_v35 = vrot.slane %v1631_v14, %v7808_v7  ;;  %v1532_v44 = vrot.slane %v1510_v27, %v7802_v2  ;;  %v2571_v55 = vmul.f32 %v7911_v9, %v1637_v11 }
 0x243   : > { %v9795_v28 = vsel %vm7870_vm11, 0.0, %v7876_v43  ;;  %v1540_v62 = vcombine.high %v1518_v40, %v1518_v40  ;;  %v1547_v32 = vrot.slane %v1518_v40, %v7808_v7  ;;  %v8178_v29 = vrot.slane %v1511_v38, %v7802_v2  ;;  %v9799_v2 = vld [vmem:[#allocation23_spill] sm:$0xff] }
 0x244   : > { %v2572_v34 = vmul.f32 %v9795_v28, %v1637_v11  ;;  %v1542_v30 = vcombine.high %v1532_v44, %v1532_v44  ;;  %v1551_v22 = vrot.slane %v1532_v44, %v7808_v7  ;;  %v2573_v14 = vmul.f32 %v7919_v26, %v1641_v54 }
 0x245   : > { %v1541_v20 = vcombine.high %v1525_v39, %v1525_v39  ;;  %v1555_v27 = vrot.slane %v1540_v62, %v7808_v7  ;;  %v1563_v9 = vrot.slane %v1525_v39, %v7808_v7  ;;  %v9796_v43 = vsel %vm7890_vm12, 0.0, %v7898_v58 }
 0x246   : > { %v2574_v11 = vmul.f32 %v9796_v43, %v1641_v54  ;;  %v2539_v40 = vmul.f32 %v1547_v32, %v7775_v46  ;;  %v2540_v38 = vmul.f32 %v1547_v32, %v7778_v47  ;;  %v2541_v28 = vmul.f32 %v1551_v22, %v7784_v51 }
 0x247   : > { %v2575_v44 = vmul.f32 %v7931_v50, %v1645_v19  ;;  %v1559_v26 = vrot.slane %v1542_v30, %v7808_v7  ;;  %v2542_v41 = vmul.f32 %v1551_v22, %v7787_v52  ;;  %v2543_v62 = vmul.f32 %v1555_v27, %v7790_v53  ;;  %v9797_v30 = vld [vmem:[#allocation15_spill] sm:$0xff] }
 0x248   : > { %v2544_v39 = vmul.f32 %v1555_v27, %v7796_v63  ;;  %v1543_v58 = vcombine.high %v8178_v29, %v8178_v29  ;;  %v8200_v54 = vrot.slane %v8178_v29, %v7808_v7  ;;  %v2556_v32 = vadd.f32 %v2540_v38, %v2524_v61 }
 0x249   : > { %v2555_v43 = vadd.f32 %v2539_v40, %v2523_v48  ;;  %v2557_v56 = vadd.f32 %v2541_v28, %v2525_v6  ;;  %v2558_v13 = vadd.f32 %v2542_v41, %v2526_v49  ;;  %v2559_v50 = vadd.f32 %v2543_v62, %v2527_v42  ;;  %v9800_v6 = vld [vmem:[#allocation26_spill] sm:$0xff] }
 0x24a   : > { %v2560_v51 = vadd.f32 %v2544_v39, %v2528_v18  ;;  %v2547_v46 = vmul.f32 %v1563_v9, %v9797_v30  ;;  %v2588_v52 = vadd.f32 %v2572_v34, %v2556_v32  ;;  %v9798_v27 = vsel %vm7954_vm14, 0.0, %v7948_v16 }
 0x24b   : > { %v2587_v22 = vadd.f32 %v2571_v55, %v2555_v43  ;;  %v2529_v53 = vmul.f32 %v9798_v27, %v8112_v33  ;;  %v2589_v63 = vadd.f32 %v2573_v14, %v2557_v56  ;;  %v2590_v47 = vadd.f32 %v2574_v11, %v2558_v13  ;;  %v9802_v13 = vld [vmem:[#allocation17_spill] sm:$0xff] }
 0x24c   : > { %v2591_v29 = vadd.f32 %v2575_v44, %v2559_v50  ;;  %v2545_v61 = vmul.f32 %v1559_v26, %v9799_v2  ;;  %vm2604_vm4 = vcmp.ge.f32.partialorder %v2588_v52, 0.0  ;;  %v2620_v41 = vmul.f32 0.1, %v2588_v52 }
 0x24d   : > { %vm2603_vm3 = vcmp.ge.f32.partialorder %v2587_v22, 0.0  ;;  %v2619_v48 = vmul.f32 0.1, %v2587_v22  ;;  %vm2605_vm5 = vcmp.ge.f32.partialorder %v2589_v63, 0.0  ;;  %v2621_v18 = vmul.f32 0.1, %v2589_v63 }
 0x24e   : > { %vm2606_vm12 = vcmp.ge.f32.partialorder %v2590_v47, 0.0  ;;  %v9801_v49 = vsel %vm7938_vm13, 0.0, %v7943_v3  ;;  %v2636_v16 = vsel %vm2604_vm4, %v2588_v52, %v2620_v41  ;;  %v2622_v55 = vmul.f32 0.1, %v2590_v47 }
 0x24f   : > { %v2576_v42 = vmul.f32 %v9801_v49, %v1645_v19  ;;  %v2635_v34 = vsel %vm2603_vm3, %v2587_v22, %v2619_v48  ;;  %vm2607_vm11 = vcmp.ge.f32.partialorder %v2591_v29, 0.0  ;;  %v2548_v56 = vmul.f32 %v1563_v9, %v9802_v13 }
 0x250   : > { %5363 = vmatprep.mubr.f32.mxu0 %v2635_v34  ;;  %v2637_v14 = vsel %vm2605_vm5, %v2589_v63, %v2621_v18  ;;  %v2623_v11 = vmul.f32 0.1, %v2591_v29  ;;  %v1571_v38 = vrot.slane %v1541_v20, %v7808_v7  ;;  %v2561_v28 = vadd.f32 %v2545_v61, %v2529_v53 }
 0x251   : > { %v2592_v40 = vadd.f32 %v2576_v42, %v2560_v51  ;;  %5364 = vmatmul.mubr.f32.vlgmr.msra.gmra.mrb[4].mxu0 %v2636_v16  ;;  %v2577_v44 = vmul.f32 %v8000_v17, %v8165_v31  ;;  %v2530_v3 = vmul.f32 %v8006_v15, %v8112_v33  ;;  %v2638_v52 = vsel %vm2606_vm12, %v2590_v47, %v2622_v55  ;;  %v9804_v33 = vld [vmem:[#allocation28_spill] sm:$0xff]  ;;  %v9815_v42 = vld [vmem:[#allocation41_spill] sm:$0xff] }
 0x252   : > { %5366 = vmatprep.mubr.f32.mxu0 %v2637_v14  ;;  %v2639_v19 = vsel %vm2607_vm11, %v2591_v29, %v2623_v11  ;;  %v2546_v9 = vmul.f32 %v1559_v26, %v7799_v1  ;;  %v2563_v51 = vadd.f32 %v2547_v46, %v8145_v21  ;;  %v2579_v53 = vmul.f32 %v8012_v60, %v8155_v24  ;;  %v9805_v26 = vld [vmem:[#allocation31_spill] sm:$0xff]  ;;  %v9816_v55 = vld [vmem:[#allocation25_spill] sm:$0xff] }
 0x253   : > { %vm2608_vm3 = vcmp.ge.f32.partialorder %v2592_v40, 0.0  ;;  %v2624_v63 = vmul.f32 0.1, %v2592_v40  ;;  %v2593_v62 = vadd.f32 %v2577_v44, %v2561_v28  ;;  %v9803_v17 = vsel %vm7958_vm15, 0.0, %v7963_v4  ;;  %v9817_v11 = vld [vmem:[#allocation35_spill] sm:$0xff]  ;;  %v9820_v28 = vld [vmem:[#allocation37_spill] sm:$0xff] }
 0x254   : > { %v2562_v20 = vadd.f32 %v2546_v9, %v2530_v3  ;;  %v2578_v15 = vmul.f32 %v9803_v17, %v8165_v31  ;;  %v2564_v47 = vadd.f32 %v2548_v56, %v8149_v36  ;;  %v9806_v39 = vsel %vm7965_vm0, 0.0, %v9805_v26  ;;  %v9812_v36 = vld [vmem:[#allocation33_spill] sm:$0xff]  ;;  %v9822_v44 = vld [vmem:[#allocation38_spill] sm:$0xff] }
 0x255   : > { %v2580_v32 = vmul.f32 %v9806_v39, %v8155_v24  ;;  %v9807_v46 = vand.u32 15, %v8048_v12  ;;  %v9808_v21 = vmov 0  ;;  %5367 = vmatmul.mubr.f32.gmra.mrb[6].mxu0 %v2638_v52  ;;  %vm2609_vm11 = vcmp.ge.f32.partialorder %v2593_v62, 0.0  ;;  %v9814_v12 = vld [vmem:[#allocation24_spill] sm:$0xff]  ;;  %v9826_v17 = vld [vmem:[#allocation42_spill] sm:$0xff] }
 0x256   : > { %v2625_v60 = vmul.f32 0.1, %v2593_v62  ;;  %v2595_v43 = vadd.f32 %v2579_v53, %v2563_v51  ;;  %v9813_v31 = vsel %vm7980_vm1, 0.0, %v9812_v36  ;;  %v1575_v22 = vrot.slane %v1543_v58, %v7808_v7  ;;  %5369 = vmatprep.mubr.f32.mxu0 %v2639_v19  ;;  %v9824_v19 = vld [vmem:[#allocation27_spill] sm:$0xff] }
 0x257   : > { %vm8237_vm5 = vcmp.eq.s32.totalorder %v9807_v46, 15  ;;  %v2533_v50 = vmul.f32 %v9813_v31, %v8115_v8  ;;  %v2594_v24 = vadd.f32 %v2578_v15, %v2562_v20  ;;  %v2596_v27 = vadd.f32 %v2580_v32, %v2564_v47  ;;  %v9827_v47 = vld [vmem:[#allocation29_spill] sm:$0xff] }
 0x258   : > { %v9809_v21 = vsel %vm8237_vm5, 4294967295, %v9808_v21  ;;  %v2549_v29 = vmul.f32 %v8200_v54, %v9814_v12  ;;  %v2640_v61 = vsel %vm2608_vm3, %v2592_v40, %v2624_v63  ;;  %vm2611_vm12 = vcmp.ge.f32.partialorder %v2595_v43, 0.0  ;;  %v9818_v40 = vld [vmem:[#allocation36_spill] sm:$0xff] }
 0x259   : > { %9810 = vst [vmem:[#allocation15_spill] sm:$0xff] %v9809_v21  ;;  %v2627_v48 = vmul.f32 0.1, %v2595_v43  ;;  %v2534_v41 = vmul.f32 %v8054_v25, %v8115_v8  ;;  %v2641_v18 = vsel %vm2609_vm11, %v2593_v62, %v2625_v60  ;;  %vm2610_vm4 = vcmp.ge.f32.partialorder %v2594_v24, 0.0  ;;  %5370 = vmatmul.mubr.f32.gmra.mrb[8].mxu0 %v2640_v61  ;;  %v9829_v60 = vld [vmem:[#allocation39_spill] sm:$0xff] }
 0x25a   : > { %v2626_v49 = vmul.f32 0.1, %v2594_v24  ;;  %v2581_v34 = vmul.f32 %v9815_v42, %v8159_v37  ;;  %vm2612_vm0 = vcmp.ge.f32.partialorder %v2596_v27, 0.0  ;;  %v2628_v58 = vmul.f32 0.1, %v2596_v27  ;;  %5372 = vmatprep.mubr.f32.mxu0 %v2641_v18 }
 0x25b   : > { %v2565_v16 = vadd.f32 %v2549_v29, %v2533_v50  ;;  %v2550_v56 = vmul.f32 %v8200_v54, %v9816_v55  ;;  %v2643_v14 = vsel %vm2611_vm12, %v2595_v43, %v2627_v48  ;;  %v9819_v25 = vsel %vm8023_vm2, 0.0, %v9818_v40  ;;  %v9825_v54 = vld [vmem:[#allocation43_spill] sm:$0xff]  ;;  %v9831_v43 = vld [vmem:[#allocation40_spill] sm:$0xff]  ;;  %v9835_v48 = vld [vmem:[#allocation46_spill] sm:$0xff] }
 0x25c   : > { %v2582_v8 = vmul.f32 %v9819_v25, %v8159_v37  ;;  %vm9821_vm3 = vnez %v9820_v28  ;;  %v2551_v9 = vmul.f32 %v1571_v38, %v9824_v19  ;;  %v2642_v63 = vsel %vm2610_vm4, %v2594_v24, %v2626_v49  ;;  %v9834_v24 = vld [vmem:[#allocation30_spill] sm:$0xff] }
 0x25d   : > { %v9823_v3 = vsel %vm9821_vm3, 0.0, %v9822_v44  ;;  %v2597_v62 = vadd.f32 %v2581_v34, %v2565_v16  ;;  %v2566_v51 = vadd.f32 %v2550_v56, %v2534_v41  ;;  %v2536_v53 = vmul.f32 %v9825_v54, %v8123_v0  ;;  %5373 = vmatmul.mubr.f32.gmra.mrb[10].mxu0 %v2642_v63  ;;  %v9838_v40 = vld [vmem:[#allocation34_spill] sm:$0xff] }
 0x25e   : > { %v2535_v52 = vmul.f32 %v9823_v3, %v8123_v0  ;;  %v2583_v15 = vmul.f32 %v9826_v17, %v8168_v35  ;;  %v2552_v37 = vmul.f32 %v1571_v38, %v9827_v47  ;;  %v9828_v26 = vcombine.high %v8131_v5, %v8131_v5  ;;  %5375 = vmatprep.mubr.f32.mxu0 %v2643_v14 }
 0x25f   : > { %v2629_v32 = vmul.f32 0.1, %v2597_v62  ;;  %v2598_v46 = vadd.f32 %v2582_v8, %v2566_v51  ;;  %vm9830_vm11 = vnez %v9829_v60  ;;  %v9833_v31 = vsel %vm8076_vm10, 0.0, %v8081_v57  ;;  %v9837_v57 = vld [vmem:[#allocation47_spill] sm:$0xff] }
 0x260   : > { %v2567_v20 = vadd.f32 %v2551_v9, %v2535_v52  ;;  %v1665_v39 = vrot.slane %v9828_v26, %v7808_v7  ;;  %v9832_v36 = vsel %vm9830_vm11, 0.0, %v9831_v43  ;;  %v2537_v38 = vmul.f32 %v9833_v31, %v8138_v59  ;;  %v3045_v43 = vld [vmem:[#allocation4] sm:$0xff] }
 0x261   : > { %v2584_v0 = vmul.f32 %v9832_v36, %v8168_v35  ;;  %vm2613_vm12 = vcmp.ge.f32.partialorder %v2597_v62, 0.0  ;;  %v2568_v5 = vadd.f32 %v2552_v37, %v2536_v53  ;;  %v2553_v29 = vmul.f32 %v1575_v22, %v9834_v24  ;;  %v9836_v35 = vld [vmem:[#allocation48_spill] sm:$0xff]  ;;  %v3075_v37 = vld [vmem:[#allocation4 + $0xe8] sm:$0xff] }
 0x262   : > { %v2599_v50 = vadd.f32 %v2583_v15, %v2567_v20  ;;  %v2644_v61 = vsel %vm2612_vm0, %v2596_v27, %v2628_v58  ;;  %v2522_v41 = vsel %vm8237_vm5, 0.0, %v9835_v48  ;;  %v2538_v18 = vmul.f32 %v9836_v35, %v8138_v59  ;;  %v3074_v15 = vld [vmem:[#allocation4 + $0xe0] sm:$0xff]  ;;  %v3046_v36 = vld [vmem:[#allocation4 + $0x8] sm:$0xff] }
 0x263   : > { %v2630_v49 = vmul.f32 0.1, %v2598_v46  ;;  %v2600_v42 = vadd.f32 %v2584_v0, %v2568_v5  ;;  %v2569_v34 = vadd.f32 %v2553_v29, %v2537_v38  ;;  %v2585_v16 = vmul.f32 %v9837_v57, %v1665_v39  ;;  %5376 = vmatmul.mubr.f32.gmra.mrb[12].mxu0 %v2644_v61  ;;  %v9839_v31 = vld [vmem:[#allocation44_spill] sm:$0xff]  ;;  %v3890_v48 = vld [vmem:[#allocation2 + $0x88] sm:$0xff] }
 0x264   : > { %v2645_v56 = vsel %vm2613_vm12, %v2597_v62, %v2629_v32  ;;  %vm2614_vm4 = vcmp.ge.f32.partialorder %v2598_v46, 0.0  ;;  %v2631_v14 = vmul.f32 0.1, %v2599_v50  ;;  %v2554_v25 = vmul.f32 %v1575_v22, %v9838_v40  ;;  %v3077_v32 = vld [vmem:[#allocation4 + $0xf8] sm:$0xff]  ;;  %v3889_v61 = vld [vmem:[#allocation2 + $0x80] sm:$0xff] }
 0x265   : > { %5378 = vmatprep.mubr.f32.mxu0 %v2645_v56  ;;  %vm2615_vm0 = vcmp.ge.f32.partialorder %v2599_v50, 0.0  ;;  %v2601_v27 = vadd.f32 %v2585_v16, %v2569_v34  ;;  %v2586_v8 = vmul.f32 %v2522_v41, %v1665_v39  ;;  %v2646_v44 = vsel %vm2614_vm4, %v2598_v46, %v2630_v49  ;;  %v3076_v39 = vld [vmem:[#allocation4 + $0xf0] sm:$0xff]  ;;  %v3894_v34 = vld [vmem:[#allocation2 + $0xa8] sm:$0xff] }
 0x266   : > { %v2570_v58 = vadd.f32 %v2554_v25, %v2538_v18  ;;  %v2632_v3 = vmul.f32 0.1, %v2600_v42  ;;  %v2647_v59 = vsel %vm2615_vm0, %v2599_v50, %v2631_v14  ;;  %vm2616_vm5 = vcmp.ge.f32.partialorder %v2600_v42, 0.0  ;;  %v3891_v41 = vld [vmem:[#allocation2 + $0x90] sm:$0xff]  ;;  %v3892_v18 = vld [vmem:[#allocation2 + $0x98] sm:$0xff] }
 0x267   : > { %5379 = vmatmul.mubr.f32.gmra.mrb[14].mxu0 %v2646_v44  ;;  %v2633_v52 = vmul.f32 0.1, %v2601_v27  ;;  %vm2617_vm11 = vcmp.ge.f32.partialorder %v2601_v27, 0.0  ;;  %v6179_v26 = vpack.c.bf16 %v3075_v37, %v3074_v15  ;;  %v6183_v46 = vpack.c.bf16 %v3077_v32, %v3076_v39  ;;  %v9840_v16 = vld [vmem:[#allocation14_spill] sm:$0xff]  ;;  %v8321_v39 = vld [vmem:[%s9579_s6] ss:$0 sm:$0xff] }
 0x268   : > { %v2602_v9 = vadd.f32 %v2586_v8, %v2570_v58  ;;  %5381 = vmatprep.mubr.f32.mxu0 %v2647_v59  ;;  %v2648_v63 = vsel %vm2616_vm5, %v2600_v42, %v2632_v3  ;;  %v8303_v0 = vpack.c.bf16 %v3046_v36, %v3045_v43  ;;  %v4948_v38 = vmul.f32 -1.442695, %v9839_v31  ;;  %v3893_v42 = vld [vmem:[#allocation2 + $0xa0] sm:$0xff]  ;;  %v9841_v43 = vld [vmem:[#allocation9_spill] sm:$0xff] }
 0x269   : > { %v2649_v51 = vsel %vm2617_vm11, %v2601_v27, %v2633_v52  ;;  %6180 = vmatprep.subr.bf16.mxu1 %v6179_v26  ;;  %v6251_v35 = vpack.c.bf16 %v3890_v48, %v3889_v61  ;;  %v6255_v49 = vpack.c.bf16 %v3892_v18, %v3891_v41  ;;  %v6259_v14 = vpack.c.bf16 %v3894_v34, %v3893_v42  ;;  %v9842_v31 = vld [vmem:[#allocation8_spill] sm:$0xff]  ;;  %v9844_v48 = vld [vmem:[#allocation10_spill] sm:$0xff] }
 0x26a   : > { %v2634_v62 = vmul.f32 0.1, %v2602_v9  ;;  %vm2618_vm12 = vcmp.ge.f32.partialorder %v2602_v9, 0.0  ;;  %6182 = vmatpush3.bf16.msra.mxu1 %v6179_v26  ;;  %6486 = vpow2.f32 %v4948_v38 }
 0x26b   : > { %5382 = vmatmul.mubr.f32.gmra.mrb[16].mxu0 %v2648_v63  ;;  %6184 = vmatprep.subr.bf16.mxu1 %v6183_v46 }
 0x26c   : > { %5384 = vmatprep.mubr.f32.mxu0 %v2649_v51  ;;  %v2650_v22 = vsel %vm2618_vm12, %v2602_v9, %v2634_v62  ;;  %6252 = vmatprep.subr.bf16.mxu0 %v6251_v35  ;;  %vm9847_vm12 = vcmask 1040384  }
 0x26d   : > { %6254 = vmatpush3.bf16.msra.mxu0 %v6251_v35  ;;  %v9845_v35 = vld [vmem:[#allocation13_spill] sm:$0xff] }
 0x26e   : > { %6186 = vmatpush3.bf16.msra.mxu1 %v6183_v46  ;;  %6256 = vmatprep.subr.bf16.mxu0 %v6255_v49 }
 0x26f   : > { %5385 = vmatmul.mubr.f32.gmra.mrb[18].mxu0 %v2650_v22  ;;  %6188 = vmatprep.subr.bf16.mxu1 %v8303_v0 }
 0x271   : > { %6258 = vmatpush3.bf16.msra.mxu0 %v6255_v49  ;;  %v9846_v49 = vld [vmem:[#allocation12_spill] sm:$0xff] }
 0x272   : > { %6260 = vmatprep.subr.bf16.mxu0 %v6259_v14 }
 0x274   : > { %v6487_v50 = vpop.eup %6486 }
 0x275   : > { %v1677_v5 = vadd.f32 1.0, %v6487_v50  ;;  %6262 = vmatpush3.bf16.msra.mxu0 %v6259_v14  ;;  %v9843_v50 = vld [vmem:[#allocation11_spill] sm:$0xff]  ;;  %v3049_v14 = vld [vmem:[#allocation4 + $0x20] sm:$0xff] }
 0x277   : > { %6488 = vrcp.f32 %v1677_v5 }
 0x27a   : > { %v8295_v54 = vpop.f32.mrb[2].mxu0  ;;  %v8297_v53 = vpop.f32.mrb[6].mxu1 }
 0x27b   : > { %v8299_v20 = vpop.f32.mrb[3].mxu0  ;;  %v8301_v17 = vpop.f32.mrb[7].mxu1 }
 0x281   : > { %v6489_v29 = vpop.eup %6488 }
 0x282   : > { %v1681_v57 = vcombine.high %v6489_v29, %v6489_v29  ;;  %v1688_v56 = vrot.slane %v6489_v29, %v9840_v16 }
 0x284   : > { %v1695_v25 = vrot.slane %v1681_v57, %v9840_v16  ;;  %v1696_v27 = vcombine.high %v1688_v56, %v1688_v56  ;;  %v1704_v8 = vrot.slane %v1688_v56, %v9840_v16  ;;  %v3047_v57 = vld [vmem:[#allocation4 + $0x10] sm:$0xff]  ;;  %v3048_v56 = vld [vmem:[#allocation4 + $0x18] sm:$0xff] }
 0x286   : > { %v1697_v58 = vcombine.high %v1695_v25, %v1695_v25  ;;  %v1718_v44 = vrot.slane %v1696_v27, %v9840_v16  ;;  %v1711_v3 = vrot.slane %v1695_v25, %v9840_v16  ;;  %v1726_v52 = vcombine.high %v1704_v8, %v1704_v8 }
 0x287   : > { %v1733_v62 = vrot.slane %v1704_v8, %v7808_v7 }
 0x288   : > { %v1725_v59 = vrot.slane %v1697_v58, %v9840_v16  ;;  %v1728_v9 = vcombine.high %v1718_v44, %v1718_v44  ;;  %v1727_v63 = vcombine.high %v1711_v3, %v1711_v3  ;;  %v1737_v51 = vrot.slane %v1718_v44, %v7808_v7 }
 0x289   : > { %v1741_v15 = vrot.slane %v1726_v52, %v7808_v7  ;;  %v1749_v26 = vrot.slane %v1711_v3, %v7808_v7  ;;  %v2820_v36 = vmul.f32 %v1733_v62, %v9841_v43  ;;  %v2819_v38 = vmul.f32 %v1733_v62, %v9842_v31  ;;  %v3050_v3 = vld [vmem:[#allocation4 + $0x28] sm:$0xff]  ;;  %v3052_v52 = vld [vmem:[#allocation4 + $0x38] sm:$0xff]  ;;  %v3053_v62 = vld [vmem:[#allocation4 + $0x40] sm:$0xff] }
 0x28a   : > { %v1729_v22 = vcombine.high %v1725_v59, %v1725_v59  ;;  %v1745_v37 = vrot.slane %v1728_v9, %v7808_v7  ;;  %v1753_v32 = vrot.slane %v1725_v59, %v7808_v7  ;;  %v1757_v46 = vrot.slane %v1727_v63, %v7808_v7  ;;  %v3051_v59 = vld [vmem:[#allocation4 + $0x30] sm:$0xff] }
 0x28b   : > { %v2822_v5 = vmul.f32 %v1737_v51, %v9843_v50  ;;  %v2821_v41 = vmul.f32 %v1737_v51, %v9844_v48  ;;  %v8331_v18 = vmul.f32 %v1741_v15, %v9845_v35  ;;  %v8334_v42 = vmul.f32 %v1741_v15, %v9846_v49  ;;  %v3059_v50 = vld [vmem:[#allocation4 + $0x70] sm:$0xff] }
 0x28c   : > { %v1761_v29 = vrot.slane %v1729_v22, %v7808_v7  ;;  %v8337_v34 = vmul.f32 %v1745_v37, %v7799_v1  ;;  %v8341_v58 = vmul.f32 %v1745_v37, %v9799_v2  ;;  %v8344_v8 = vmul.f32 %v1749_v26, %v9802_v13  ;;  %v3054_v13 = vld [vmem:[#allocation4 + $0x48] sm:$0xff]  ;;  %v3056_v37 = vld [vmem:[#allocation4 + $0x58] sm:$0xff] }
 0x28d   : > { %v8347_v44 = vmul.f32 %v1749_v26, %v9797_v30  ;;  %v8351_v9 = vmul.f32 %v1753_v32, %v9816_v55  ;;  %v8354_v63 = vmul.f32 %v1753_v32, %v9814_v12  ;;  %v8357_v2 = vmul.f32 %v1757_v46, %v9827_v47  ;;  %v3055_v55 = vld [vmem:[#allocation4 + $0x50] sm:$0xff]  ;;  %v3057_v26 = vld [vmem:[#allocation4 + $0x60] sm:$0xff] }
 0x28e   : > { %v8360_v30 = vmul.f32 %v1757_v46, %v9824_v19  ;;  %v8363_v22 = vmul.f32 %v1761_v29, %v9838_v40  ;;  %v8366_v15 = vmul.f32 %v1761_v29, %v9834_v24  ;;  %v6191_v43 = vpack.c.bf16 %v3048_v56, %v3047_v57  ;;  %v3060_v19 = vld [vmem:[#allocation4 + $0x78] sm:$0xff] }
 0x28f   : > { %v8368_v47 = vpack.c.bf16 %v3050_v3, %v3049_v14  ;;  %v8370_v31 = vpack.c.bf16 %v3052_v52, %v3051_v59  ;;  %v8373_v24 = vpack.c.bf16 %v3054_v13, %v3053_v62  ;;  %v8376_v48 = vpack.c.bf16 %v3056_v37, %v3055_v55  ;;  %v3369_v52 = vld [vmem:[#allocation4 + $0x100] sm:$0xff] }
 0x290   : > { %v8380_v56 = vpack.c.bf16 %v3060_v19, %v3059_v50 }
 0x324   : > { %v5365_v61 = vpop.f32.mrb[4].mxu0 }
 0x325   : > { %v2746_v25 = vadd.f32 %v5365_v61, %v8321_v39  ;;  %v2740_v27 = vpop.f32.mrb[5].mxu0 }
 0x326   : > { %v2741_v1 = vadd.f32 %v8321_v39, %v2740_v27 }
 0x327   : > { %v2836_v51 = vadd.f32 %v2820_v36, %v2746_v25  ;;  %v3058_v36 = vld [vmem:[#allocation4 + $0x68] sm:$0xff] }
 0x328   : > { %v2835_v12 = vadd.f32 %v2819_v38, %v2741_v1  ;;  %v5368_v32 = vpop.f32.mrb[6].mxu0  ;;  %v8378_v57 = vpack.c.bf16 %v3058_v36, %v3057_v26  ;;  %v3370_v1 = vld [vmem:[#allocation4 + $0x108] sm:$0xff] }
 0x329   : > { %v2868_v46 = vmul.f32 0.1, %v2836_v51  ;;  %v2756_v40 = vadd.f32 %v5368_v32, %v8321_v39  ;;  %v2750_v61 = vpop.f32.mrb[7].mxu0  ;;  %vm2852_vm5 = vcmp.ge.f32.partialorder %v2836_v51, 0.0  ;;  %v8386_v37 = vpack.c.bf16 %v3370_v1, %v3369_v52 }
 0x32a   : > { %v2751_v29 = vadd.f32 %v8321_v39, %v2750_v61  ;;  %vm2851_vm11 = vcmp.ge.f32.partialorder %v2835_v12, 0.0  ;;  %v2867_v38 = vmul.f32 0.1, %v2835_v12 }
 0x32b   : > { %v2838_v35 = vadd.f32 %v2822_v5, %v2756_v40  ;;  %v2884_v49 = vsel %vm2852_vm5, %v2836_v51, %v2868_v46  ;;  %vm9848_vm5 = vcmask 1046528  }
 0x32c   : > { %v2837_v14 = vadd.f32 %v2821_v41, %v2751_v29  ;;  %v5371_v25 = vpop.f32.mrb[8].mxu0  ;;  %v2883_v27 = vsel %vm2851_vm11, %v2835_v12, %v2867_v38  ;;  %v2918_v3 = vrot.slane %v2884_v49, 7  ;;  %v2982_v59 = vrot.slane %v2884_v49, 1  ;;  %vm9849_vm11 = vmmov %vm9847_vm12 }
 0x32d   : > { %v2766_v62 = vadd.f32 %v5371_v25, %v8321_v39  ;;  %v2760_v13 = vpop.f32.mrb[9].mxu0  ;;  %v2917_v32 = vrot.slane %v2883_v27, 7  ;;  %v2981_v61 = vrot.slane %v2883_v27, 1  ;;  %5419 = vmatprep.mubr.f32.mxu1 %v2883_v27  ;;  %vm2854_vm4 = vcmp.ge.f32.partialorder %v2838_v35, 0.0 }
 0x32e   : > { %v2761_v5 = vadd.f32 %v8321_v39, %v2760_v13  ;;  %5420 = vmatmul.mubr.f32.vlgmr.msra.gmra.mrb[8].mxu1 %v2884_v49  ;;  %vm2853_vm0 = vcmp.ge.f32.partialorder %v2837_v14, 0.0  ;;  %v2869_v51 = vmul.f32 0.1, %v2837_v14  ;;  %v2870_v55 = vmul.f32 0.1, %v2838_v35 }
 0x32f   : > { %v2840_v41 = vadd.f32 %v8331_v18, %v2766_v62  ;;  %6190 = vmatpush3.bf16.msra.mxu1 %v8303_v0  ;;  %v8389_v26 = vsel %vm9847_vm12, %v2917_v32, %v2918_v3  ;;  %v8392_v12 = vsel %vm9848_vm5, %v2981_v61, %v2982_v59  ;;  %v8398_v40 = vsel %vm9849_vm11, 0.0, %v2917_v32  ;;  %vm9850_vm12 = vmmov %vm9849_vm11 }
 0x330   : > { %v2839_v36 = vadd.f32 %v8334_v42, %v2761_v5  ;;  %v5374_v50 = vpop.f32.mrb[10].mxu0  ;;  %v2885_v19 = vsel %vm2853_vm0, %v2837_v14, %v2869_v51  ;;  %6192 = vmatprep.subr.bf16.mxu1 %v6191_v43  ;;  %v8395_v46 = vsel %vm2854_vm4, %v2838_v35, %v2870_v55  ;;  %vm9851_vm5 = vmmov %vm9849_vm11  ;;  %vm9852_vm11 = vcmask 1046528  }
 0x331   : > { %v2776_v0 = vadd.f32 %v5374_v50, %v8321_v39  ;;  %v2770_v18 = vpop.f32.mrb[11].mxu0  ;;  %v2920_v29 = vrot.slane %v2885_v19, 7  ;;  %v2984_v38 = vrot.slane %v2885_v19, 1  ;;  %5422 = vmatprep.mubr.f32.mxu1 %v2885_v19  ;;  %v2922_v49 = vrot.slane %v8395_v46, 7 }
 0x332   : > { %v2771_v25 = vadd.f32 %v8321_v39, %v2770_v18  ;;  %v9655_v42 = vrot.slane %v8395_v46, 1  ;;  %5423 = vmatmul.mubr.f32.gmra.mrb[10].mxu1 %v8395_v46  ;;  %vm2855_vm0 = vcmp.ge.f32.partialorder %v2839_v36, 0.0  ;;  %v2871_v35 = vmul.f32 0.1, %v2839_v36 }
 0x333   : > { %v2842_v14 = vadd.f32 %v8337_v34, %v2776_v0  ;;  %6194 = vmatpush3.bf16.msra.mxu1 %v6191_v43  ;;  %vm2856_vm4 = vcmp.ge.f32.partialorder %v2840_v41, 0.0  ;;  %v2872_v27 = vmul.f32 0.1, %v2840_v41  ;;  %v8407_v52 = vsel %vm9850_vm12, %v2918_v3, %v2920_v29 }
 0x334   : > { %v2841_v1 = vadd.f32 %v8341_v58, %v2771_v25  ;;  %v8410_v13 = vsel %vm2855_vm0, %v2839_v36, %v2871_v35  ;;  %6196 = vmatprep.subr.bf16.mxu1 %v8368_v47  ;;  %v8414_v32 = vsel %vm9851_vm5, %v2920_v29, %v2922_v49  ;;  %v8417_v61 = vsel %vm9852_vm11, %v2982_v59, %v2984_v38 }
 0x335   : > { %v2924_v5 = vrot.slane %v8410_v13, 7  ;;  %v2988_v3 = vrot.slane %v8410_v13, 1  ;;  %5425 = vmatprep.mubr.f32.mxu1 %v8410_v13  ;;  %v8423_v58 = vsel %vm2856_vm4, %v2840_v41, %v2872_v27  ;;  %vm2858_vm12 = vcmp.ge.f32.partialorder %v2842_v14, 0.0  ;;  %vm9853_vm4 = vmmov %vm9851_vm5 }
 0x336   : > { %v5377_v62 = vpop.f32.mrb[12].mxu0  ;;  %v2926_v55 = vrot.slane %v8423_v58, 7  ;;  %5426 = vmatmul.mubr.f32.gmra.mrb[12].mxu1 %v8423_v58  ;;  %vm2857_vm0 = vcmp.ge.f32.partialorder %v2841_v1, 0.0  ;;  %v2873_v50 = vmul.f32 0.1, %v2841_v1  ;;  %vm9854_vm5 = vmmov %vm9853_vm4 }
 0x337   : > { %v2786_v34 = vadd.f32 %v5377_v62, %v8321_v39  ;;  %v2780_v43 = vpop.f32.mrb[13].mxu0  ;;  %6198 = vmatpush3.bf16.msra.mxu1 %v8368_v47  ;;  %v2874_v19 = vmul.f32 0.1, %v2842_v14  ;;  %v8434_v18 = vsel %vm9853_vm4, %v2922_v49, %v2924_v5 }
 0x338   : > { %v2781_v51 = vadd.f32 %v8321_v39, %v2780_v43  ;;  %6200 = vmatprep.subr.bf16.mxu1 %v8370_v31  ;;  %v8437_v29 = vsel %vm9854_vm5, %v2924_v5, %v2926_v55  ;;  %v8445_v35 = vsel %vm2857_vm0, %v2841_v1, %v2873_v50 }
 0x339   : > { %v2844_v59 = vadd.f32 %v8344_v8, %v2786_v34  ;;  %v8442_v8 = vsel %vm9852_vm11, %v2984_v38, %v9655_v42  ;;  %v2928_v49 = vrot.slane %v8445_v35, 7  ;;  %5428 = vmatprep.mubr.f32.mxu1 %v8445_v35 }
 0x33a   : > { %v2843_v0 = vadd.f32 %v8347_v44, %v2781_v51  ;;  %v5380_v41 = vpop.f32.mrb[14].mxu0  ;;  %v8447_v44 = vsel %vm2858_vm12, %v2842_v14, %v2874_v19  ;;  %vm9855_vm12 = vmmov %vm9853_vm4 }
 0x33b   : > { %v2796_v47 = vadd.f32 %v5380_v41, %v8321_v39  ;;  %v2790_v25 = vpop.f32.mrb[15].mxu0  ;;  %vm2860_vm2 = vcmp.ge.f32.partialorder %v2844_v59, 0.0  ;;  %v2930_v34 = vrot.slane %v8447_v44, 7  ;;  %5429 = vmatmul.mubr.f32.gmra.mrb[14].mxu1 %v8447_v44  ;;  %v2876_v51 = vmul.f32 0.1, %v2844_v59 }
 0x33c   : > { %v2791_v27 = vadd.f32 %v8321_v39, %v2790_v25  ;;  %vm2859_vm0 = vcmp.ge.f32.partialorder %v2843_v0, 0.0  ;;  %v2875_v14 = vmul.f32 0.1, %v2843_v0  ;;  %6202 = vmatpush3.bf16.msra.mxu1 %v8370_v31  ;;  %v8460_v50 = vsel %vm9855_vm12, %v2926_v55, %v2928_v49 }
 0x33d   : > { %v2846_v38 = vadd.f32 %v8351_v9, %v2796_v47  ;;  %v8463_v19 = vsel %vm9853_vm4, %v2928_v49, %v2930_v34  ;;  %6204 = vmatprep.subr.bf16.mxu1 %v8373_v24  ;;  %v8474_v55 = vsel %vm2860_vm2, %v2844_v59, %v2876_v51  ;;  %v9869_v13 = vrot.slane %v8447_v44, 1 }
 0x33e   : > { %v2845_v1 = vadd.f32 %v8354_v63, %v2791_v27  ;;  %v5383_v5 = vpop.f32.mrb[16].mxu0  ;;  %v8466_v47 = vsel %vm2859_vm0, %v2843_v0, %v2875_v14  ;;  %v2934_v0 = vrot.slane %v8474_v55, 7  ;;  %vm9856_vm0 = vmmov %vm9853_vm4 }
 0x33f   : > { %v2806_v9 = vadd.f32 %v5383_v5, %v8321_v39  ;;  %v2800_v41 = vpop.f32.mrb[17].mxu0  ;;  %vm2862_vm5 = vcmp.ge.f32.partialorder %v2846_v38, 0.0  ;;  %v2878_v25 = vmul.f32 0.1, %v2846_v38  ;;  %v2932_v31 = vrot.slane %v8466_v47, 7  ;;  %5431 = vmatprep.mubr.f32.mxu1 %v8466_v47  ;;  %vm9857_vm4 = vmmov %vm9856_vm0 }
 0x340   : > { %v2801_v63 = vadd.f32 %v8321_v39, %v2800_v41  ;;  %5432 = vmatmul.mubr.f32.gmra.mrb[16].mxu1 %v8474_v55  ;;  %vm2861_vm11 = vcmp.ge.f32.partialorder %v2845_v1, 0.0  ;;  %v2877_v27 = vmul.f32 0.1, %v2845_v1 }
 0x341   : > { %v2848_v49 = vadd.f32 %v8357_v2, %v2806_v9  ;;  %6206 = vmatpush3.bf16.msra.mxu1 %v8373_v24  ;;  %v2894_v43 = vsel %vm2862_vm5, %v2846_v38, %v2878_v25  ;;  %v8484_v59 = vsel %vm9856_vm0, %v2930_v34, %v2932_v31  ;;  %v8492_v42 = vsel %vm9857_vm4, %v2932_v31, %v2934_v0 }
 0x342   : > { %v2847_v5 = vadd.f32 %v8360_v30, %v2801_v63  ;;  %v5386_v41 = vpop.f32.mrb[18].mxu0  ;;  %6208 = vmatprep.subr.bf16.mxu1 %v8376_v48  ;;  %v2938_v9 = vrot.slane %v2894_v43, 7  ;;  %v3002_v14 = vrot.slane %v2894_v43, 1  ;;  %v2893_v30 = vsel %vm2861_vm11, %v2845_v1, %v2877_v27 }
 0x343   : > { %v2816_v2 = vadd.f32 %v5386_v41, %v8321_v39  ;;  %v2810_v51 = vpop.f32.mrb[19].mxu0  ;;  %vm2864_vm2 = vcmp.ge.f32.partialorder %v2848_v49, 0.0  ;;  %v2936_v36 = vrot.slane %v2893_v30, 7  ;;  %v3000_v38 = vrot.slane %v2893_v30, 1  ;;  %5434 = vmatprep.mubr.f32.mxu1 %v2893_v30 }
 0x344   : > { %v2811_v62 = vadd.f32 %v8321_v39, %v2810_v51  ;;  %vm2863_vm12 = vcmp.ge.f32.partialorder %v2847_v5, 0.0  ;;  %v2879_v24 = vmul.f32 0.1, %v2847_v5  ;;  %v2880_v34 = vmul.f32 0.1, %v2848_v49  ;;  %5435 = vmatmul.mubr.f32.gmra.mrb[18].mxu1 %v2894_v43 }
 0x345   : > { %v2850_v63 = vadd.f32 %v8363_v22, %v2816_v2  ;;  %v9858_v39 = vrot.slane %v8395_v46, 1  ;;  %vm9859_vm5 = vcmask 1046528   ;;  %6210 = vmatpush3.bf16.msra.mxu1 %v8376_v48  ;;  %v9863_v30 = vrot.slane %v8423_v58, 1 }
 0x346   : > { %v2849_v25 = vadd.f32 %v8366_v15, %v2811_v62  ;;  %v2895_v41 = vsel %vm2863_vm12, %v2847_v5, %v2879_v24  ;;  %v2896_v2 = vsel %vm2864_vm2, %v2848_v49, %v2880_v34  ;;  %6212 = vmatprep.subr.bf16.mxu1 %v8378_v57  ;;  %vm9860_vm12 = vmmov %vm9857_vm4  ;;  %v8508_v5 = vsel %vm9857_vm4, %v2936_v36, %v2938_v9 }
 0x347   : > { %v8499_v1 = vsel %vm9859_vm5, %v9858_v39, %v2988_v3  ;;  %v2940_v22 = vrot.slane %v2895_v41, 7  ;;  %v3004_v27 = vrot.slane %v2895_v41, 1  ;;  %5437 = vmatprep.mubr.f32.mxu1 %v2895_v41  ;;  %v2942_v15 = vrot.slane %v2896_v2, 7  ;;  %vm9861_vm5 = vmmov %vm9857_vm4 }
 0x348   : > { %v3006_v62 = vrot.slane %v2896_v2, 1  ;;  %vm2865_vm0 = vcmp.ge.f32.partialorder %v2849_v25, 0.0  ;;  %v2881_v43 = vmul.f32 0.1, %v2849_v25  ;;  %v2882_v31 = vmul.f32 0.1, %v2850_v63  ;;  %5438 = vmatmul.mubr.f32.gmra.mrb[20].mxu1 %v2896_v2  ;;  %vm9862_vm2 = vmmov %vm9857_vm4 }
 0x349   : > { %v8505_v46 = vsel %vm9860_vm12, %v2934_v0, %v2936_v36  ;;  %v8511_v48 = vsel %vm9861_vm5, %v2938_v9, %v2940_v22  ;;  %v8514_v49 = vsel %vm9862_vm2, %v2940_v22, %v2942_v15  ;;  %vm9864_vm11 = vcmask 1046528   ;;  %6214 = vmatpush3.bf16.msra.mxu1 %v8378_v57 }
 0x34a   : > { %v2897_v51 = vsel %vm2865_vm0, %v2849_v25, %v2881_v43  ;;  %v8521_v24 = vsel %vm9864_vm11, %v2988_v3, %v9863_v30  ;;  %v9865_v0 = vrot.slane %v8445_v35, 1  ;;  %v9866_v36 = vmov %v9863_v30  ;;  %vm9867_vm12 = vmmov %vm9864_vm11  ;;  %6216 = vmatprep.subr.bf16.mxu1 %v8380_v56  ;;  %v3371_v30 = vld [vmem:[#allocation4 + $0x110] sm:$0xff] }
 0x34b   : > { %v2944_v9 = vrot.slane %v2897_v51, 7  ;;  %v3008_v25 = vrot.slane %v2897_v51, 1  ;;  %5440 = vmatprep.mubr.f32.mxu1 %v2897_v51  ;;  %vm9868_vm0 = vcmp.ge.f32.partialorder %v2850_v63, 0.0  ;;  %v9872_v2 = vrot.slane %v8466_v47, 1  ;;  %vm9874_vm5 = vmmov %vm9864_vm11 }
 0x34c   : > { %v8528_v34 = vsel %vm9867_vm12, %v9866_v36, %v9865_v0  ;;  %v8532_v41 = vsel %vm9868_vm0, %v2850_v63, %v2882_v31  ;;  %v9870_v3 = vmov %v9865_v0  ;;  %v9873_v63 = vmov %v9869_v13  ;;  %vm9877_vm2 = vmmov %vm9874_vm5  ;;  %v3372_v0 = vld [vmem:[#allocation4 + $0x118] sm:$0xff] }
 0x34d   : > { %v8539_v39 = vsel %vm9864_vm11, %v9870_v3, %v9869_v13  ;;  %v2946_v58 = vrot.slane %v8532_v41, 7  ;;  %v3010_v22 = vrot.slane %v8532_v41, 1  ;;  %v8551_v43 = vsel %vm9874_vm5, %v9873_v63, %v9872_v2  ;;  %vm9878_vm12 = vmmov %vm9857_vm4  ;;  %5441 = vmatmul.mubr.f32.gmra.mrb[22].mxu1 %v8532_v41  ;;  %v3901_v41 = vld [vmem:[#allocation2 + $0xe0] sm:$0xff] }
 0x34e   : > { %v9875_v35 = vrot.slane %v8474_v55, 1  ;;  %v9876_v31 = vmov %v9872_v2  ;;  %v8561_v36 = vsel %vm9878_vm12, %v2942_v15, %v2944_v9  ;;  %vm9880_vm0 = vmmov %vm9877_vm2  ;;  %6218 = vmatpush3.bf16.msra.mxu1 %v8380_v56 }
 0x34f   : > { %vm9881_vm11 = vmmov %vm9880_vm0  ;;  %v8585_v55 = vsel %vm9880_vm0, %v3008_v25, %v3010_v22  ;;  %6220 = vmatprep.subr.bf16.mxu1 %v8386_v37 }
 0x350   : > { %v8558_v51 = vsel %vm9877_vm2, %v9876_v31, %v9875_v35  ;;  %v9879_v13 = vmov %v9875_v35  ;;  %v8569_v44 = vsel %vm9881_vm11, %v3000_v38, %v3002_v14  ;;  %vm9882_vm5 = vmmov %vm9880_vm0  ;;  %v3380_v35 = vld [vmem:[#allocation4 + $0x158] sm:$0xff]  ;;  %v3382_v31 = vld [vmem:[#allocation4 + $0x168] sm:$0xff] }
 0x351   : > { %v8566_v3 = vsel %vm9880_vm0, %v9879_v13, %v3000_v38  ;;  %v8572_v2 = vsel %vm9882_vm5, %v3002_v14, %v3004_v27  ;;  %vm9883_vm2 = vmmov %vm9857_vm4  ;;  %v6223_v38 = vpack.c.bf16 %v3372_v0, %v3371_v30  ;;  %v3384_v30 = vld [vmem:[#allocation4 + $0x178] sm:$0xff]  ;;  %v3903_v0 = vld [vmem:[#allocation2 + $0xf0] sm:$0xff] }
 0x352   : > { %v2947_v47 = vsel %vm9883_vm2, %v2944_v9, %v2946_v58  ;;  %vm9884_vm4 = vmmov %vm9880_vm0  ;;  %v3375_v9 = vld [vmem:[#allocation4 + $0x130] sm:$0xff] }
 0x353   : > { %v8577_v63 = vsel %vm9884_vm4, %v3004_v27, %v3006_v62  ;;  %vm9885_vm12 = vmmov %vm9880_vm0  ;;  %v3373_v27 = vld [vmem:[#allocation4 + $0x120] sm:$0xff]  ;;  %v3379_v58 = vld [vmem:[#allocation4 + $0x150] sm:$0xff] }
 0x354   : > { %v8580_v15 = vsel %vm9885_vm12, %v3006_v62, %v3008_v25  ;;  %vm9886_vm11 = vmneg %vm7812_vm6  ;;  %v3374_v62 = vld [vmem:[#allocation4 + $0x128] sm:$0xff]  ;;  %v3376_v25 = vld [vmem:[#allocation4 + $0x138] sm:$0xff] }
 0x355   : > { %5475 = vmatprep.mubr.msk.f32.mxu1 %vm9886_vm11, %v8398_v40  ;;  %vm9664_vm4 = vmneg %vm7824_vm7  ;;  %v6227_v40 = vpack.c.bf16 %v3374_v62, %v3373_v27  ;;  %v1951_v27 = vcombine.high %v8297_v53, %v8297_v53 }
 0x356   : > { %5476 = vmatmul.mubr.f32.vlgmr.msra.gmra.mrb[8].mxu1 %v8389_v26  ;;  %vm9660_vm5 = vmneg %vm7828_vm8  ;;  %v3377_v26 = vld [vmem:[#allocation4 + $0x140] sm:$0xff] }
 0x357   : > { %6222 = vmatpush3.bf16.msra.mxu1 %v8386_v37  ;;  %5478 = vmatprep.mubr.msk.f32.mxu1 %vm9664_vm4, %v8407_v52  ;;  %vm9659_vm2 = vmneg %vm7954_vm14  ;;  %v6231_v37 = vpack.c.bf16 %v3376_v25, %v3375_v9  ;;  %v3378_v52 = vld [vmem:[#allocation4 + $0x148] sm:$0xff]  ;;  %v1958_v9 = vrot.slane %v8297_v53, %v9840_v16  ;;  %v1861_v25 = vcombine.high %v8299_v20, %v8299_v20 }
 0x358   : > { %6224 = vmatprep.subr.bf16.mxu1 %v6223_v38  ;;  %vm9656_vm12 = vmneg %vm7832_vm9 }
 0x359   : > { %vm9658_vm0 = vmneg %vm7980_vm1 }
 0x35a   : > { %5479 = vmatmul.mubr.f32.gmra.mrb[10].mxu1 %v8414_v32  ;;  %vm9657_vm11 = vmneg %vm9821_vm3 }
 0x35b   : > { %6226 = vmatpush3.bf16.msra.mxu1 %v6223_v38  ;;  %5481 = vmatprep.mubr.msk.f32.mxu1 %vm9660_vm5, %v8434_v18  ;;  %v6235_v18 = vpack.c.bf16 %v3378_v52, %v3377_v26  ;;  %v1778_v38 = vrot.slane %v8295_v54, %v9840_v16  ;;  %v1965_v26 = vrot.slane %v1951_v27, %v9840_v16 }
 0x35c   : > { %6228 = vmatprep.subr.bf16.mxu1 %v6227_v40 }
 0x35d   : > { %v1786_v62 = vcombine.high %v1778_v38, %v1778_v38 }
 0x35e   : > { %5482 = vmatmul.mubr.f32.gmra.mrb[12].mxu1 %v8437_v29  ;;  %v6239_v29 = vpack.c.bf16 %v3380_v35, %v3379_v58  ;;  %v1868_v58 = vrot.slane %v8299_v20, %v9840_v16  ;;  %v1981_v20 = vrot.slane %v1965_v26, %v9840_v16 }
 0x35f   : > { %6230 = vmatpush3.bf16.msra.mxu1 %v6227_v40  ;;  %5484 = vmatprep.mubr.msk.f32.mxu1 %vm9659_vm2, %v8460_v50  ;;  %v3381_v50 = vld [vmem:[#allocation4 + $0x160] sm:$0xff] }
 0x360   : > { %6232 = vmatprep.subr.bf16.mxu1 %v6231_v37 }
 0x362   : > { %5485 = vmatmul.mubr.f32.gmra.mrb[14].mxu1 %v8463_v19  ;;  %v6243_v19 = vpack.c.bf16 %v3382_v31, %v3381_v50  ;;  %v1875_v50 = vrot.slane %v1861_v25, %v9840_v16  ;;  %v1967_v31 = vcombine.high %v1965_v26, %v1965_v26 }
 0x363   : > { %6234 = vmatpush3.bf16.msra.mxu1 %v6231_v37  ;;  %5487 = vmatprep.mubr.msk.f32.mxu1 %vm9656_vm12, %v8484_v59  ;;  %v3383_v59 = vld [vmem:[#allocation4 + $0x170] sm:$0xff]  ;;  %vm9661_vm12 = vmneg %vm8076_vm10  ;;  %v1794_v37 = vrot.slane %v1778_v38, %v9840_v16  ;;  %v1997_v38 = vcombine.high %v1981_v20, %v1981_v20 }
 0x364   : > { %6236 = vmatprep.subr.bf16.mxu1 %v6235_v18 }
 0x365   : > { %v1816_v53 = vcombine.high %v1794_v37, %v1794_v37 }
 0x366   : > { %5488 = vmatmul.mubr.f32.gmra.mrb[16].mxu1 %v8492_v42  ;;  %v6247_v42 = vpack.c.bf16 %v3384_v30, %v3383_v59  ;;  %v1974_v30 = vrot.slane %v1958_v9, %v9840_v16 }
 0x367   : > { %6238 = vmatpush3.bf16.msra.mxu1 %v6235_v18  ;;  %5490 = vmatprep.mubr.msk.f32.mxu1 %vm9658_vm0, %v8505_v46  ;;  %v9890_v46 = vld [vmem:[#allocation21_spill] sm:$0xff] }
 0x368   : > { %6240 = vmatprep.subr.bf16.mxu1 %v6239_v29 }
 0x36a   : > { %5491 = vmatmul.mubr.f32.gmra.mrb[18].mxu1 %v8508_v5  ;;  %v9892_v5 = vld [vmem:[#allocation22_spill] sm:$0xff] }
 0x36b   : > { %6242 = vmatpush3.bf16.msra.mxu1 %v6239_v29  ;;  %5493 = vmatprep.mubr.msk.f32.mxu1 %vm9657_vm11, %v8511_v48  ;;  %vm9891_vm11 = vnez %v9890_v46  ;;  %vm9893_vm2 = vnez %v9892_v5  ;;  %v3897_v48 = vld [vmem:[#allocation2 + $0xc0] sm:$0xff]  ;;  %v1966_v29 = vcombine.high %v1958_v9, %v1958_v9 }
 0x36c   : > { %6244 = vmatprep.subr.bf16.mxu1 %v6243_v19  ;;  %vm9662_vm0 = vmneg %vm9891_vm11 }
 0x36d   : > { %vm9663_vm5 = vmneg %vm9893_vm2 }
 0x36e   : > { %5494 = vmatmul.mubr.f32.gmra.mrb[20].mxu1 %v8514_v49  ;;  %v3898_v49 = vld [vmem:[#allocation2 + $0xc8] sm:$0xff] }
 0x36f   : > { %6246 = vmatpush3.bf16.msra.mxu1 %v6243_v19  ;;  %5496 = vmatprep.mubr.msk.f32.mxu1 %vm9661_vm12, %v8561_v36  ;;  %vm9665_vm12 = vmneg %vm7938_vm13  ;;  %v3904_v36 = vld [vmem:[#allocation2 + $0xf8] sm:$0xff] }
 0x370   : > { %6248 = vmatprep.subr.bf16.mxu1 %v6247_v42  ;;  %v6279_v13 = vpack.c.bf16 %v3904_v36, %v3903_v0 }
 0x372   : > { %5497 = vmatmul.mubr.f32.gmra.mrb[22].mxu1 %v2947_v47 }
 0x373   : > { %6250 = vmatpush3.bf16.msra.mxu1 %v6247_v42  ;;  %5531 = vmatprep.mubr.f32.mxu1 %v8392_v12 }
 0x376   : > { %5532 = vmatmul.mubr.msk.f32.vlgmr.msra.gmra.mrb[8].mxu1 %vm9662_vm0, %v8417_v61  ;;  %vm9668_vm0 = vmneg %vm7958_vm15  ;;  %v3895_v61 = vld [vmem:[#allocation2 + $0xb0] sm:$0xff] }
 0x377   : > { %5534 = vmatprep.mubr.f32.mxu1 %v8442_v8  ;;  %v3896_v8 = vld [vmem:[#allocation2 + $0xb8] sm:$0xff] }
 0x37a   : > { %5535 = vmatmul.mubr.msk.f32.gmra.mrb[10].mxu1 %vm9663_vm5, %v8499_v1  ;;  %vm9894_vm5 = vnez %v9804_v33  ;;  %v6263_v1 = vpack.c.bf16 %v3896_v8, %v3895_v61  ;;  %v1876_v61 = vcombine.high %v1868_v58, %v1868_v58 }
 0x37b   : > { %5537 = vmatprep.mubr.f32.mxu1 %v8521_v24  ;;  %vm9670_vm4 = vmneg %vm9894_vm5  ;;  %vm9898_vm5 = vcmask 1046528   ;;  %v6267_v24 = vpack.c.bf16 %v3898_v49, %v3897_v48  ;;  %v1988_v48 = vrot.slane %v1966_v29, %v9840_v16  ;;  %v1877_v49 = vcombine.high %v1875_v50, %v1875_v50 }
 0x37c   : > { %v3028_v12 = vsel %vm9898_vm5, %v3010_v22, 0.0  ;;  %6264 = vmatprep.subr.bf16.mxu0 %v6263_v1  ;;  %v3902_v22 = vld [vmem:[#allocation2 + $0xe8] sm:$0xff] }
 0x37d   : > { %6266 = vmatpush3.bf16.msra.mxu0 %v6263_v1  ;;  %v8728_v1 = vrot.slane %v1794_v37, %v7808_v7  ;;  %v8763_v9 = vrot.slane %v1988_v48, %v7808_v7 }
 0x37e   : > { %5538 = vmatmul.mubr.msk.f32.gmra.mrb[12].mxu1 %vm9665_vm12, %v8528_v34  ;;  %vm9895_vm12 = vnez %v9817_v11  ;;  %v3899_v34 = vld [vmem:[#allocation2 + $0xd0] sm:$0xff]  ;;  %6268 = vmatprep.subr.bf16.mxu0 %v6267_v24 }
 0x37f   : > { %5540 = vmatprep.mubr.f32.mxu1 %v8539_v39  ;;  %vm9689_vm10 = vmneg %vm9895_vm12  ;;  %v3900_v39 = vld [vmem:[#allocation2 + $0xd8] sm:$0xff] }
 0x381   : > { %6270 = vmatpush3.bf16.msra.mxu0 %v6267_v24 }
 0x382   : > { %5541 = vmatmul.mubr.msk.f32.gmra.mrb[14].mxu1 %vm9668_vm0, %v8551_v43  ;;  %vm9896_vm0 = vnez %v9829_v60  ;;  %v6271_v43 = vpack.c.bf16 %v3900_v39, %v3899_v34  ;;  %v8736_v34 = vrot.slane %v1816_v53, %v7808_v7 }
 0x383   : > { %5543 = vmatprep.mubr.f32.mxu1 %v8558_v51  ;;  %vm9688_vm3 = vmneg %vm9896_vm0  ;;  %v6275_v51 = vpack.c.bf16 %v3902_v22, %v3901_v41 }
 0x384   : > { %6272 = vmatprep.subr.bf16.mxu0 %v6271_v43 }
 0x385   : > { %6274 = vmatpush3.bf16.msra.mxu0 %v6271_v43  ;;  %v1995_v43 = vrot.slane %v1967_v31, %v9840_v16  ;;  %v8781_v31 = vrot.slane %v1997_v38, %v7808_v7 }
 0x386   : > { %5544 = vmatmul.mubr.msk.f32.gmra.mrb[16].mxu1 %vm9670_vm4, %v8566_v3  ;;  %vm9897_vm4 = vnez %v9809_v21  ;;  %6276 = vmatprep.subr.bf16.mxu0 %v6275_v51  ;;  %v4949_v3 = vmul.f32 -1.442695, %v8301_v17  ;;  %v4310_v21 = vld [vmem:[#allocation4 + $0x240] sm:$0xff] }
 0x387   : > { %5546 = vmatprep.mubr.f32.mxu1 %v8569_v44  ;;  %vm9682_vm1 = vmneg %vm9897_vm4  ;;  %v4302_v44 = vld [vmem:[#allocation4 + $0x200] sm:$0xff]  ;;  %v1999_v27 = vcombine.high %v1995_v43, %v1995_v43  ;;  %v8778_v53 = vrot.slane %v1995_v43, %v7808_v7  ;;  %9903 = vst [vmem:[#allocation31_spill] sm:$0xff] %v8781_v31 }
 0x388   : > { %6490 = vpow2.f32 %v4949_v3  ;;  %v1884_v3 = vrot.slane %v1868_v58, %v9840_v16 }
 0x389   : > { %6278 = vmatpush3.bf16.msra.mxu0 %v6275_v51  ;;  %v1996_v51 = vcombine.high %v1974_v30, %v1974_v30  ;;  %9902 = vst [vmem:[#allocation28_spill] sm:$0xff] %v8778_v53 }
 0x38a   : > { %5547 = vmatmul.mubr.msk.f32.gmra.mrb[18].mxu1 %vm9689_vm10, %v8572_v2  ;;  %6280 = vmatprep.subr.bf16.mxu0 %v6279_v13  ;;  %v4303_v2 = vld [vmem:[#allocation4 + $0x208] sm:$0xff]  ;;  %vm9917_vm10 = vcmask 1046528  }
 0x38b   : > { %5549 = vmatprep.mubr.f32.mxu1 %v8577_v63  ;;  %v8702_v47 = vpack.c.bf16 %v4303_v2, %v4302_v44  ;;  %v1998_v2 = vcombine.high %v1988_v48, %v1988_v48  ;;  %v8768_v26 = vrot.slane %v1996_v51, %v7808_v7 }
 0x38d   : > { %6282 = vmatpush3.bf16.msra.mxu0 %v6279_v13  ;;  %v8775_v58 = vrot.slane %v1998_v2, %v7808_v7  ;;  %v4306_v2 = vld [vmem:[#allocation4 + $0x220] sm:$0xff] }
 0x38e   : > { %5550 = vmatmul.mubr.msk.f32.gmra.mrb[20].mxu1 %vm9688_vm3, %v8580_v15  ;;  %6284 = vmatprep.subr.bf16.mxu0 %v8702_v47  ;;  %vm9915_vm3 = vcmask 1040384  }
 0x38f   : > { %5552 = vmatprep.mubr.f32.mxu1 %v8585_v55  ;;  %v1771_v55 = vcombine.high %v8295_v54, %v8295_v54  ;;  %v1808_v54 = vrot.slane %v1786_v62, %v9840_v16 }
 0x391   : > { %v1785_v17 = vrot.slane %v1771_v55, %v9840_v16  ;;  %v1818_v59 = vcombine.high %v1808_v54, %v1808_v54  ;;  %v8733_v24 = vrot.slane %v1808_v54, %v7808_v7  ;;  %v1905_v55 = vrot.slane %v1877_v49, %v9840_v16  ;;  %v4304_v49 = vld [vmem:[#allocation4 + $0x210] sm:$0xff] }
 0x392   : > { %5553 = vmatmul.mubr.msk.f32.gmra.mrb[22].mxu1 %vm9682_vm1, %v3028_v12  ;;  %v6491_v63 = vpop.eup %6490  ;;  %v1906_v54 = vcombine.high %v1884_v3, %v1884_v3 }
 0x393   : > { %v2043_v15 = vadd.f32 1.0, %v6491_v63  ;;  %v1787_v52 = vcombine.high %v1785_v17, %v1785_v17  ;;  %v1801_v18 = vrot.slane %v1785_v17, %v9840_v16  ;;  %v8743_v22 = vrot.slane %v1818_v59, %v7808_v7 }
 0x394   : > { %v1891_v63 = vrot.slane %v1875_v50, %v9840_v16  ;;  %v8756_v17 = vrot.slane %v1974_v30, %v7808_v7  ;;  %v1909_v50 = vcombine.high %v1905_v55, %v1905_v55  ;;  %v1913_v30 = vrot.slane %v1884_v3, %v7808_v7 }
 0x395   : > { %6492 = vrcp.f32 %v2043_v15  ;;  %v1815_v19 = vrot.slane %v1787_v52, %v9840_v16  ;;  %v1817_v12 = vcombine.high %v1801_v18, %v1801_v18  ;;  %v8739_v39 = vrot.slane %v1801_v18, %v7808_v7 }
 0x396   : > { %v1898_v15 = vrot.slane %v1876_v61, %v9840_v16  ;;  %v8771_v52 = vrot.slane %v1981_v20, %v7808_v7  ;;  %v8799_v20 = vrot.slane %v1891_v63, %v7808_v7  ;;  %v8802_v48 = vrot.slane %v1905_v55, %v7808_v7 }
 0x397   : > { %v1819_v41 = vcombine.high %v1815_v19, %v1815_v19  ;;  %v8746_v36 = vrot.slane %v1815_v19, %v7808_v7  ;;  %v8749_v13 = vrot.slane %v1817_v12, %v7808_v7  ;;  %v8784_v19 = vrot.slane %v1999_v27, %v7808_v7  ;;  %v4308_v27 = vld [vmem:[#allocation4 + $0x230] sm:$0xff] }
 0x398   : > { %v1908_v29 = vcombine.high %v1898_v15, %v1898_v15  ;;  %v8811_v3 = vrot.slane %v1909_v50, %v7808_v7 }
 0x399   : > { %9899 = vst [vmem:[#allocation23_spill] sm:$0xff] %v8746_v36  ;;  %9900 = vst [vmem:[#allocation26_spill] sm:$0xff] %v8749_v13 }
 0x39a   : > { %9904 = vst [vmem:[#allocation33_spill] sm:$0xff] %v8784_v19 }
 0x39f   : > { %v6493_v40 = vpop.eup %6492 }
 0x3a0   : > { %v2047_v35 = vcombine.high %v6493_v40, %v6493_v40  ;;  %v2054_v42 = vrot.slane %v6493_v40, %v9840_v16  ;;  %v8760_v40 = vrot.slane %v1819_v41, %v7808_v7  ;;  %v8805_v41 = vrot.slane %v1908_v29, %v7808_v7 }
 0x3a2   : > { %v2061_v8 = vrot.slane %v2047_v35, %v9840_v16  ;;  %v2062_v0 = vcombine.high %v2054_v42, %v2054_v42  ;;  %v2070_v62 = vrot.slane %v2054_v42, %v9840_v16  ;;  %9901 = vst [vmem:[#allocation17_spill] sm:$0xff] %v8760_v40  ;;  %v1907_v35 = vcombine.high %v1891_v63, %v1891_v63  ;;  %v8793_v42 = vld [vmem:[%s9579_s6 + $0x1] ss:$0 sm:$0xff]  ;;  %v4311_v40 = vld [vmem:[#allocation4 + $0x248] sm:$0xff] }
 0x3a4   : > { %v2063_v44 = vcombine.high %v2061_v8, %v2061_v8  ;;  %v2084_v25 = vrot.slane %v2062_v0, %v9840_v16  ;;  %v2077_v37 = vrot.slane %v2061_v8, %v9840_v16  ;;  %v2092_v59 = vcombine.high %v2070_v62, %v2070_v62 }
 0x3a5   : > { %v8796_v8 = vrot.slane %v1906_v54, %v7808_v7  ;;  %v8808_v51 = vrot.slane %v1907_v35, %v7808_v7  ;;  %v2099_v63 = vrot.slane %v2070_v62, %v7808_v7  ;;  %v4309_v54 = vld [vmem:[#allocation4 + $0x238] sm:$0xff] }
 0x3a6   : > { %v2091_v18 = vrot.slane %v2063_v44, %v9840_v16  ;;  %v8788_v16 = vrot.slane %v1898_v15, %v7808_v7  ;;  %v2094_v12 = vcombine.high %v2084_v25, %v2084_v25  ;;  %v2093_v61 = vcombine.high %v2077_v37, %v2077_v37  ;;  %v4305_v44 = vld [vmem:[#allocation4 + $0x218] sm:$0xff]  ;;  %v4307_v15 = vld [vmem:[#allocation4 + $0x228] sm:$0xff] }
 0x3a7   : > { %v8816_v29 = vrot.slane %v2084_v25, %v7808_v7  ;;  %v8819_v35 = vrot.slane %v2092_v59, %v7808_v7  ;;  %v8822_v50 = vrot.slane %v2077_v37, %v7808_v7  ;;  %v4313_v62 = vld [vmem:[#allocation4 + $0x258] sm:$0xff] }
 0x3a8   : > { %v2095_v43 = vcombine.high %v2091_v18, %v2091_v18  ;;  %v8829_v60 = vrot.slane %v2091_v18, %v7808_v7  ;;  %v8832_v25 = vrot.slane %v2093_v61, %v7808_v7 }
 0x3a9   : > { %9905 = vst [vmem:[#allocation24_spill] sm:$0xff] %v8816_v29  ;;  %9906 = vst [vmem:[#allocation41_spill] sm:$0xff] %v8819_v35  ;;  %v8834_v35 = vpack.c.bf16 %v4305_v44, %v4304_v49  ;;  %v8839_v29 = vpack.c.bf16 %v4307_v15, %v4306_v2 }
 0x3aa   : > { %9907 = vst [vmem:[#allocation25_spill] sm:$0xff] %v8822_v50  ;;  %9909 = vst [vmem:[#allocation38_spill] sm:$0xff] %v8829_v60  ;;  %v8837_v37 = vrot.slane %v2095_v43, %v7808_v7  ;;  %v8848_v60 = vpack.c.bf16 %v4313_v62, %v4312_v45 }
 0x3ab   : > { %9910 = vst [vmem:[#allocation27_spill] sm:$0xff] %v8832_v25  ;;  %v8846_v25 = vpack.c.bf16 %v4311_v40, %v4310_v21 }
 0x3ac   : > { %9911 = vst [vmem:[#allocation43_spill] sm:$0xff] %v8837_v37  ;;  %9912 = vst [vmem:[#allocation42_spill] sm:$0xff] %v8848_v60 }
 0x449   : > { %v5533_v0 = vpop.f32.mrb[8].mxu1 }
 0x44a   : > { %v3553_v55 = vadd.f32 %v5533_v0, %v8793_v42  ;;  %v3451_v38 = vpop.f32.mrb[9].mxu1  ;;  %v8826_v0 = vrot.slane %v2094_v12, %v7808_v7  ;;  %v8841_v12 = vpack.c.bf16 %v4309_v54, %v4308_v27 }
 0x44b   : > { %v3552_v19 = vadd.f32 %v8793_v42, %v3451_v38 }
 0x44c   : > { %9908 = vst [vmem:[#allocation36_spill] sm:$0xff] %v8826_v0  ;;  %vm3569_vm5 = vcmp.ge.f32.partialorder %v3553_v55, 0.0  ;;  %v3585_v59 = vmul.f32 0.1, %v3553_v55 }
 0x44d   : > { %vm3568_vm1 = vcmp.ge.f32.partialorder %v3552_v19, 0.0  ;;  %v3584_v38 = vmul.f32 0.1, %v3552_v19  ;;  %v5536_v50 = vpop.f32.mrb[10].mxu1 }
 0x44e   : > { %v8843_v0 = vsel %vm3569_vm5, %v3553_v55, %v3585_v59  ;;  %v3555_v18 = vadd.f32 %v5536_v50, %v8793_v42  ;;  %v3461_v61 = vpop.f32.mrb[11].mxu1 }
 0x44f   : > { %v9691_v49 = vrot.slane %v8843_v0, 7  ;;  %v3697_v7 = vrot.slane %v8843_v0, 1  ;;  %v8853_v43 = vmul.f32 %v8843_v0, %v1913_v30  ;;  %v3600_v44 = vsel %vm3568_vm1, %v3552_v19, %v3584_v38  ;;  %vm9916_vm1 = vmmov %vm9915_vm3 }
 0x450   : > { %v3632_v2 = vrot.slane %v3600_v44, 7  ;;  %v3696_v15 = vrot.slane %v3600_v44, 1  ;;  %v8855_v27 = vmul.f32 %v3600_v44, %v1913_v30  ;;  %vm3571_vm5 = vcmp.ge.f32.partialorder %v3555_v18, 0.0 }
 0x451   : > { %v3587_v55 = vmul.f32 0.1, %v3555_v18  ;;  %v3554_v54 = vadd.f32 %v8793_v42, %v3461_v61  ;;  %v5539_v21 = vpop.f32.mrb[12].mxu1  ;;  %v8859_v45 = vmul.f32 %v8843_v0, %v2099_v63  ;;  %v8861_v40 = vmul.f32 %v3600_v44, %v2099_v63 }
 0x452   : > { %v8866_v50 = vsel %vm9915_vm3, %v3632_v2, %v9691_v49  ;;  %v3679_v19 = vsel %vm9916_vm1, 0.0, %v3632_v2  ;;  %v3557_v30 = vadd.f32 %v5539_v21, %v8793_v42  ;;  %v3471_v62 = vpop.f32.mrb[13].mxu1  ;;  %v3698_v59 = vsel %vm9917_vm10, %v3696_v15, %v3697_v7 }
 0x453   : > { %9913 = vst [vmem:[#allocation29_spill] sm:$0xff] %v8859_v45  ;;  %9914 = vst [vmem:[#allocation40_spill] sm:$0xff] %v8861_v40  ;;  %v8871_v38 = vsel %vm3571_vm5, %v3555_v18, %v3587_v55  ;;  %vm3570_vm4 = vcmp.ge.f32.partialorder %v3554_v54, 0.0  ;;  %v3586_v61 = vmul.f32 0.1, %v3554_v54  ;;  %v3556_v45 = vadd.f32 %v8793_v42, %v3471_v62 }
 0x454   : > { %v8878_v49 = vmul.f32 %v8871_v38, %v8788_v16  ;;  %vm3573_vm3 = vcmp.ge.f32.partialorder %v3557_v30, 0.0  ;;  %v3589_v21 = vmul.f32 0.1, %v3557_v30  ;;  %v9920_v60 = vrot.slane %v8843_v0, 7 }
 0x455   : > { %v8880_v2 = vsel %vm3570_vm4, %v3554_v54, %v3586_v61  ;;  %vm3572_vm1 = vcmp.ge.f32.partialorder %v3556_v45, 0.0  ;;  %v3588_v15 = vmul.f32 0.1, %v3556_v45  ;;  %v5542_v18 = vpop.f32.mrb[14].mxu1  ;;  %v3680_v61 = vsel %vm7812_vm6, 0.0, %v3679_v19 }
 0x456   : > { %9918 = vst [vmem:[#allocation30_spill] sm:$0xff] %v8880_v2  ;;  %v3699_v40 = vrot.slane %v8880_v2, 1  ;;  %v8886_v62 = vmul.f32 %v8880_v2, %v8788_v16  ;;  %v3559_v63 = vadd.f32 %v5542_v18, %v8793_v42  ;;  %v3481_v44 = vpop.f32.mrb[15].mxu1  ;;  %v8889_v37 = vsel %vm3573_vm3, %v3557_v30, %v3589_v21 }
 0x457   : > { %v8891_v31 = vsel %vm3572_vm1, %v3556_v45, %v3588_v15  ;;  %v3558_v54 = vadd.f32 %v8793_v42, %v3481_v44  ;;  %v8901_v16 = vmul.f32 %v8889_v37, %v8796_v8  ;;  %v3760_v28 = vmul.f32 %v3680_v61, %v8728_v1 }
 0x458   : > { %v3700_v55 = vsel %vm9917_vm10, %v3697_v7, %v3699_v40  ;;  %v8907_v44 = vmul.f32 %v8891_v31, %v8796_v8  ;;  %vm3575_vm4 = vcmp.ge.f32.partialorder %v3559_v63, 0.0  ;;  %v3591_v21 = vmul.f32 0.1, %v3559_v63 }
 0x459   : > { %v5545_v19 = vpop.f32.mrb[16].mxu1  ;;  %vm3574_vm5 = vcmp.ge.f32.partialorder %v3558_v54, 0.0  ;;  %v3590_v7 = vmul.f32 0.1, %v3558_v54  ;;  %v3808_v30 = vmul.f32 %v3698_v59, %v8756_v17  ;;  %v3745_v45 = vsel %vm9891_vm11, 0.0, %v3700_v55 }
 0x45a   : > { %v3561_v15 = vadd.f32 %v5545_v19, %v8793_v42  ;;  %v3491_v18 = vpop.f32.mrb[17].mxu1  ;;  %v8915_v57 = vsel %vm3575_vm4, %v3559_v63, %v3591_v21  ;;  %v3792_v46 = vadd.f32 %v8855_v27, %v3760_v28  ;;  %v3809_v21 = vmul.f32 %v3745_v45, %v8756_v17 }
 0x45b   : > { %v3560_v13 = vadd.f32 %v8793_v42, %v3491_v18  ;;  %v8917_v8 = vsel %vm3574_vm5, %v3558_v54, %v3590_v7  ;;  %v8923_v18 = vmul.f32 %v8915_v57, %v8805_v41  ;;  %v9919_v7 = vrot.slane %v8880_v2, 7 }
 0x45c   : > { %vm3577_vm3 = vcmp.ge.f32.partialorder %v3561_v15, 0.0  ;;  %v3593_v11 = vmul.f32 0.1, %v3561_v15  ;;  %v8929_v63 = vmul.f32 %v8917_v8, %v8805_v41  ;;  %vm9921_vm10 = vcmask 1040384  }
 0x45d   : > { %v5548_v59 = vpop.f32.mrb[18].mxu1  ;;  %vm3576_vm1 = vcmp.ge.f32.partialorder %v3560_v13, 0.0  ;;  %v3592_v19 = vmul.f32 0.1, %v3560_v13  ;;  %v3636_v4 = vsel %vm9921_vm10, %v9920_v60, %v9919_v7  ;;  %vm9923_vm4 = vcmask 1046528  }
 0x45e   : > { %v8931_v55 = vsel %vm3577_vm3, %v3561_v15, %v3593_v11  ;;  %v3501_v54 = vpop.f32.mrb[19].mxu1  ;;  %v3563_v61 = vadd.f32 %v5548_v59, %v8793_v42  ;;  %v3761_v11 = vmul.f32 %v8866_v50, %v8728_v1  ;;  %v9922_v59 = vrot.slane %v8871_v38, 1 }
 0x45f   : > { %v8937_v53 = vmul.f32 %v8931_v55, %v8799_v20  ;;  %v3562_v41 = vadd.f32 %v8793_v42, %v3501_v54  ;;  %v8944_v15 = vsel %vm3576_vm1, %v3560_v13, %v3592_v19  ;;  %v3824_v50 = vadd.f32 %v3808_v30, %v3792_v46 }
 0x460   : > { %v3702_v28 = vsel %vm9923_vm4, %v3699_v40, %v9922_v59  ;;  %v8959_v1 = vmul.f32 %v8944_v15, %v8799_v20  ;;  %vm3579_vm5 = vcmp.ge.f32.partialorder %v3563_v61, 0.0  ;;  %v3595_v17 = vmul.f32 0.1, %v3563_v61 }
 0x461   : > { %v5551_v36 = vpop.f32.mrb[20].mxu1  ;;  %vm3578_vm3 = vcmp.ge.f32.partialorder %v3562_v41, 0.0  ;;  %v3594_v0 = vmul.f32 0.1, %v3562_v41  ;;  %v3793_v60 = vadd.f32 %v8853_v43, %v3761_v11  ;;  %v3682_v40 = vsel %vm7824_vm7, 0.0, %v3636_v4 }
 0x462   : > { %v3511_v13 = vpop.f32.mrb[21].mxu1  ;;  %v3565_v45 = vadd.f32 %v5551_v36, %v8793_v42  ;;  %v3810_v19 = vmul.f32 %v3702_v28, %v8763_v9  ;;  %v8966_v7 = vsel %vm3579_vm5, %v3563_v61, %v3595_v17  ;;  %vm3840_vm1 = vcmp.ge.f32.partialorder %v3824_v50, 0.0 }
 0x463   : > { %v3856_v20 = vmul.f32 0.1, %v3824_v50  ;;  %v8968_v59 = vsel %vm3578_vm3, %v3562_v41, %v3594_v0  ;;  %v8974_v43 = vmul.f32 %v8966_v7, %v8802_v48  ;;  %v3825_v41 = vadd.f32 %v3809_v21, %v3793_v60 }
 0x464   : > { %v8980_v28 = vmul.f32 %v8968_v59, %v8802_v48  ;;  %vm3581_vm10 = vcmp.ge.f32.partialorder %v3565_v45, 0.0  ;;  %v3597_v17 = vmul.f32 0.1, %v3565_v45  ;;  %v3762_v0 = vmul.f32 %v3682_v40, %v8733_v24 }
 0x465   : > { %v5554_v27 = vpop.f32.mrb[22].mxu1  ;;  %v3872_v11 = vsel %vm3840_vm1, %v3824_v50, %v3856_v20  ;;  %v3564_v46 = vadd.f32 %v8793_v42, %v3511_v13  ;;  %vm3841_vm4 = vcmp.ge.f32.partialorder %v3825_v41, 0.0  ;;  %v3857_v30 = vmul.f32 0.1, %v3825_v41 }
 0x466   : > { %v3521_v4 = vpop.f32.mrb[23].mxu1  ;;  %5587 = vmatprep.mubr.f32.mxu0 %v3872_v11  ;;  %v9924_v36 = vrot.slane %v8871_v38, 7  ;;  %v9925_v50 = vrot.slane %v8880_v2, 7  ;;  %vm9926_vm5 = vcmask 1040384   ;;  %v9927_v61 = vrot.slane %v8891_v31, 1 }
 0x467   : > { %v9928_v48 = vrot.slane %v8871_v38, 1  ;;  %vm9929_vm3 = vcmask 1046528   ;;  %v8994_v60 = vsel %vm3581_vm10, %v3565_v45, %v3597_v17  ;;  %v3794_v40 = vadd.f32 %v8886_v62, %v3762_v0 }
 0x468   : > { %v3638_v20 = vsel %vm9926_vm5, %v9925_v50, %v9924_v36  ;;  %vm3580_vm1 = vcmp.ge.f32.partialorder %v3564_v46, 0.0  ;;  %v3596_v13 = vmul.f32 0.1, %v3564_v46  ;;  %v3873_v11 = vsel %vm3841_vm4, %v3825_v41, %v3857_v30  ;;  %vm9932_vm4 = vmmov %vm9926_vm5 }
 0x469   : > { %v3704_v21 = vsel %vm9929_vm3, %v9928_v48, %v9927_v61  ;;  %v3657_v54 = vrot.slane %v8994_v60, 7  ;;  %v3721_v14 = vrot.slane %v8994_v60, 1  ;;  %v9001_v36 = vmul.f32 %v8994_v60, %v8808_v51  ;;  %5588 = vmatmul.mubr.f32.vlgmr.msra.gmra.mrb[20].mxu0 %v3873_v11  ;;  %vm9935_vm5 = vmmov %vm9929_vm3 }
 0x46a   : > { %v3826_v50 = vadd.f32 %v3810_v19, %v3794_v40  ;;  %v9003_v2 = vsel %vm3580_vm1, %v3564_v46, %v3596_v13  ;;  %v3747_v45 = vsel %vm9893_vm2, 0.0, %v3704_v21  ;;  %v3763_v62 = vmul.f32 %v3638_v20, %v8733_v24  ;;  %6286 = vmatpush3.bf16.msra.mxu0 %v8702_v47  ;;  %vm9938_vm3 = vmmov %vm9932_vm4 }
 0x46b   : > { %v3655_v61 = vrot.slane %v9003_v2, 7  ;;  %v3719_v30 = vrot.slane %v9003_v2, 1  ;;  %v9012_v41 = vmul.f32 %v9003_v2, %v8808_v51  ;;  %v3811_v17 = vmul.f32 %v3747_v45, %v8763_v9  ;;  %6288 = vmatprep.subr.bf16.mxu0 %v8834_v35 }
 0x46c   : > { %vm3842_vm10 = vcmp.ge.f32.partialorder %v3826_v50, 0.0  ;;  %v3858_v19 = vmul.f32 0.1, %v3826_v50  ;;  %v3795_v46 = vadd.f32 %v8878_v49, %v3763_v62  ;;  %v3567_v0 = vadd.f32 %v5554_v27, %v8793_v42 }
 0x46d   : > { %v9930_v24 = vrot.slane %v8891_v31, 7  ;;  %v9931_v20 = vrot.slane %v8871_v38, 7  ;;  %v9933_v51 = vrot.slane %v8889_v37, 1  ;;  %v9934_v9 = vrot.slane %v8891_v31, 1 }
 0x46e   : > { %v3566_v21 = vadd.f32 %v8793_v42, %v3521_v4  ;;  %v9936_v49 = vrot.slane %v8889_v37, 7  ;;  %v3874_v13 = vsel %vm3842_vm10, %v3826_v50, %v3858_v19  ;;  %v3827_v11 = vadd.f32 %v3811_v17, %v3795_v46  ;;  %6290 = vmatpush3.bf16.msra.mxu0 %v8834_v35 }
 0x46f   : > { %v3640_v48 = vsel %vm9932_vm4, %v9931_v20, %v9930_v24  ;;  %v3706_v47 = vsel %vm9935_vm5, %v9934_v9, %v9933_v51  ;;  %v9937_v27 = vmov %v9930_v24  ;;  %vm3583_vm1 = vcmp.ge.f32.partialorder %v3567_v0, 0.0  ;;  %5590 = vmatprep.mubr.f32.mxu0 %v3874_v13  ;;  %6292 = vmatprep.subr.bf16.mxu0 %v8839_v29 }
 0x470   : > { %v3642_v40 = vsel %vm9938_vm3, %v9937_v27, %v9936_v49  ;;  %v3599_v45 = vmul.f32 0.1, %v3567_v0  ;;  %v3684_v62 = vsel %vm7828_vm8, 0.0, %v3640_v48  ;;  %v3812_v24 = vmul.f32 %v3706_v47, %v8768_v26 }
 0x471   : > { %vm3582_vm4 = vcmp.ge.f32.partialorder %v3566_v21, 0.0  ;;  %v3598_v20 = vmul.f32 0.1, %v3566_v21  ;;  %vm3843_vm5 = vcmp.ge.f32.partialorder %v3827_v11, 0.0  ;;  %v3859_v42 = vmul.f32 0.1, %v3827_v11 }
 0x472   : > { %v9039_v4 = vsel %vm3583_vm1, %v3567_v0, %v3599_v45  ;;  %v3764_v51 = vmul.f32 %v3684_v62, %v8736_v34  ;;  %v9939_v49 = vrot.slane %v8917_v8, 1  ;;  %v9940_v27 = vrot.slane %v8889_v37, 1  ;;  %6294 = vmatpush3.bf16.msra.mxu0 %v8839_v29 }
 0x473   : > { %v3661_v50 = vrot.slane %v9039_v4, 7  ;;  %v3725_v17 = vrot.slane %v9039_v4, 1  ;;  %v9047_v19 = vmul.f32 %v9039_v4, %v8811_v3  ;;  %v9049_v46 = vsel %vm3582_vm4, %v3566_v21, %v3598_v20  ;;  %6296 = vmatprep.subr.bf16.mxu0 %v8841_v12 }
 0x474   : > { %v3875_v48 = vsel %vm3843_vm5, %v3827_v11, %v3859_v42  ;;  %v3796_v35 = vadd.f32 %v8907_v44, %v3764_v51  ;;  %v3659_v0 = vrot.slane %v9049_v46, 7  ;;  %v3723_v9 = vrot.slane %v9049_v46, 1  ;;  %vm9949_vm5 = vmmov %vm9938_vm3 }
 0x475   : > { %5591 = vmatmul.mubr.f32.gmra.mrb[22].mxu0 %v3875_v48  ;;  %v9056_v47 = vmul.f32 %v9049_v46, %v8811_v3  ;;  %vm9941_vm10 = vcmask 1046528   ;;  %v3765_v21 = vmul.f32 %v3642_v40, %v8736_v34  ;;  %v9942_v11 = vrot.slane %v8917_v8, 7 }
 0x476   : > { %v3708_v13 = vsel %vm9941_vm10, %v9940_v27, %v9939_v49  ;;  %v9943_v44 = vrot.slane %v8889_v37, 7  ;;  %v3828_v62 = vadd.f32 %v3812_v24, %v3796_v35  ;;  %v9944_v42 = vrot.slane %v8915_v57, 1  ;;  %vm9946_vm1 = vmmov %vm9941_vm10  ;;  %6298 = vmatpush3.bf16.msra.mxu0 %v8841_v12 }
 0x477   : > { %v3749_v20 = vsel %vm7938_vm13, 0.0, %v3708_v13  ;;  %v9945_v51 = vmov %v9939_v49  ;;  %v3797_v34 = vadd.f32 %v8901_v16, %v3765_v21  ;;  %v9947_v27 = vrot.slane %v8915_v57, 7  ;;  %vm9952_vm10 = vmmov %vm9946_vm1  ;;  %6300 = vmatprep.subr.bf16.mxu0 %v8846_v25 }
 0x478   : > { %v3644_v45 = vsel %vm9938_vm3, %v9943_v44, %v9942_v11  ;;  %v3710_v48 = vsel %vm9946_vm1, %v9945_v51, %v9944_v42  ;;  %v3813_v40 = vmul.f32 %v3749_v20, %v8768_v26  ;;  %vm3844_vm4 = vcmp.ge.f32.partialorder %v3828_v62, 0.0 }
 0x479   : > { %v3686_v3 = vsel %vm7954_vm14, 0.0, %v3644_v45  ;;  %v3814_v35 = vmul.f32 %v3710_v48, %v8775_v58  ;;  %v3860_v49 = vmul.f32 0.1, %v3828_v62  ;;  %v9948_v13 = vmov %v9942_v11 }
 0x47a   : > { %v3766_v24 = vmul.f32 %v3686_v3, %v8743_v22  ;;  %v3646_v11 = vsel %vm9949_vm5, %v9948_v13, %v9947_v27  ;;  %v9950_v29 = vrot.slane %v8944_v15, 1  ;;  %v9951_v16 = vmov %v9944_v42  ;;  %6302 = vmatpush3.bf16.msra.mxu0 %v8846_v25  ;;  %v9973_v25 = vld [vmem:[#allocation28_spill] sm:$0xff] }
 0x47b   : > { %v3829_v21 = vadd.f32 %v3813_v40, %v3797_v34  ;;  %v3767_v20 = vmul.f32 %v3646_v11, %v8743_v22  ;;  %v3876_v3 = vsel %vm3844_vm4, %v3828_v62, %v3860_v49  ;;  %v9953_v51 = vrot.slane %v8944_v15, 7  ;;  %vm9959_vm4 = vmmov %vm9938_vm3 }
 0x47c   : > { %v3712_v26 = vsel %vm9952_vm10, %v9951_v16, %v9950_v29  ;;  %v3798_v44 = vadd.f32 %v8929_v63, %v3766_v24  ;;  %v9954_v48 = vmov %v9947_v27  ;;  %v9955_v13 = vrot.slane %v8931_v55, 1  ;;  %5593 = vmatprep.mubr.f32.mxu0 %v3876_v3  ;;  %vm9962_vm10 = vmmov %vm9946_vm1 }
 0x47d   : > { %v3751_v45 = vsel %vm7958_vm15, 0.0, %v3712_v26  ;;  %v3648_v27 = vsel %vm9938_vm3, %v9954_v48, %v9953_v51  ;;  %v9956_v34 = vmov %v9950_v29  ;;  %vm3845_vm5 = vcmp.ge.f32.partialorder %v3829_v21, 0.0 }
 0x47e   : > { %v3815_v42 = vmul.f32 %v3751_v45, %v8775_v58  ;;  %v3714_v63 = vsel %vm9946_vm1, %v9956_v34, %v9955_v13  ;;  %v3861_v22 = vmul.f32 0.1, %v3829_v21  ;;  %v3830_v62 = vadd.f32 %v3814_v35, %v3798_v44 }
 0x47f   : > { %v3799_v58 = vadd.f32 %v8923_v18, %v3767_v20  ;;  %v3688_v40 = vsel %vm7832_vm9, 0.0, %v3648_v27  ;;  %v3816_v24 = vmul.f32 %v3714_v63, %v8771_v52  ;;  %v9957_v49 = vrot.slane %v8931_v55, 7 }
 0x480   : > { %v9958_v11 = vmov %v9953_v51  ;;  %v9960_v12 = vrot.slane %v8968_v59, 1  ;;  %v9961_v16 = vmov %v9955_v13  ;;  %v3877_v18 = vsel %vm3845_vm5, %v3829_v21, %v3861_v22  ;;  %v9966_v22 = vld [vmem:[#allocation32_spill] sm:$0xff] }
 0x481   : > { %v3650_v29 = vsel %vm9959_vm4, %v9958_v11, %v9957_v49  ;;  %vm3846_vm3 = vcmp.ge.f32.partialorder %v3830_v62, 0.0  ;;  %v3862_v26 = vmul.f32 0.1, %v3830_v62  ;;  %v3831_v44 = vadd.f32 %v3815_v42, %v3799_v58  ;;  %5594 = vmatmul.mubr.f32.gmra.mrb[24].mxu0 %v3877_v18 }
 0x482   : > { %v3716_v35 = vsel %vm9962_vm10, %v9961_v16, %v9960_v12  ;;  %v3768_v45 = vmul.f32 %v3688_v40, %v8739_v39  ;;  %vm9963_vm1 = vnez %v9804_v33  ;;  %v3769_v3 = vmul.f32 %v3650_v29, %v8739_v39 }
 0x483   : > { %v3753_v20 = vsel %vm9963_vm1, 0.0, %v3716_v35  ;;  %v9964_v51 = vrot.slane %v8968_v59, 7  ;;  %v9965_v48 = vmov %v9957_v49  ;;  %v3878_v13 = vsel %vm3846_vm3, %v3830_v62, %v3862_v26  ;;  %v9971_v49 = vld [vmem:[#allocation42_spill] sm:$0xff] }
 0x484   : > { %vm3847_vm10 = vcmp.ge.f32.partialorder %v3831_v44, 0.0  ;;  %v3863_v21 = vmul.f32 0.1, %v3831_v44  ;;  %v3817_v34 = vmul.f32 %v3753_v20, %v8771_v52  ;;  %5596 = vmatprep.mubr.f32.mxu0 %v3878_v13  ;;  %v3800_v42 = vadd.f32 %v8959_v1, %v3768_v45  ;;  %6304 = vmatprep.subr.bf16.mxu0 %v9971_v49  ;;  %v9972_v52 = vld [vmem:[#allocation23_spill] sm:$0xff] }
 0x485   : > { %v3652_v27 = vsel %vm9959_vm4, %v9965_v48, %v9964_v51  ;;  %v3801_v63 = vadd.f32 %v8937_v53, %v3769_v3  ;;  %vm9967_vm5 = vnez %v9966_v22  ;;  %v9968_v58 = vrot.slane %v8966_v7, 1  ;;  %v9978_v3 = vld [vmem:[#allocation35_spill] sm:$0xff]  ;;  %6306 = vmatpush3.bf16.msra.mxu0 %v9971_v49 }
 0x486   : > { %v3690_v39 = vsel %vm9967_vm5, 0.0, %v3652_v27  ;;  %v9969_v40 = vmov %v9960_v12  ;;  %vm9970_vm4 = vcmask 1046528   ;;  %v3879_v11 = vsel %vm3847_vm10, %v3831_v44, %v3863_v21 }
 0x487   : > { %v3718_v62 = vsel %vm9970_vm4, %v9969_v40, %v9968_v58  ;;  %v3770_v29 = vmul.f32 %v3690_v39, %v9972_v52  ;;  %v9974_v1 = vrot.slane %v8966_v7, 7  ;;  %v9975_v53 = vmov %v9964_v51  ;;  %5597 = vmatmul.mubr.f32.gmra.mrb[26].mxu0 %v3879_v11 }
 0x488   : > { %v3818_v12 = vmul.f32 %v3718_v62, %v9973_v25  ;;  %vm9976_vm3 = vcmask 1040384   ;;  %v3832_v35 = vadd.f32 %v3816_v24, %v3800_v42  ;;  %v3833_v18 = vadd.f32 %v3817_v34, %v3801_v63  ;;  %v9982_v63 = vld [vmem:[#allocation37_spill] sm:$0xff]  ;;  %v9984_v62 = vld [vmem:[#allocation26_spill] sm:$0xff] }
 0x489   : > { %v3654_v16 = vsel %vm9976_vm3, %v9975_v53, %v9974_v1  ;;  %v9977_v26 = vmov %v9968_v58  ;;  %v3802_v20 = vadd.f32 %v8980_v28, %v3770_v29  ;;  %v9979_v48 = vmov %v9974_v1  ;;  %vm9980_vm10 = vmmov %vm9976_vm3 }
 0x48a   : > { %v3720_v45 = vsel %vm9970_vm4, %v9977_v26, %v3719_v30  ;;  %v3771_v44 = vmul.f32 %v3654_v16, %v9972_v52  ;;  %v3656_v24 = vsel %vm9980_vm10, %v9979_v48, %v3655_v61  ;;  %vm9981_vm3 = vmmov %vm9970_vm4  ;;  %vm3848_vm4 = vcmp.ge.f32.partialorder %v3832_v35, 0.0  ;;  %v9985_v52 = vld [vmem:[#allocation31_spill] sm:$0xff] }
 0x48b   : > { %v3755_v51 = vsel %vm9895_vm12, 0.0, %v3720_v45  ;;  %v3722_v27 = vsel %vm9981_vm3, %v3719_v30, %v3721_v14  ;;  %v3864_v13 = vmul.f32 0.1, %v3832_v35  ;;  %vm3849_vm1 = vcmp.ge.f32.partialorder %v3833_v18, 0.0  ;;  %v9990_v45 = vld [vmem:[#allocation45_spill] sm:$0xff] }
 0x48c   : > { %v3865_v28 = vmul.f32 0.1, %v3833_v18  ;;  %v3834_v21 = vadd.f32 %v3818_v12, %v3802_v20  ;;  %v3803_v34 = vadd.f32 %v8974_v43, %v3771_v44  ;;  %v3819_v42 = vmul.f32 %v3755_v51, %v9973_v25  ;;  %v9993_v51 = vld [vmem:[#allocation17_spill] sm:$0xff] }
 0x48d   : > { %vm9983_vm12 = vnez %v9982_v63  ;;  %v3880_v58 = vsel %vm3848_vm4, %v3832_v35, %v3864_v13  ;;  %v3820_v30 = vmul.f32 %v3722_v27, %v9985_v52  ;;  %vm9986_vm3 = vcmask 1040384   ;;  %v9989_v35 = vld [vmem:[#allocation39_spill] sm:$0xff]  ;;  %v9995_v13 = vld [vmem:[#allocation33_spill] sm:$0xff] }
 0x48e   : > { %v3692_v39 = vsel %vm9983_vm12, 0.0, %v3656_v24  ;;  %v3881_v40 = vsel %vm3849_vm1, %v3833_v18, %v3865_v28  ;;  %5599 = vmatprep.mubr.f32.mxu0 %v3880_v58  ;;  %vm3850_vm10 = vcmp.ge.f32.partialorder %v3834_v21, 0.0  ;;  %v3866_v49 = vmul.f32 0.1, %v3834_v21  ;;  %vm9988_vm4 = vmmov %vm9986_vm3 }
 0x48f   : > { %v3772_v11 = vmul.f32 %v3692_v39, %v9984_v62  ;;  %v3835_v29 = vadd.f32 %v3819_v42, %v3803_v34  ;;  %v3658_v43 = vsel %vm9986_vm3, %v3655_v61, %v3657_v54  ;;  %5600 = vmatmul.mubr.f32.gmra.mrb[28].mxu0 %v3881_v40  ;;  %vm9987_vm1 = vcmask 1046528   ;;  %v9997_v42 = vld [vmem:[#allocation24_spill] sm:$0xff] }
 0x490   : > { %v3724_v12 = vsel %vm9987_vm1, %v3721_v14, %v3723_v9  ;;  %v3773_v1 = vmul.f32 %v3658_v43, %v9984_v62  ;;  %v3660_v53 = vsel %vm9988_vm4, %v3657_v54, %v3659_v0  ;;  %v3882_v16 = vsel %vm3850_vm10, %v3834_v21, %v3866_v49  ;;  %vm9992_vm10 = vmmov %vm9987_vm1  ;;  %v10001_v49 = vld [vmem:[#allocation41_spill] sm:$0xff]  ;;  %v10002_v43 = vld [vmem:[#allocation36_spill] sm:$0xff] }
 0x491   : > { %v3804_v25 = vadd.f32 %v9012_v41, %v3772_v11  ;;  %vm3851_vm15 = vcmp.ge.f32.partialorder %v3835_v29, 0.0  ;;  %v3867_v61 = vmul.f32 0.1, %v3835_v29  ;;  %v3757_v41 = vsel %vm9896_vm0, 0.0, %v3724_v12  ;;  %5602 = vmatprep.mubr.f32.mxu0 %v3882_v16  ;;  %vm9994_vm1 = vmmov %vm9988_vm4  ;;  %v10004_v16 = vld [vmem:[#allocation38_spill] sm:$0xff] }
 0x492   : > { %v3805_v26 = vadd.f32 %v9001_v36, %v3773_v1  ;;  %v3821_v14 = vmul.f32 %v3757_v41, %v9985_v52  ;;  %vm9991_vm3 = vnez %v9990_v45  ;;  %v3726_v54 = vsel %vm9992_vm10, %v3723_v9, %v3725_v17 }
 0x493   : > { %v3836_v18 = vadd.f32 %v3820_v30, %v3804_v25  ;;  %v3694_v44 = vsel %vm9991_vm3, 0.0, %v3660_v53  ;;  %v3883_v20 = vsel %vm3851_vm15, %v3835_v29, %v3867_v61  ;;  %v3662_v36 = vsel %vm9994_vm1, %v3659_v0, %v3661_v50  ;;  %vm9996_vm15 = vmmov %vm9992_vm10  ;;  %v9998_v0 = vld [vmem:[#allocation15_spill] sm:$0xff]  ;;  %v10003_v53 = vld [vmem:[#allocation25_spill] sm:$0xff] }
 0x494   : > { %v3774_v48 = vmul.f32 %v3694_v44, %v9993_v51  ;;  %5603 = vmatmul.mubr.f32.gmra.mrb[30].mxu0 %v3883_v20  ;;  %v3837_v27 = vadd.f32 %v3821_v14, %v3805_v26  ;;  %v3822_v28 = vmul.f32 %v3726_v54, %v9995_v13  ;;  %v3743_v9 = vsel %vm9996_vm15, %v3725_v17, 0.0  ;;  %v10000_v17 = vld [vmem:[#allocation30_spill] sm:$0xff]  ;;  %v4314_v44 = vld [vmem:[#allocation4 + $0x260] sm:$0xff]  ;;  %v4315_v20 = vld [vmem:[#allocation4 + $0x268] sm:$0xff] }
 0x495   : > { %vm3852_vm4 = vcmp.ge.f32.partialorder %v3836_v18, 0.0  ;;  %v3868_v24 = vmul.f32 0.1, %v3836_v18  ;;  %v3775_v34 = vmul.f32 %v3662_v36, %v9993_v51  ;;  %v9221_v39 = vmul.f32 %v8871_v38, %v9997_v42  ;;  %v4317_v51 = vld [vmem:[#allocation4 + $0x278] sm:$0xff]  ;;  %v4286_v36 = vld [vmem:[#allocation4 + $0x188] sm:$0xff] }
 0x496   : > { %v3806_v21 = vadd.f32 %v9056_v47, %v3774_v48  ;;  %vm3853_vm10 = vcmp.ge.f32.partialorder %v3837_v27, 0.0  ;;  %v3869_v50 = vmul.f32 0.1, %v3837_v27  ;;  %vm9999_vm1 = vnez %v9998_v0 }
 0x497   : > { %v3884_v58 = vsel %vm3852_vm4, %v3836_v18, %v3868_v24  ;;  %v3759_v40 = vsel %vm9999_vm1, 0.0, %v3743_v9  ;;  %v3807_v47 = vadd.f32 %v9047_v19, %v3775_v34  ;;  %v9229_v52 = vmul.f32 %v10000_v17, %v9997_v42  ;;  %v10005_v18 = vld [vmem:[#allocation27_spill] sm:$0xff]  ;;  %v10008_v34 = vld [vmem:[#allocation40_spill] sm:$0xff] }
 0x498   : > { %5605 = vmatprep.mubr.f32.mxu0 %v3884_v58  ;;  %v3838_v62 = vadd.f32 %v3822_v28, %v3806_v21  ;;  %v3823_v11 = vmul.f32 %v3759_v40, %v9995_v13  ;;  %v3885_v30 = vsel %vm3853_vm10, %v3837_v27, %v3869_v50  ;;  %v9233_v38 = vmul.f32 %v8889_v37, %v10001_v49  ;;  %v10007_v21 = vld [vmem:[#allocation29_spill] sm:$0xff]  ;;  %v4287_v50 = vld [vmem:[#allocation4 + $0x190] sm:$0xff]  ;;  %v4288_v40 = vld [vmem:[#allocation4 + $0x198] sm:$0xff] }
 0x499   : > { %v9237_v29 = vmul.f32 %v8891_v31, %v10001_v49  ;;  %v9241_v25 = vmul.f32 %v8915_v57, %v10002_v43  ;;  %5606 = vmatmul.mubr.f32.gmra.mrb[32].mxu0 %v3885_v30  ;;  %v9245_v1 = vmul.f32 %v8917_v8, %v10002_v43  ;;  %v9249_v37 = vmul.f32 %v8931_v55, %v10003_v53 }
 0x49a   : > { %vm3854_vm4 = vcmp.ge.f32.partialorder %v3838_v62, 0.0  ;;  %v3870_v19 = vmul.f32 0.1, %v3838_v62  ;;  %v3839_v12 = vadd.f32 %v3823_v11, %v3807_v47  ;;  %v9253_v31 = vmul.f32 %v8944_v15, %v10003_v53  ;;  %v10006_v15 = vld [vmem:[#allocation43_spill] sm:$0xff]  ;;  %v4289_v53 = vld [vmem:[#allocation4 + $0x1a0] sm:$0xff] }
 0x49b   : > { %v9257_v57 = vmul.f32 %v8966_v7, %v10004_v16  ;;  %v9261_v61 = vmul.f32 %v8968_v59, %v10004_v16  ;;  %v9265_v26 = vmul.f32 %v8994_v60, %v10005_v18  ;;  %v9269_v55 = vmul.f32 %v9003_v2, %v10005_v18  ;;  %v4316_v60 = vld [vmem:[#allocation4 + $0x270] sm:$0xff]  ;;  %v4285_v2 = vld [vmem:[#allocation4 + $0x180] sm:$0xff]  ;;  %v4290_v16 = vld [vmem:[#allocation4 + $0x1a8] sm:$0xff] }
 0x49c   : > { %v3886_v41 = vsel %vm3854_vm4, %v3838_v62, %v3870_v19  ;;  %vm3855_vm15 = vcmp.ge.f32.partialorder %v3839_v12, 0.0  ;;  %v3871_v8 = vmul.f32 0.1, %v3839_v12  ;;  %v9273_v7 = vmul.f32 %v9039_v4, %v10006_v15 }
 0x49d   : > { %5608 = vmatprep.mubr.f32.mxu0 %v3886_v41  ;;  %v9277_v59 = vmul.f32 %v9049_v46, %v10006_v15  ;;  %v6307_v54 = vpack.c.bf16 %v4315_v20, %v4314_v44  ;;  %v6311_v48 = vpack.c.bf16 %v4317_v51, %v4316_v60  ;;  %v6315_v4 = vpack.c.bf16 %v4286_v36, %v4285_v2  ;;  %v9282_v46 = vld [vmem:[%s9579_s6 + $0x2] ss:$0 sm:$0xff]  ;;  %v4291_v51 = vld [vmem:[#allocation4 + $0x1b0] sm:$0xff] }
 0x49e   : > { %v3887_v14 = vsel %vm3855_vm15, %v3839_v12, %v3871_v8  ;;  %v6319_v30 = vpack.c.bf16 %v4288_v40, %v4287_v50  ;;  %vm10009_vm15 = vcmask 1040384   ;;  %v6323_v20 = vpack.c.bf16 %v4290_v16, %v4289_v53 }
 0x49f   : > { %5609 = vmatmul.mubr.f32.gmra.mrb[34].mxu0 %v3887_v14  ;;  %6308 = vmatprep.subr.bf16.mxu0 %v6307_v54 }
 0x4a0   : > { %6310 = vmatpush3.bf16.msra.mxu0 %v6307_v54 }
 0x4a1   : > { %6312 = vmatprep.subr.bf16.mxu0 %v6311_v48 }
 0x4a4   : > { %6314 = vmatpush3.bf16.msra.mxu0 %v6311_v48  ;;  %v4292_v48 = vld [vmem:[#allocation4 + $0x1b8] sm:$0xff] }
 0x4a5   : > { %6316 = vmatprep.subr.bf16.mxu0 %v6315_v4 }
 0x53c   : > { %v5589_v24 = vpop.f32.mrb[20].mxu0 }
 0x53d   : > { %v3985_v27 = vadd.f32 %v5589_v24, %v9282_v46  ;;  %v3979_v13 = vpop.f32.mrb[21].mxu0 }
 0x53e   : > { %v3980_v28 = vadd.f32 %v9282_v46, %v3979_v13 }
 0x53f   : > { %v4075_v9 = vadd.f32 %v10007_v21, %v3985_v27 }
 0x540   : > { %v4074_v42 = vadd.f32 %v10008_v34, %v3980_v28 }
 0x541   : > { %vm4091_vm10 = vcmp.ge.f32.partialorder %v4075_v9, 0.0  ;;  %v4107_v58 = vmul.f32 0.1, %v4075_v9 }
 0x542   : > { %vm4090_vm4 = vcmp.ge.f32.partialorder %v4074_v42, 0.0  ;;  %v4106_v62 = vmul.f32 0.1, %v4074_v42 }
 0x543   : > { %v4123_v47 = vsel %vm4091_vm10, %v4075_v9, %v4107_v58  ;;  %vm10010_vm10 = vcmask 1046528   ;;  %v4294_v9 = vld [vmem:[#allocation4 + $0x1c8] sm:$0xff] }
 0x544   : > { %v9288_v11 = vsel %vm4090_vm4, %v4074_v42, %v4106_v62  ;;  %v4157_v17 = vrot.slane %v4123_v47, 7  ;;  %v4221_v49 = vrot.slane %v4123_v47, 1 }
 0x545   : > { %v4156_v19 = vrot.slane %v9288_v11, 7  ;;  %v4220_v12 = vrot.slane %v9288_v11, 1  ;;  %5643 = vmatprep.mubr.f32.mxu0 %v9288_v11  ;;  %v4613_v11 = vld [vmem:[#allocation4 + $0x2a0] sm:$0xff] }
 0x546   : > { %5644 = vmatmul.mubr.f32.vlgmr.msra.gmra.mrb[36].mxu0 %v4123_v47 }
 0x547   : > { %6318 = vmatpush3.bf16.msra.mxu0 %v6315_v4  ;;  %v9298_v15 = vsel %vm10009_vm15, %v4156_v19, %v4157_v17  ;;  %v9301_v14 = vsel %vm10010_vm10, %v4220_v12, %v4221_v49 }
 0x548   : > { %v5592_v43 = vpop.f32.mrb[22].mxu0  ;;  %6320 = vmatprep.subr.bf16.mxu0 %v6319_v30 }
 0x549   : > { %v3995_v41 = vadd.f32 %v5592_v43, %v9282_v46  ;;  %v3989_v8 = vpop.f32.mrb[23].mxu0 }
 0x54a   : > { %v3990_v18 = vadd.f32 %v9282_v46, %v3989_v8  ;;  %v4295_v8 = vld [vmem:[#allocation4 + $0x1d0] sm:$0xff] }
 0x54b   : > { %v4077_v44 = vadd.f32 %v9221_v39, %v3995_v41  ;;  %6322 = vmatpush3.bf16.msra.mxu0 %v6319_v30  ;;  %v6327_v39 = vpack.c.bf16 %v4292_v48, %v4291_v51 }
 0x54c   : > { %v4076_v54 = vadd.f32 %v9229_v52, %v3990_v18  ;;  %6324 = vmatprep.subr.bf16.mxu0 %v6323_v20  ;;  %v4293_v52 = vld [vmem:[#allocation4 + $0x1c0] sm:$0xff] }
 0x54d   : > { %vm4093_vm4 = vcmp.ge.f32.partialorder %v4077_v44, 0.0  ;;  %v4109_v60 = vmul.f32 0.1, %v4077_v44  ;;  %v6331_v30 = vpack.c.bf16 %v4294_v9, %v4293_v52 }
 0x54e   : > { %vm4092_vm1 = vcmp.ge.f32.partialorder %v4076_v54, 0.0  ;;  %v4108_v2 = vmul.f32 0.1, %v4076_v54 }
 0x54f   : > { %v9305_v36 = vsel %vm4093_vm4, %v4077_v44, %v4109_v60  ;;  %6326 = vmatpush3.bf16.msra.mxu0 %v6323_v20  ;;  %vm10013_vm4 = vmmov %vm10010_vm10  ;;  %v4298_v60 = vld [vmem:[#allocation4 + $0x1e8] sm:$0xff] }
 0x550   : > { %v4124_v4 = vsel %vm4092_vm1, %v4076_v54, %v4108_v2  ;;  %v4161_v24 = vrot.slane %v9305_v36, 7  ;;  %v4225_v27 = vrot.slane %v9305_v36, 1  ;;  %vm10011_vm1 = vmmov %vm10009_vm15  ;;  %6328 = vmatprep.subr.bf16.mxu0 %v6327_v39  ;;  %v4297_v54 = vld [vmem:[#allocation4 + $0x1e0] sm:$0xff] }
 0x551   : > { %v4159_v28 = vrot.slane %v4124_v4, 7  ;;  %v4223_v21 = vrot.slane %v4124_v4, 1  ;;  %5646 = vmatprep.mubr.f32.mxu0 %v4124_v4  ;;  %vm10012_vm15 = vmmov %vm10011_vm1 }
 0x552   : > { %5647 = vmatmul.mubr.f32.gmra.mrb[38].mxu0 %v9305_v36  ;;  %v4610_v36 = vld [vmem:[#allocation4 + $0x288] sm:$0xff] }
 0x553   : > { %v9313_v50 = vsel %vm10011_vm1, %v4157_v17, %v4159_v28  ;;  %v9316_v40 = vsel %vm10012_vm15, %v4159_v28, %v4161_v24  ;;  %v9319_v62 = vsel %vm10010_vm10, %v4221_v49, %v4223_v21  ;;  %v9325_v43 = vsel %vm10013_vm4, %v4223_v21, %v4225_v27  ;;  %v4296_v49 = vld [vmem:[#allocation4 + $0x1d8] sm:$0xff]  ;;  %6330 = vmatpush3.bf16.msra.mxu0 %v6327_v39 }
 0x554   : > { %v5595_v13 = vpop.f32.mrb[24].mxu0  ;;  %6332 = vmatprep.subr.bf16.mxu0 %v6331_v30  ;;  %v6335_v2 = vpack.c.bf16 %v4296_v49, %v4295_v8 }
 0x555   : > { %v4005_v34 = vadd.f32 %v5595_v13, %v9282_v46  ;;  %v3999_v42 = vpop.f32.mrb[25].mxu0 }
 0x556   : > { %v4000_v58 = vadd.f32 %v9282_v46, %v3999_v42 }
 0x557   : > { %v4079_v47 = vadd.f32 %v9233_v38, %v4005_v34  ;;  %6334 = vmatpush3.bf16.msra.mxu0 %v6331_v30 }
 0x558   : > { %v4078_v12 = vadd.f32 %v9237_v29, %v4000_v58  ;;  %v4300_v58 = vld [vmem:[#allocation4 + $0x1f8] sm:$0xff]  ;;  %6336 = vmatprep.subr.bf16.mxu0 %v6335_v2 }
 0x559   : > { %vm4095_vm1 = vcmp.ge.f32.partialorder %v4079_v47, 0.0  ;;  %v4111_v41 = vmul.f32 0.1, %v4079_v47 }
 0x55a   : > { %v5598_v53 = vpop.f32.mrb[26].mxu0  ;;  %vm4094_vm15 = vcmp.ge.f32.partialorder %v4078_v12, 0.0  ;;  %v4110_v38 = vmul.f32 0.1, %v4078_v12 }
 0x55b   : > { %v4015_v17 = vadd.f32 %v5598_v53, %v9282_v46  ;;  %v4009_v16 = vpop.f32.mrb[27].mxu0  ;;  %v4127_v20 = vsel %vm4095_vm1, %v4079_v47, %v4111_v41  ;;  %vm10014_vm1 = vcmask 1040384   ;;  %6338 = vmatpush3.bf16.msra.mxu0 %v6335_v2 }
 0x55c   : > { %v4010_v18 = vadd.f32 %v9282_v46, %v4009_v16  ;;  %v4126_v51 = vsel %vm4094_vm15, %v4078_v12, %v4110_v38  ;;  %v4165_v48 = vrot.slane %v4127_v20, 7  ;;  %v4229_v52 = vrot.slane %v4127_v20, 1  ;;  %vm10015_vm15 = vmmov %vm10014_vm1 }
 0x55d   : > { %v4081_v44 = vadd.f32 %v9241_v25, %v4015_v17  ;;  %v4163_v4 = vrot.slane %v4126_v51, 7  ;;  %v4227_v13 = vrot.slane %v4126_v51, 1  ;;  %5649 = vmatprep.mubr.f32.mxu0 %v4126_v51  ;;  %v6339_v25 = vpack.c.bf16 %v4298_v60, %v4297_v54  ;;  %vm10018_vm0 = vmmov %vm10015_vm15 }
 0x55e   : > { %v4080_v29 = vadd.f32 %v9245_v1, %v4010_v18  ;;  %5650 = vmatmul.mubr.f32.gmra.mrb[40].mxu0 %v4127_v20  ;;  %v4299_v1 = vld [vmem:[#allocation4 + $0x1f0] sm:$0xff] }
 0x55f   : > { %vm4097_vm10 = vcmp.ge.f32.partialorder %v4081_v44, 0.0  ;;  %v4113_v28 = vmul.f32 0.1, %v4081_v44  ;;  %v9336_v47 = vsel %vm10014_vm1, %v4161_v24, %v4163_v4  ;;  %v9339_v12 = vsel %vm10015_vm15, %v4163_v4, %v4165_v48  ;;  %6340 = vmatprep.subr.bf16.mxu0 %v6339_v25 }
 0x560   : > { %vm4096_vm4 = vcmp.ge.f32.partialorder %v4080_v29, 0.0  ;;  %v4112_v39 = vmul.f32 0.1, %v4080_v29  ;;  %6342 = vmatpush3.bf16.msra.mxu0 %v6339_v25 }
 0x561   : > { %v9333_v42 = vsel %vm4097_vm10, %v4081_v44, %v4113_v28  ;;  %vm10016_vm10 = vcmask 1046528   ;;  %v6343_v44 = vpack.c.bf16 %v4300_v58, %v4299_v1 }
 0x562   : > { %v5601_v21 = vpop.f32.mrb[28].mxu0  ;;  %v4128_v17 = vsel %vm4096_vm4, %v4080_v29, %v4112_v39  ;;  %v4169_v16 = vrot.slane %v9333_v42, 7  ;;  %v4233_v41 = vrot.slane %v9333_v42, 1  ;;  %v9348_v24 = vsel %vm10016_vm10, %v4225_v27, %v4227_v13  ;;  %vm10017_vm4 = vmmov %vm10016_vm10  ;;  %v4609_v29 = vld [vmem:[#allocation4 + $0x280] sm:$0xff] }
 0x563   : > { %v4025_v9 = vadd.f32 %v5601_v21, %v9282_v46  ;;  %v4019_v34 = vpop.f32.mrb[29].mxu0  ;;  %v4167_v49 = vrot.slane %v4128_v17, 7  ;;  %v4231_v30 = vrot.slane %v4128_v17, 1  ;;  %5652 = vmatprep.mubr.f32.mxu0 %v4128_v17  ;;  %v9353_v20 = vsel %vm10017_vm4, %v4227_v13, %v4229_v52  ;;  %vm10019_vm13 = vmmov %vm10017_vm4  ;;  %6344 = vmatprep.subr.bf16.mxu0 %v6343_v44 }
 0x564   : > { %v4020_v53 = vadd.f32 %v9282_v46, %v4019_v34  ;;  %5653 = vmatmul.mubr.f32.gmra.mrb[42].mxu0 %v9333_v42  ;;  %v9371_v34 = vpack.c.bf16 %v4610_v36, %v4609_v29 }
 0x565   : > { %v4083_v8 = vadd.f32 %v9249_v37, %v4025_v9  ;;  %v9357_v27 = vsel %vm10015_vm15, %v4165_v48, %v4167_v49  ;;  %v9361_v4 = vsel %vm10018_vm0, %v4167_v49, %v4169_v16  ;;  %v9365_v21 = vsel %vm10017_vm4, %v4229_v52, %v4231_v30  ;;  %6346 = vmatpush3.bf16.msra.mxu0 %v6343_v44 }
 0x566   : > { %v4082_v18 = vadd.f32 %v9253_v31, %v4020_v53  ;;  %v9368_v2 = vsel %vm10019_vm13, %v4231_v30, %v4233_v41  ;;  %6348 = vmatprep.subr.bf16.mxu0 %v9371_v34 }
 0x567   : > { %v5604_v38 = vpop.f32.mrb[30].mxu0  ;;  %vm4099_vm1 = vcmp.ge.f32.partialorder %v4083_v8, 0.0  ;;  %v4115_v60 = vmul.f32 0.1, %v4083_v8 }
 0x568   : > { %v4035_v54 = vadd.f32 %v5604_v38, %v9282_v46  ;;  %v4029_v37 = vpop.f32.mrb[31].mxu0  ;;  %vm4098_vm10 = vcmp.ge.f32.partialorder %v4082_v18, 0.0  ;;  %v4114_v51 = vmul.f32 0.1, %v4082_v18 }
 0x569   : > { %v4030_v31 = vadd.f32 %v9282_v46, %v4029_v37  ;;  %v4131_v28 = vsel %vm4099_vm1, %v4083_v8, %v4115_v60  ;;  %vm10020_vm1 = vmmov %vm10015_vm15 }
 0x56a   : > { %v4085_v13 = vadd.f32 %v9257_v57, %v4035_v54  ;;  %v4130_v39 = vsel %vm4098_vm10, %v4082_v18, %v4114_v51  ;;  %v4173_v9 = vrot.slane %v4131_v28, 7  ;;  %v4237_v17 = vrot.slane %v4131_v28, 1  ;;  %vm10021_vm15 = vmmov %vm10020_vm1 }
 0x56b   : > { %v4084_v48 = vadd.f32 %v9261_v61, %v4030_v31  ;;  %v4171_v1 = vrot.slane %v4130_v39, 7  ;;  %v4235_v58 = vrot.slane %v4130_v39, 1  ;;  %5655 = vmatprep.mubr.f32.mxu0 %v4130_v39  ;;  %vm10022_vm10 = vmmov %vm10017_vm4 }
 0x56c   : > { %v5607_v42 = vpop.f32.mrb[32].mxu0  ;;  %vm4101_vm0 = vcmp.ge.f32.partialorder %v4085_v13, 0.0  ;;  %v4117_v53 = vmul.f32 0.1, %v4085_v13  ;;  %5656 = vmatmul.mubr.f32.gmra.mrb[44].mxu0 %v4131_v28 }
 0x56d   : > { %v4045_v57 = vadd.f32 %v5607_v42, %v9282_v46  ;;  %v4039_v52 = vpop.f32.mrb[33].mxu0  ;;  %vm4100_vm13 = vcmp.ge.f32.partialorder %v4084_v48, 0.0  ;;  %v4116_v8 = vmul.f32 0.1, %v4084_v48  ;;  %v9376_v30 = vsel %vm10020_vm1, %v4169_v16, %v4171_v1 }
 0x56e   : > { %v4040_v61 = vadd.f32 %v9282_v46, %v4039_v52  ;;  %v4133_v49 = vsel %vm4101_vm0, %v4085_v13, %v4117_v53  ;;  %v9379_v18 = vsel %vm10021_vm15, %v4171_v1, %v4173_v9  ;;  %v9384_v36 = vsel %vm10022_vm10, %v4233_v41, %v4235_v58  ;;  %vm10023_vm0 = vmmov %vm10022_vm10 }
 0x56f   : > { %v4087_v38 = vadd.f32 %v9265_v26, %v4045_v57  ;;  %v4132_v25 = vsel %vm4100_vm13, %v4084_v48, %v4116_v8  ;;  %v4177_v54 = vrot.slane %v4133_v49, 7  ;;  %v4241_v51 = vrot.slane %v4133_v49, 1  ;;  %vm10024_vm15 = vmmov %vm10020_vm1 }
 0x570   : > { %v4086_v37 = vadd.f32 %v9269_v55, %v4040_v61  ;;  %v4175_v60 = vrot.slane %v4132_v25, 7  ;;  %v4239_v29 = vrot.slane %v4132_v25, 1  ;;  %5658 = vmatprep.mubr.f32.mxu0 %v4132_v25  ;;  %v9388_v26 = vsel %vm10023_vm0, %v4235_v58, %v4237_v17  ;;  %vm10025_vm10 = vmmov %vm10023_vm0 }
 0x571   : > { %5659 = vmatmul.mubr.f32.gmra.mrb[46].mxu0 %v4133_v49  ;;  %vm4103_vm4 = vcmp.ge.f32.partialorder %v4087_v38, 0.0  ;;  %v4119_v16 = vmul.f32 0.1, %v4087_v38  ;;  %vm10028_vm2 = vmmov %vm10023_vm0 }
 0x572   : > { %v5610_v31 = vpop.f32.mrb[34].mxu0  ;;  %vm4102_vm13 = vcmp.ge.f32.partialorder %v4086_v37, 0.0  ;;  %v4118_v28 = vmul.f32 0.1, %v4086_v37  ;;  %v9392_v44 = vsel %vm10020_vm1, %v4173_v9, %v4175_v60  ;;  %v9396_v39 = vsel %vm10024_vm15, %v4175_v60, %v4177_v54 }
 0x573   : > { %v4055_v13 = vadd.f32 %v5610_v31, %v9282_v46  ;;  %v4049_v55 = vpop.f32.mrb[35].mxu0  ;;  %v4135_v48 = vsel %vm4103_vm4, %v4087_v38, %v4119_v16  ;;  %v9399_v42 = vsel %vm10025_vm10, %v4237_v17, %v4239_v29  ;;  %v9404_v9 = vsel %vm10023_vm0, %v4239_v29, %v4241_v51  ;;  %vm10026_vm10 = vmmov %vm10024_vm15 }
 0x574   : > { %v4050_v41 = vadd.f32 %v9282_v46, %v4049_v55  ;;  %v4134_v58 = vsel %vm4102_vm13, %v4086_v37, %v4118_v28  ;;  %v4181_v53 = vrot.slane %v4135_v48, 7  ;;  %v4245_v57 = vrot.slane %v4135_v48, 1  ;;  %vm10027_vm13 = vmmov %vm10023_vm0  ;;  %v6502_v55 = vld [vmem:[%s7770_s19 + $0x48] sm:$0xff] }
 0x575   : > { %v4089_v1 = vadd.f32 %v9273_v7, %v4055_v13  ;;  %v4179_v8 = vrot.slane %v4134_v58, 7  ;;  %v4243_v61 = vrot.slane %v4134_v58, 1  ;;  %5661 = vmatprep.mubr.f32.mxu0 %v4134_v58  ;;  %v4611_v13 = vld [vmem:[#allocation4 + $0x290] sm:$0xff]  ;;  %vm10029_vm0 = vmmov %vm10026_vm10 }
 0x576   : > { %v4088_v52 = vadd.f32 %v9277_v59, %v4050_v41  ;;  %5662 = vmatmul.mubr.f32.gmra.mrb[48].mxu0 %v4135_v48 }
 0x577   : > { %vm4105_vm4 = vcmp.ge.f32.partialorder %v4089_v1, 0.0  ;;  %v4121_v46 = vmul.f32 0.1, %v4089_v1  ;;  %v4180_v17 = vsel %vm10024_vm15, %v4177_v54, %v4179_v8  ;;  %v4182_v7 = vsel %vm10026_vm10, %v4179_v8, %v4181_v53  ;;  %v4612_v54 = vld [vmem:[#allocation4 + $0x298] sm:$0xff]  ;;  %vm10034_vm15 = vmmov %vm10027_vm13 }
 0x578   : > { %vm4104_vm1 = vcmp.ge.f32.partialorder %v4088_v52, 0.0  ;;  %v4120_v49 = vmul.f32 0.1, %v4088_v52  ;;  %v9411_v25 = vsel %vm10027_vm13, %v4241_v51, %v4243_v61  ;;  %v9414_v59 = vsel %vm10028_vm2, %v4243_v61, %v4245_v57  ;;  %vm10031_vm2 = vmneg %vm7812_vm6  ;;  %v4616_v8 = vld [vmem:[#allocation4 + $0x2b8] sm:$0xff]  ;;  %v4618_v61 = vld [vmem:[#allocation4 + $0x2c8] sm:$0xff] }
 0x579   : > { %v9408_v38 = vsel %vm4105_vm4, %v4089_v1, %v4121_v46  ;;  %v4203_v51 = vsel %vm10029_vm0, 0.0, %v4156_v19  ;;  %vm10032_vm4 = vmmov %vm10029_vm0  ;;  %v6351_v58 = vpack.c.bf16 %v4612_v54, %v4611_v13  ;;  %v4620_v46 = vld [vmem:[#allocation4 + $0x2d8] sm:$0xff] }
 0x57a   : > { %v4136_v37 = vsel %vm4104_vm1, %v4088_v52, %v4120_v49  ;;  %v4185_v60 = vrot.slane %v9408_v38, 7  ;;  %v4249_v29 = vrot.slane %v9408_v38, 1  ;;  %vm10033_vm1 = vmmov %vm10029_vm0  ;;  %v4614_v52 = vld [vmem:[#allocation4 + $0x2a8] sm:$0xff]  ;;  %v6499_v49 = vld [vmem:[%s7770_s19 + $0x20] sm:$0xff] }
 0x57b   : > { %v4183_v31 = vrot.slane %v4136_v37, 7  ;;  %v4247_v16 = vrot.slane %v4136_v37, 1  ;;  %5664 = vmatprep.mubr.f32.mxu0 %v4136_v37  ;;  %vm10035_vm10 = vmmov %vm10027_vm13  ;;  %v6500_v37 = vld [vmem:[%s7770_s19 + $0x38] sm:$0xff] }
 0x57c   : > { %5665 = vmatmul.mubr.f32.gmra.mrb[50].mxu0 %v9408_v38  ;;  %vm10037_vm6 = vmneg %vm7824_vm7  ;;  %v6504_v19 = vld [vmem:[%s7770_s19 + $0x58] sm:$0xff] }
 0x57d   : > { %5699 = vmatprep.mubr.msk.f32.mxu0 %vm10031_vm2, %v4203_v51  ;;  %v4184_v28 = vsel %vm10032_vm4, %v4181_v53, %v4183_v31  ;;  %v4186_v41 = vsel %vm10033_vm1, %v4183_v31, %v4185_v60  ;;  %v9428_v48 = vsel %vm10034_vm15, %v4245_v57, %v4247_v16  ;;  %v9433_v1 = vsel %vm10035_vm10, %v4247_v16, %v4249_v29  ;;  %v4615_v57 = vld [vmem:[#allocation4 + $0x2b0] sm:$0xff]  ;;  %vm10038_vm13 = vmneg %vm7828_vm8 }
 0x57e   : > { %v6355_v53 = vpack.c.bf16 %v4614_v52, %v4613_v11  ;;  %vm10039_vm7 = vmneg %vm7954_vm14  ;;  %vm10052_vm15 = vnez %v9804_v33 }
 0x57f   : > { %vm10040_vm8 = vmneg %vm7832_vm9 }
 0x580   : > { %5700 = vmatmul.mubr.f32.vlgmr.msra.gmra.mrb[36].mxu0 %v9298_v15  ;;  %v6359_v15 = vpack.c.bf16 %v4616_v8, %v4615_v57  ;;  %vm10041_vm14 = vmneg %vm9967_vm5  ;;  %v6505_v57 = vld [vmem:[%s7770_s19 + $0x50] sm:$0xff] }
 0x581   : > { %6350 = vmatpush3.bf16.msra.mxu0 %v9371_v34  ;;  %5702 = vmatprep.mubr.msk.f32.mxu0 %vm10037_vm6, %v9313_v50  ;;  %v4617_v34 = vld [vmem:[#allocation4 + $0x2c0] sm:$0xff]  ;;  %vm10042_vm9 = vmneg %vm9983_vm12  ;;  %vm10046_vm12 = vnez %v9892_v5  ;;  %vm10054_vm6 = vnez %v9978_v3 }
 0x582   : > { %6352 = vmatprep.subr.bf16.mxu0 %v6351_v58  ;;  %v6363_v50 = vpack.c.bf16 %v4618_v61, %v4617_v34  ;;  %vm10043_vm0 = vmneg %vm9991_vm3  ;;  %vm10048_vm3 = vnez %v9800_v6  ;;  %v9513_v6 = vld [vmem:[%s9579_s6 + $0x3] ss:$0 sm:$0xff] }
 0x583   : > { %vm10045_vm5 = vmneg %vm9891_vm11  ;;  %vm10050_vm11 = vnez %v9754_v10 }
 0x584   : > { %5703 = vmatmul.mubr.f32.gmra.mrb[38].mxu0 %v9316_v40  ;;  %v4619_v40 = vld [vmem:[#allocation4 + $0x2d0] sm:$0xff]  ;;  %vm10047_vm2 = vmneg %vm10046_vm12 }
 0x585   : > { %6354 = vmatpush3.bf16.msra.mxu0 %v6351_v58  ;;  %5705 = vmatprep.mubr.msk.f32.mxu0 %vm10038_vm13, %v9336_v47  ;;  %v6367_v56 = vpack.c.bf16 %v4620_v46, %v4619_v40  ;;  %v4621_v47 = vld [vmem:[#allocation4 + $0x2e0] sm:$0xff]  ;;  %vm10049_vm4 = vmneg %vm10048_vm3  ;;  %v6506_v40 = vld [vmem:[%s7770_s19 + $0x68] sm:$0xff] }
 0x586   : > { %6356 = vmatprep.subr.bf16.mxu0 %v6355_v53  ;;  %vm10051_vm1 = vmneg %vm10050_vm11 }
 0x587   : > { %vm10053_vm10 = vmneg %vm10052_vm15 }
 0x588   : > { %5706 = vmatmul.mubr.f32.gmra.mrb[40].mxu0 %v9339_v12  ;;  %v4622_v12 = vld [vmem:[#allocation4 + $0x2e8] sm:$0xff]  ;;  %vm10055_vm13 = vmneg %vm10054_vm6 }
 0x589   : > { %6358 = vmatpush3.bf16.msra.mxu0 %v6355_v53  ;;  %5708 = vmatprep.mubr.msk.f32.mxu0 %vm10039_vm7, %v9357_v27  ;;  %v6371_v23 = vpack.c.bf16 %v4622_v12, %v4621_v47  ;;  %v4623_v27 = vld [vmem:[#allocation4 + $0x2f0] sm:$0xff]  ;;  %vm10056_vm7 = vnez %v9989_v35  ;;  %v6494_v35 = vld [vmem:[%s7770_s19 + $0x8] sm:$0xff] }
 0x58a   : > { %6360 = vmatprep.subr.bf16.mxu0 %v6359_v15 }
 0x58c   : > { %5709 = vmatmul.mubr.f32.gmra.mrb[42].mxu0 %v9361_v4  ;;  %v4624_v4 = vld [vmem:[#allocation4 + $0x2f8] sm:$0xff] }
 0x58d   : > { %6362 = vmatpush3.bf16.msra.mxu0 %v6359_v15  ;;  %5711 = vmatprep.mubr.msk.f32.mxu0 %vm10040_vm8, %v9376_v30  ;;  %v6375_v32 = vpack.c.bf16 %v4624_v4, %v4623_v27  ;;  %vm10057_vm8 = vmneg %vm10056_vm7  ;;  %v6497_v30 = vld [vmem:[%s7770_s19 + $0x10] sm:$0xff] }
 0x58e   : > { %6364 = vmatprep.subr.bf16.mxu0 %v6363_v50 }
 0x590   : > { %5712 = vmatmul.mubr.f32.gmra.mrb[44].mxu0 %v9379_v18 }
 0x591   : > { %6366 = vmatpush3.bf16.msra.mxu0 %v6363_v50  ;;  %5714 = vmatprep.mubr.msk.f32.mxu0 %vm10041_vm14, %v9392_v44  ;;  %vm10058_vm14 = vcmask 1046528  }
 0x592   : > { %6368 = vmatprep.subr.bf16.mxu0 %v6367_v56  ;;  %v4267_v10 = vsel %vm10058_vm14, %v4249_v29, 0.0  ;;  %v6501_v29 = vld [vmem:[%s7770_s19 + $0x30] sm:$0xff] }
 0x594   : > { %5715 = vmatmul.mubr.f32.gmra.mrb[46].mxu0 %v9396_v39 }
 0x595   : > { %6370 = vmatpush3.bf16.msra.mxu0 %v6367_v56  ;;  %5717 = vmatprep.mubr.msk.f32.mxu0 %vm10042_vm9, %v4180_v17  ;;  %vm10059_vm9 = vnez %v9998_v0  ;;  %v6495_v0 = vld [vmem:[%s7770_s19] sm:$0xff] }
 0x596   : > { %6372 = vmatprep.subr.bf16.mxu0 %v6371_v23  ;;  %v6507_v56 = vld [vmem:[%s7770_s19 + $0x60] sm:$0xff] }
 0x598   : > { %5718 = vmatmul.mubr.f32.gmra.mrb[48].mxu0 %v4182_v7 }
 0x599   : > { %6374 = vmatpush3.bf16.msra.mxu0 %v6371_v23  ;;  %5720 = vmatprep.mubr.msk.f32.mxu0 %vm10043_vm0, %v4184_v28  ;;  %vm10060_vm0 = vmneg %vm10059_vm9 }
 0x59a   : > { %6376 = vmatprep.subr.bf16.mxu0 %v6375_v32 }
 0x59c   : > { %5721 = vmatmul.mubr.f32.gmra.mrb[50].mxu0 %v4186_v41  ;;  %v6503_v41 = vld [vmem:[%s7770_s19 + $0x40] sm:$0xff] }
 0x59d   : > { %6378 = vmatpush3.bf16.msra.mxu0 %v6375_v32  ;;  %5755 = vmatprep.mubr.f32.mxu0 %v9301_v14  ;;  %v6508_v32 = vld [vmem:[%s7770_s19 + $0x78] sm:$0xff] }
 0x5a0   : > { %5756 = vmatmul.mubr.msk.f32.vlgmr.msra.gmra.mrb[36].mxu0 %vm10045_vm5, %v9319_v62 }
 0x5a1   : > { %5758 = vmatprep.mubr.f32.mxu0 %v9325_v43 }
 0x5a4   : > { %5759 = vmatmul.mubr.msk.f32.gmra.mrb[38].mxu0 %vm10047_vm2, %v9348_v24 }
 0x5a5   : > { %5761 = vmatprep.mubr.f32.mxu0 %v9353_v20 }
 0x5a8   : > { %5762 = vmatmul.mubr.msk.f32.gmra.mrb[40].mxu0 %vm10049_vm4, %v9365_v21  ;;  %v6496_v21 = vld [vmem:[%s7770_s19 + $0x18] sm:$0xff] }
 0x5a9   : > { %5764 = vmatprep.mubr.f32.mxu0 %v9368_v2 }
 0x5ac   : > { %5765 = vmatmul.mubr.msk.f32.gmra.mrb[42].mxu0 %vm10051_vm1, %v9384_v36 }
 0x5ad   : > { %5767 = vmatprep.mubr.f32.mxu0 %v9388_v26 }
 0x5b0   : > { %5768 = vmatmul.mubr.msk.f32.gmra.mrb[44].mxu0 %vm10053_vm10, %v9399_v42  ;;  %v6498_v42 = vld [vmem:[%s7770_s19 + $0x28] sm:$0xff] }
 0x5b1   : > { %5770 = vmatprep.mubr.f32.mxu0 %v9404_v9 }
 0x5b4   : > { %5771 = vmatmul.mubr.msk.f32.gmra.mrb[46].mxu0 %vm10055_vm13, %v9411_v25 }
 0x5b5   : > { %5773 = vmatprep.mubr.f32.mxu0 %v9414_v59 }
 0x5b8   : > { %5774 = vmatmul.mubr.msk.f32.gmra.mrb[48].mxu0 %vm10057_vm8, %v9428_v48 }
 0x5b9   : > { %5776 = vmatprep.mubr.f32.mxu0 %v9433_v1 }
 0x5bc   : > { %5777 = vmatmul.mubr.msk.f32.gmra.mrb[50].mxu0 %vm10060_vm0, %v4267_v10  ;;  %v6509_v10 = vld [vmem:[%s7770_s19 + $0x70] sm:$0xff] }
 0x673   : > { %v5757_v33 = vpop.f32.mrb[36].mxu0 }
 0x674   : > { %v4793_v5 = vadd.f32 %v5757_v33, %v9513_v6  ;;  %v4691_v3 = vpop.f32.mrb[37].mxu0 }
 0x675   : > { %v4792_v63 = vadd.f32 %v9513_v6, %v4691_v3 }
 0x676   : > { %v4809_v45 = vadd.f32 %v6494_v35, %v4793_v5 }
 0x677   : > { %v4808_v14 = vadd.f32 %v6495_v0, %v4792_v63  ;;  %v5760_v62 = vpop.f32.mrb[38].mxu0 }
 0x678   : > { %4825 = vst [vmem:[%s9521_s11 + $0x8] sm:$0xff] %v4809_v45  ;;  %v4795_v43 = vadd.f32 %v5760_v62, %v9513_v6  ;;  %v4701_v24 = vpop.f32.mrb[39].mxu0 }
 0x679   : > { %4824 = vst [vmem:[%s9521_s11] sm:$0xff] %v4808_v14  ;;  %v4794_v20 = vadd.f32 %v9513_v6, %v4701_v24 }
 0x67a   : > { %v4811_v2 = vadd.f32 %v6496_v21, %v4795_v43 }
 0x67b   : > { %v4810_v18 = vadd.f32 %v6497_v30, %v4794_v20  ;;  %v5763_v36 = vpop.f32.mrb[40].mxu0 }
 0x67c   : > { %4827 = vst [vmem:[%s9521_s11 + $0x18] sm:$0xff] %v4811_v2  ;;  %v4797_v26 = vadd.f32 %v5763_v36, %v9513_v6  ;;  %v4711_v44 = vpop.f32.mrb[41].mxu0 }
 0x67d   : > { %4826 = vst [vmem:[%s9521_s11 + $0x10] sm:$0xff] %v4810_v18  ;;  %v4796_v39 = vadd.f32 %v9513_v6, %v4711_v44 }
 0x67e   : > { %v4813_v9 = vadd.f32 %v6498_v42, %v4797_v26 }
 0x67f   : > { %v4812_v17 = vadd.f32 %v6499_v49, %v4796_v39  ;;  %v5766_v7 = vpop.f32.mrb[42].mxu0 }
 0x680   : > { %4829 = vst [vmem:[%s9521_s11 + $0x28] sm:$0xff] %v4813_v9  ;;  %v4799_v38 = vadd.f32 %v5766_v7, %v9513_v6  ;;  %v4721_v25 = vpop.f32.mrb[43].mxu0 }
 0x681   : > { %4828 = vst [vmem:[%s9521_s11 + $0x20] sm:$0xff] %v4812_v17  ;;  %v4798_v59 = vadd.f32 %v9513_v6, %v4721_v25 }
 0x682   : > { %v4815_v60 = vadd.f32 %v6500_v37, %v4799_v38 }
 0x683   : > { %v4814_v31 = vadd.f32 %v6501_v29, %v4798_v59  ;;  %v5769_v16 = vpop.f32.mrb[44].mxu0 }
 0x684   : > { %4831 = vst [vmem:[%s9521_s11 + $0x38] sm:$0xff] %v4815_v60  ;;  %v4801_v13 = vadd.f32 %v5769_v16, %v9513_v6  ;;  %v4731_v54 = vpop.f32.mrb[45].mxu0 }
 0x685   : > { %4830 = vst [vmem:[%s9521_s11 + $0x30] sm:$0xff] %v4814_v31  ;;  %v4800_v51 = vadd.f32 %v9513_v6, %v4731_v54 }
 0x686   : > { %v4817_v28 = vadd.f32 %v6502_v55, %v4801_v13 }
 0x687   : > { %v4816_v48 = vadd.f32 %v6503_v41, %v4800_v51  ;;  %v5772_v1 = vpop.f32.mrb[46].mxu0 }
 0x688   : > { %4833 = vst [vmem:[%s9521_s11 + $0x48] sm:$0xff] %v4817_v28  ;;  %v4803_v58 = vadd.f32 %v5772_v1, %v9513_v6  ;;  %v4741_v11 = vpop.f32.mrb[47].mxu0 }
 0x689   : > { %4832 = vst [vmem:[%s9521_s11 + $0x40] sm:$0xff] %v4816_v48  ;;  %v4802_v52 = vadd.f32 %v9513_v6, %v4741_v11 }
 0x68a   : > { %v4819_v53 = vadd.f32 %v6504_v19, %v4803_v58 }
 0x68b   : > { %v4818_v8 = vadd.f32 %v6505_v57, %v4802_v52  ;;  %v5775_v15 = vpop.f32.mrb[48].mxu0 }
 0x68c   : > { %4835 = vst [vmem:[%s9521_s11 + $0x58] sm:$0xff] %v4819_v53  ;;  %v4805_v34 = vadd.f32 %v5775_v15, %v9513_v6  ;;  %v4751_v61 = vpop.f32.mrb[49].mxu0 }
 0x68d   : > { %4834 = vst [vmem:[%s9521_s11 + $0x50] sm:$0xff] %v4818_v8  ;;  %v4804_v50 = vadd.f32 %v9513_v6, %v4751_v61 }
 0x68e   : > { %v4821_v46 = vadd.f32 %v6506_v40, %v4805_v34 }
 0x68f   : > { %v4820_v47 = vadd.f32 %v6507_v56, %v4804_v50  ;;  %v5778_v12 = vpop.f32.mrb[50].mxu0 }
 0x690   : > { %4837 = vst [vmem:[%s9521_s11 + $0x68] sm:$0xff] %v4821_v46  ;;  %v4807_v23 = vadd.f32 %v5778_v12, %v9513_v6  ;;  %v4761_v27 = vpop.f32.mrb[51].mxu0 }
 0x691   : > { %4836 = vst [vmem:[%s9521_s11 + $0x60] sm:$0xff] %v4820_v47  ;;  %v4806_v4 = vadd.f32 %v9513_v6, %v4761_v27 }
 0x692   : > { %v4823_v22 = vadd.f32 %v6508_v32, %v4807_v23 }
 0x693   : > { %v4822_v33 = vadd.f32 %v6509_v10, %v4806_v4 }
 0x694   : > { %4839 = vst [vmem:[%s9521_s11 + $0x78] sm:$0xff] %v4823_v22 }
 0x695   : > { %4838 = vst [vmem:[%s9521_s11 + $0x70] sm:$0xff] %v4822_v33 }
 0x696 PF: > { %s19_s24 = sadd.s32 1, %s6580_s24  }
 0x697   : > { %p16_p10 = scmp.ge.s32.totalorder %s19_s24, 4  }
 0x699   :  { %18 = sbr.rel (!%p16_p10) target bundleno = 2 (0x2), region = 99 }
 0x6a0   :  { %4862 = vsyncpa [#allocation3], 1 }
 0x6a1   :  { %4864 = vsyncpa [#allocation3 + $0x1], 1 }
 0x6a2   :  { %4865 = vsyncpa [#allocation5], 1 }

</bundles_post_ra>
